<compile_context>
chip_gen: v6e
topology: v6e:2x2x1
jax: 0.10.0
libtpu: 0.0.40
codegen_flags: <defaults>
</compile_context>

<pallas_src>
import math
import functools

import jax
import jax.numpy as jnp
from jax import lax
from jax.experimental import pallas as pl
from jax.experimental.pallas import tpu as pltpu

OUT_CLASSES = 5
OUT_PAD = 128   # pad classes to a full lane tile -> unmasked vst on the output


def mtan_kernel(time_ref, x_ref, mask_ref, qp_ref,
                w_emb_ref, b_emb_ref, wk_ref, bk_ref,
                wox_ref, wom_ref, bo_ref, out_ref):
    Bt, S, _ = x_ref.shape                 # (Bt, S, input_dim)
    H, Lq, ek = qp_ref.shape               # pre-scaled query projection, per head
    E = w_emb_ref.shape[1]

    # ---- key-side time embedding + K projection, one matmul with M = Bt*S ----
    t = time_ref[...]                                              # (Bt*S, 1)
    raw = t * w_emb_ref[...] + b_emb_ref[...]                      # (Bt*S, E)
    col = lax.broadcasted_iota(jnp.int32, (1, E), 1)
    k_emb = jnp.where(col == 0, raw, jnp.sin(raw))                 # chan0: linear, rest: sin(periodic)
    k_proj = jnp.dot(k_emb, wk_ref[...],
                     preferred_element_type=jnp.float32) + bk_ref[...]  # (Bt*S, E)

    bo = bo_ref[...]                                               # (1, OUT_PAD)

    # hoist per-head constants out of the batch loop (loaded once per grid step)
    q_heads = [qp_ref[h] for h in range(H)]                        # each (Lq, ek)
    wox_heads = [wox_ref[h] for h in range(H)]                     # each (I, OUT_PAD)
    wom_heads = [wom_ref[h] for h in range(H)]                     # each (I, OUT_PAD)

    for b in range(Bt):                                            # static unroll over batch tile
        xb = x_ref[b]                                              # (S, I)
        mb = mask_ref[b]                                           # (S, I)
        ind = (mb != 0).astype(jnp.float32)                        # attention-mask indicator
        mval_x = ind * xb                                          # masked value, x half
        mval_m = ind * mb                                          # masked value, mask half
        # Fully-masked channel fallback: reference degrades to a uniform mean over S.
        fb_x = jnp.mean(xb, axis=0, keepdims=True)                 # (1, I)
        fb_m = jnp.mean(mb, axis=0, keepdims=True)                 # (1, I)

        kpb = k_proj[b * S:(b + 1) * S, :]                         # (S, E), static sublane slice

        acc = jnp.zeros((Lq, bo.shape[1]), jnp.float32)            # (Lq, OUT_PAD) accumulator
        for h in range(H):                                         # static unroll over heads
            qh = q_heads[h]                                        # (Lq, ek), scale folded in
            kh = kpb[:, h * ek:(h + 1) * ek]                       # (S, ek), static lane slice
            sc = lax.dot_general(qh, kh, (((1,), (1,)), ((), ())),
                                 preferred_element_type=jnp.float32)          # (Lq, S)
            # matmul-factored masked softmax: never builds the (Lq, S, D) tensor
            e = jnp.exp(sc - jnp.max(sc, axis=1, keepdims=True))               # (Lq, S)
            num_x = jnp.dot(e, mval_x, preferred_element_type=jnp.float32)     # (Lq, I)
            num_m = jnp.dot(e, mval_m, preferred_element_type=jnp.float32)     # (Lq, I)
            den = jnp.dot(e, ind, preferred_element_type=jnp.float32)          # (Lq, I)
            ok = den > 0.0
            inv = 1.0 / jnp.where(ok, den, 1.0)
            head_x = jnp.where(ok, num_x * inv, fb_x)
            head_m = jnp.where(ok, num_m * inv, fb_m)
            # per-head accumulation into the (padded) output projection — no lane concat
            acc = acc + jnp.dot(head_x, wox_heads[h], preferred_element_type=jnp.float32)
            acc = acc + jnp.dot(head_m, wom_heads[h], preferred_element_type=jnp.float32)

        out_ref[b] = acc + bo


def _choose_block_b(B, max_bt=8):
    """Largest batch tile <= max_bt dividing B, preferring >= 2 grid steps
    (keeps both v7x TensorCores busy).  Re-derive max_bt from VMEM for big shapes."""
    cands = [bt for bt in range(1, min(B, max_bt) + 1) if B % bt == 0]
    multi = [bt for bt in cands if B // bt >= 2]
    return max(multi) if multi else max(cands)


def mtan_forward(x, time_steps, mask, query_times, params, num_heads, block_b=None):
    B, S, I = x.shape
    E = params["w_emb"].shape[1]
    H = num_heads
    assert E % H == 0
    ek = E // H
    Lq = query_times.shape[0]
    D = 2 * I

    # ---- batch-independent query path, hoisted out of the kernel (scale folded in) ----
    qt = query_times[:, None].astype(jnp.float32)                  # (Lq, 1)
    raw_q = qt * params["w_emb"] + params["b_emb"]                 # (Lq, E)
    q_emb = jnp.concatenate([raw_q[:, :1], jnp.sin(raw_q[:, 1:])], axis=1)
    q_proj = (q_emb @ params["wq_t"] + params["bq"]) * (1.0 / math.sqrt(ek))
    qp = q_proj.reshape(Lq, H, ek).transpose(1, 0, 2)              # (H, Lq, ek)

    # ---- output projection: per head, per value-half, classes padded to OUT_PAD ----
    wo3 = params["wo_t"].reshape(H, D, OUT_CLASSES)                # rows: [head][x-half ++ mask-half]
    wo3 = jnp.pad(wo3, ((0, 0), (0, 0), (0, OUT_PAD - OUT_CLASSES)))
    wo_x = wo3[:, :I, :]                                           # (H, I, OUT_PAD)
    wo_m = wo3[:, I:, :]                                           # (H, I, OUT_PAD)
    bo_pad = jnp.pad(params["bo"], ((0, 0), (0, OUT_PAD - OUT_CLASSES)))   # (1, OUT_PAD)

    # time rows flattened so the per-step block is (Bt*S, 1) with no in-kernel reshape
    t_rows = time_steps.reshape(B * S, 1).astype(jnp.float32)

    Bt = block_b if block_b is not None else _choose_block_b(B)
    assert B % Bt == 0
    G = B // Bt

    grid_spec = pltpu.PrefetchScalarGridSpec(
        num_scalar_prefetch=0,
        grid=(G,),
        in_specs=[
            pl.BlockSpec((Bt * S, 1), lambda g: (g, 0)),           # time rows for this batch tile
            pl.BlockSpec((Bt, S, I), lambda g: (g, 0, 0)),         # x
            pl.BlockSpec((Bt, S, I), lambda g: (g, 0, 0)),         # mask (shipped once)
            pl.BlockSpec((H, Lq, ek), lambda g: (0, 0, 0)),        # pre-scaled q projection
            pl.BlockSpec((1, E), lambda g: (0, 0)),                # fused time-embed weight
            pl.BlockSpec((1, E), lambda g: (0, 0)),                # fused time-embed bias
            pl.BlockSpec((E, E), lambda g: (0, 0)),                # Wk^T
            pl.BlockSpec((1, E), lambda g: (0, 0)),                # bk
            pl.BlockSpec((H, I, OUT_PAD), lambda g: (0, 0, 0)),    # Wout, x half (padded)
            pl.BlockSpec((H, I, OUT_PAD), lambda g: (0, 0, 0)),    # Wout, mask half (padded)
            pl.BlockSpec((1, OUT_PAD), lambda g: (0, 0)),          # bout (padded)
        ],
        out_specs=pl.BlockSpec((Bt, Lq, OUT_PAD), lambda g: (g, 0, 0)),
    )

    out_padded = pl.pallas_call(
        mtan_kernel,
        out_shape=jax.ShapeDtypeStruct((B, Lq, OUT_PAD), jnp.float32),
        grid_spec=grid_spec,
        compiler_params=pltpu.CompilerParams(
            dimension_semantics=("parallel",)),
    )(t_rows, x, mask, qp,
      params["w_emb"], params["b_emb"], params["wk_t"], params["bk"],
      wo_x, wo_m, bo_pad)

    return out_padded[:, :, :OUT_CLASSES]


def mtan_reference(x, time_steps, mask, query_times, p, H):
    """Pure-JAX reference mirroring the PyTorch forward (broadcast masked softmax)."""
    x_cat = jnp.concatenate([x, mask], 2)
    mask2 = jnp.concatenate([mask, mask], 2)

    def embed(t):
        t = t[..., None]
        raw = t * p["w_emb"][0] + p["b_emb"][0]
        return jnp.concatenate([raw[..., :1], jnp.sin(raw[..., 1:])], -1)

    key = embed(time_steps)                     # (B, S, E)
    query = embed(query_times[None, :])         # (1, Lq, E)
    E = key.shape[-1]
    ek = E // H
    B, S, D = x_cat.shape
    Lq = query.shape[1]

    qp = (query @ p["wq_t"] + p["bq"][0]).reshape(1, Lq, H, ek).transpose(0, 2, 1, 3)
    kp = (key @ p["wk_t"] + p["bk"][0]).reshape(B, S, H, ek).transpose(0, 2, 1, 3)

    scores = jnp.einsum("xhqe,bhse->bhqs", qp, kp) / jnp.sqrt(float(ek))
    scores = jnp.broadcast_to(scores[..., None], (B, H, Lq, S, D))
    scores = jnp.where(mask2[:, None, None, :, :] == 0, -1e9, scores)
    pa = jax.nn.softmax(scores, axis=-2)
    out = jnp.sum(pa * x_cat[:, None, None, :, :], axis=-2)     # (B, H, Lq, D)
    out = out.transpose(0, 2, 1, 3).reshape(B, Lq, H * D)
    return out @ p["wo_t"] + p["bo"][0]


if __name__ == "__main__":
    # small shapes consistent with the module
    B, S, input_dim = 8, 8, 4
    E, H, Lq = 32, 4, 8          # embed_time, num_heads, len(self.query)
    D = 2 * input_dim

    key = jax.random.PRNGKey(0)
    keys = jax.random.split(key, 12)

    x = jax.random.normal(keys[0], (B, S, input_dim), jnp.float32)
    mask = (jax.random.uniform(keys[1], (B, S, input_dim)) > 0.3).astype(jnp.float32)
    time_steps = jax.random.uniform(keys[2], (B, S), jnp.float32)
    query_times = jnp.linspace(0.0, 1.0, Lq, dtype=jnp.float32)

    # deterministic synthetic parameters (PyTorch-layout shapes, folded / pre-transposed)
    w_lin = 0.5 * jax.random.normal(keys[3], (1,), jnp.float32)       # Linear(1, 1).weight
    b_lin = 0.1 * jax.random.normal(keys[4], (1,), jnp.float32)
    w_per = 0.5 * jax.random.normal(keys[5], (E - 1,), jnp.float32)   # Linear(1, E-1).weight
    b_per = 0.1 * jax.random.normal(keys[6], (E - 1,), jnp.float32)

    wq = 0.2 * jax.random.normal(keys[7], (E, E), jnp.float32)        # Linear(E, E).weight
    bq = 0.1 * jax.random.normal(keys[8], (E,), jnp.float32)
    wk = 0.2 * jax.random.normal(keys[9], (E, E), jnp.float32)
    bk = 0.1 * jax.random.normal(keys[10], (E,), jnp.float32)
    wo = 0.2 * jax.random.normal(keys[11], (5, H * D), jnp.float32)   # Linear(H*D, 5).weight
    bo = jnp.arange(5, dtype=jnp.float32) * 0.01

    params = {
        "w_emb": jnp.concatenate([w_lin, w_per])[None, :],   # (1, E)
        "b_emb": jnp.concatenate([b_lin, b_per])[None, :],   # (1, E)
        "wq_t": wq.T, "bq": bq[None, :],
        "wk_t": wk.T, "bk": bk[None, :],
        "wo_t": wo.T, "bo": bo[None, :],
    }

    out = jax.jit(functools.partial(mtan_forward, num_heads=H))(
        x, time_steps, mask, query_times, params)
    out = jax.block_until_ready(out)

    ref = mtan_reference(x, time_steps, mask, query_times, params, H)
    assert out.shape == (B, Lq, 5)
    assert jnp.allclose(out, ref, rtol=1e-3, atol=1e-3), (
        f"max abs diff {jnp.max(jnp.abs(out - ref))}")

    print("KERNEL_OK")
</pallas_src>

<mosaic_0001>
module attributes {stable_mosaic.version = 11 : i64} {
  func.func @mtan_kernel(%arg0: i32, %arg1: memref<32x1xf32, #tpu.memory_space<vmem>>, %arg2: memref<4x8x4xf32, #tpu.memory_space<vmem>>, %arg3: memref<4x8x4xf32, #tpu.memory_space<vmem>>, %arg4: memref<4x8x8xf32, #tpu.memory_space<vmem>>, %arg5: memref<1x32xf32, #tpu.memory_space<vmem>>, %arg6: memref<1x32xf32, #tpu.memory_space<vmem>>, %arg7: memref<32x32xf32, #tpu.memory_space<vmem>>, %arg8: memref<1x32xf32, #tpu.memory_space<vmem>>, %arg9: memref<4x4x128xf32, #tpu.memory_space<vmem>>, %arg10: memref<4x4x128xf32, #tpu.memory_space<vmem>>, %arg11: memref<1x128xf32, #tpu.memory_space<vmem>>, %arg12: memref<4x8x128xf32, #tpu.memory_space<vmem>>) attributes {dimension_semantics = [#tpu.dimension_semantics<parallel>], iteration_bounds = array<i64: 2>, scalar_prefetch = 0 : i64, scratch_operands = 0 : i64, tpu.core_type = #tpu.core_type<tc>, window_params = [{transform_indices = @transform_0, window_bounds = array<i64: 32, 1>}, {transform_indices = @transform_1, window_bounds = array<i64: 4, 8, 4>}, {transform_indices = @transform_2, window_bounds = array<i64: 4, 8, 4>}, {pipeline_mode = #tpu.pipeline_mode<synchronous>, transform_indices = @transform_3, window_bounds = array<i64: 4, 8, 8>}, {pipeline_mode = #tpu.pipeline_mode<synchronous>, transform_indices = @transform_4, window_bounds = array<i64: 1, 32>}, {pipeline_mode = #tpu.pipeline_mode<synchronous>, transform_indices = @transform_5, window_bounds = array<i64: 1, 32>}, {pipeline_mode = #tpu.pipeline_mode<synchronous>, transform_indices = @transform_6, window_bounds = array<i64: 32, 32>}, {pipeline_mode = #tpu.pipeline_mode<synchronous>, transform_indices = @transform_7, window_bounds = array<i64: 1, 32>}, {pipeline_mode = #tpu.pipeline_mode<synchronous>, transform_indices = @transform_8, window_bounds = array<i64: 4, 4, 128>}, {pipeline_mode = #tpu.pipeline_mode<synchronous>, transform_indices = @transform_9, window_bounds = array<i64: 4, 4, 128>}, {pipeline_mode = #tpu.pipeline_mode<synchronous>, transform_indices = @transform_10, window_bounds = array<i64: 1, 128>}, {transform_indices = @transform_11, window_bounds = array<i64: 4, 8, 128>}]} {
    %c0 = arith.constant 0 : index
    %c0_0 = arith.constant 0 : index
    %0 = vector.load %arg1[%c0, %c0_0] : memref<32x1xf32, #tpu.memory_space<vmem>>, vector<32x1xf32>
    %c0_1 = arith.constant 0 : index
    %c0_2 = arith.constant 0 : index
    %1 = vector.load %arg5[%c0_1, %c0_2] : memref<1x32xf32, #tpu.memory_space<vmem>>, vector<1x32xf32>
    %2 = vector.broadcast %0 : vector<32x1xf32> to vector<32x32xf32>
    %3 = vector.broadcast %1 : vector<1x32xf32> to vector<32x32xf32>
    %4 = arith.mulf %2, %3 : vector<32x32xf32>
    %c0_3 = arith.constant 0 : index
    %c0_4 = arith.constant 0 : index
    %5 = vector.load %arg6[%c0_3, %c0_4] : memref<1x32xf32, #tpu.memory_space<vmem>>, vector<1x32xf32>
    %6 = vector.broadcast %5 : vector<1x32xf32> to vector<32x32xf32>
    %7 = arith.addf %4, %6 : vector<32x32xf32>
    %8 = tpu.iota {dimensions = array<i32: 1>} : vector<1x32xi32>
    %c0_i32 = arith.constant 0 : i32
    %9 = vector.broadcast %c0_i32 : i32 to vector<1x32xi32>
    %10 = arith.cmpi eq, %8, %9 : vector<1x32xi32>
    %11 = math.sin %7 : vector<32x32xf32>
    %12 = vector.shape_cast %10 : vector<1x32xi1> to vector<1x32xi1>
    %13 = vector.broadcast %12 : vector<1x32xi1> to vector<32x32xi1>
    %14 = arith.select %13, %7, %11 : vector<32x32xi1>, vector<32x32xf32>
    %c0_5 = arith.constant 0 : index
    %c0_6 = arith.constant 0 : index
    %15 = vector.load %arg7[%c0_5, %c0_6] : memref<32x32xf32, #tpu.memory_space<vmem>>, vector<32x32xf32>
    %cst = arith.constant dense<0.000000e+00> : vector<32x32xf32>
    %16 = tpu.matmul %14, %15, %cst {dimension_numbers = #tpu.dot_dimension_numbers<[1], [0], [0], [1], [0, 0, 1, 1], [], []>} : vector<32x32xf32>, vector<32x32xf32>, vector<32x32xf32> -> vector<32x32xf32>
    %c0_7 = arith.constant 0 : index
    %c0_8 = arith.constant 0 : index
    %17 = vector.load %arg8[%c0_7, %c0_8] : memref<1x32xf32, #tpu.memory_space<vmem>>, vector<1x32xf32>
    %18 = vector.broadcast %17 : vector<1x32xf32> to vector<32x32xf32>
    %19 = arith.addf %16, %18 : vector<32x32xf32>
    %c0_9 = arith.constant 0 : index
    %c0_10 = arith.constant 0 : index
    %20 = vector.load %arg11[%c0_9, %c0_10] : memref<1x128xf32, #tpu.memory_space<vmem>>, vector<1x128xf32>
    %c0_11 = arith.constant 0 : index
    %c0_12 = arith.constant 0 : index
    %c0_13 = arith.constant 0 : index
    %21 = vector.load %arg4[%c0_11, %c0_12, %c0_13] : memref<4x8x8xf32, #tpu.memory_space<vmem>>, vector<1x8x8xf32>
    %22 = vector.shape_cast %21 : vector<1x8x8xf32> to vector<8x8xf32>
    %c1 = arith.constant 1 : index
    %c0_14 = arith.constant 0 : index
    %c0_15 = arith.constant 0 : index
    %23 = vector.load %arg4[%c1, %c0_14, %c0_15] : memref<4x8x8xf32, #tpu.memory_space<vmem>>, vector<1x8x8xf32>
    %24 = vector.shape_cast %23 : vector<1x8x8xf32> to vector<8x8xf32>
    %c2 = arith.constant 2 : index
    %c0_16 = arith.constant 0 : index
    %c0_17 = arith.constant 0 : index
    %25 = vector.load %arg4[%c2, %c0_16, %c0_17] : memref<4x8x8xf32, #tpu.memory_space<vmem>>, vector<1x8x8xf32>
    %26 = vector.shape_cast %25 : vector<1x8x8xf32> to vector<8x8xf32>
    %c3 = arith.constant 3 : index
    %c0_18 = arith.constant 0 : index
    %c0_19 = arith.constant 0 : index
    %27 = vector.load %arg4[%c3, %c0_18, %c0_19] : memref<4x8x8xf32, #tpu.memory_space<vmem>>, vector<1x8x8xf32>
    %28 = vector.shape_cast %27 : vector<1x8x8xf32> to vector<8x8xf32>
    %c0_20 = arith.constant 0 : index
    %c0_21 = arith.constant 0 : index
    %c0_22 = arith.constant 0 : index
    %29 = vector.load %arg9[%c0_20, %c0_21, %c0_22] : memref<4x4x128xf32, #tpu.memory_space<vmem>>, vector<1x4x128xf32>
    %30 = vector.shape_cast %29 : vector<1x4x128xf32> to vector<4x128xf32>
    %c1_23 = arith.constant 1 : index
    %c0_24 = arith.constant 0 : index
    %c0_25 = arith.constant 0 : index
    %31 = vector.load %arg9[%c1_23, %c0_24, %c0_25] : memref<4x4x128xf32, #tpu.memory_space<vmem>>, vector<1x4x128xf32>
    %32 = vector.shape_cast %31 : vector<1x4x128xf32> to vector<4x128xf32>
    %c2_26 = arith.constant 2 : index
    %c0_27 = arith.constant 0 : index
    %c0_28 = arith.constant 0 : index
    %33 = vector.load %arg9[%c2_26, %c0_27, %c0_28] : memref<4x4x128xf32, #tpu.memory_space<vmem>>, vector<1x4x128xf32>
    %34 = vector.shape_cast %33 : vector<1x4x128xf32> to vector<4x128xf32>
    %c3_29 = arith.constant 3 : index
    %c0_30 = arith.constant 0 : index
    %c0_31 = arith.constant 0 : index
    %35 = vector.load %arg9[%c3_29, %c0_30, %c0_31] : memref<4x4x128xf32, #tpu.memory_space<vmem>>, vector<1x4x128xf32>
    %36 = vector.shape_cast %35 : vector<1x4x128xf32> to vector<4x128xf32>
    %c0_32 = arith.constant 0 : index
    %c0_33 = arith.constant 0 : index
    %c0_34 = arith.constant 0 : index
    %37 = vector.load %arg10[%c0_32, %c0_33, %c0_34] : memref<4x4x128xf32, #tpu.memory_space<vmem>>, vector<1x4x128xf32>
    %38 = vector.shape_cast %37 : vector<1x4x128xf32> to vector<4x128xf32>
    %c1_35 = arith.constant 1 : index
    %c0_36 = arith.constant 0 : index
    %c0_37 = arith.constant 0 : index
    %39 = vector.load %arg10[%c1_35, %c0_36, %c0_37] : memref<4x4x128xf32, #tpu.memory_space<vmem>>, vector<1x4x128xf32>
    %40 = vector.shape_cast %39 : vector<1x4x128xf32> to vector<4x128xf32>
    %c2_38 = arith.constant 2 : index
    %c0_39 = arith.constant 0 : index
    %c0_40 = arith.constant 0 : index
    %41 = vector.load %arg10[%c2_38, %c0_39, %c0_40] : memref<4x4x128xf32, #tpu.memory_space<vmem>>, vector<1x4x128xf32>
    %42 = vector.shape_cast %41 : vector<1x4x128xf32> to vector<4x128xf32>
    %c3_41 = arith.constant 3 : index
    %c0_42 = arith.constant 0 : index
    %c0_43 = arith.constant 0 : index
    %43 = vector.load %arg10[%c3_41, %c0_42, %c0_43] : memref<4x4x128xf32, #tpu.memory_space<vmem>>, vector<1x4x128xf32>
    %44 = vector.shape_cast %43 : vector<1x4x128xf32> to vector<4x128xf32>
    %c0_44 = arith.constant 0 : index
    %c0_45 = arith.constant 0 : index
    %c0_46 = arith.constant 0 : index
    %45 = vector.load %arg2[%c0_44, %c0_45, %c0_46] : memref<4x8x4xf32, #tpu.memory_space<vmem>>, vector<1x8x4xf32>
    %46 = vector.shape_cast %45 : vector<1x8x4xf32> to vector<8x4xf32>
    %c0_47 = arith.constant 0 : index
    %c0_48 = arith.constant 0 : index
    %c0_49 = arith.constant 0 : index
    %47 = vector.load %arg3[%c0_47, %c0_48, %c0_49] : memref<4x8x4xf32, #tpu.memory_space<vmem>>, vector<1x8x4xf32>
    %48 = vector.shape_cast %47 : vector<1x8x4xf32> to vector<8x4xf32>
    %cst_50 = arith.constant 0.000000e+00 : f32
    %49 = vector.broadcast %cst_50 : f32 to vector<8x4xf32>
    %50 = arith.cmpf one, %48, %49 : vector<8x4xf32>
    %51 = arith.extui %50 : vector<8x4xi1> to vector<8x4xi32>
    %52 = arith.sitofp %51 : vector<8x4xi32> to vector<8x4xf32>
    %53 = arith.mulf %52, %46 : vector<8x4xf32>
    %54 = arith.mulf %52, %48 : vector<8x4xf32>
    %cst_51 = arith.constant dense<0.000000e+00> : vector<4xf32>
    %55 = vector.multi_reduction <add>, %46, %cst_51 [0] : vector<8x4xf32> to vector<4xf32>
    %56 = vector.shape_cast %55 : vector<4xf32> to vector<1x4xf32>
    %cst_52 = arith.constant 8.000000e+00 : f32
    %57 = vector.broadcast %cst_52 : f32 to vector<1x4xf32>
    %58 = arith.divf %56, %57 : vector<1x4xf32>
    %cst_53 = arith.constant dense<0.000000e+00> : vector<4xf32>
    %59 = vector.multi_reduction <add>, %48, %cst_53 [0] : vector<8x4xf32> to vector<4xf32>
    %60 = vector.shape_cast %59 : vector<4xf32> to vector<1x4xf32>
    %cst_54 = arith.constant 8.000000e+00 : f32
    %61 = vector.broadcast %cst_54 : f32 to vector<1x4xf32>
    %62 = arith.divf %60, %61 : vector<1x4xf32>
    %63 = vector.extract_strided_slice %19 {offsets = [0, 0], sizes = [8, 32], strides = [1, 1]} : vector<32x32xf32> to vector<8x32xf32>
    %cst_55 = arith.constant 0.000000e+00 : f32
    %64 = vector.broadcast %cst_55 : f32 to vector<8x128xf32>
    %65 = vector.extract_strided_slice %63 {offsets = [0, 0], sizes = [8, 8], strides = [1, 1]} : vector<8x32xf32> to vector<8x8xf32>
    %cst_56 = arith.constant dense<0.000000e+00> : vector<8x8xf32>
    %66 = tpu.matmul %22, %65, %cst_56 {dimension_numbers = #tpu.dot_dimension_numbers<[1], [1], [0], [0], [0, 0, 1, 0], [], []>} : vector<8x8xf32>, vector<8x8xf32>, vector<8x8xf32> -> vector<8x8xf32>
    %cst_57 = arith.constant dense<0xFF800000> : vector<8xf32>
    %67 = vector.multi_reduction <maximumf>, %66, %cst_57 [1] : vector<8x8xf32> to vector<8xf32>
    %68 = vector.shape_cast %67 : vector<8xf32> to vector<8x1xf32>
    %69 = vector.broadcast %68 : vector<8x1xf32> to vector<8x8xf32>
    %70 = arith.subf %66, %69 : vector<8x8xf32>
    %71 = math.exp %70 : vector<8x8xf32>
    %cst_58 = arith.constant dense<0.000000e+00> : vector<8x4xf32>
    %72 = tpu.matmul %71, %53, %cst_58 {dimension_numbers = #tpu.dot_dimension_numbers<[1], [0], [0], [1], [0, 0, 1, 1], [], []>} : vector<8x8xf32>, vector<8x4xf32>, vector<8x4xf32> -> vector<8x4xf32>
    %cst_59 = arith.constant dense<0.000000e+00> : vector<8x4xf32>
    %73 = tpu.matmul %71, %54, %cst_59 {dimension_numbers = #tpu.dot_dimension_numbers<[1], [0], [0], [1], [0, 0, 1, 1], [], []>} : vector<8x8xf32>, vector<8x4xf32>, vector<8x4xf32> -> vector<8x4xf32>
    %cst_60 = arith.constant dense<0.000000e+00> : vector<8x4xf32>
    %74 = tpu.matmul %71, %52, %cst_60 {dimension_numbers = #tpu.dot_dimension_numbers<[1], [0], [0], [1], [0, 0, 1, 1], [], []>} : vector<8x8xf32>, vector<8x4xf32>, vector<8x4xf32> -> vector<8x4xf32>
    %cst_61 = arith.constant 0.000000e+00 : f32
    %75 = vector.broadcast %cst_61 : f32 to vector<8x4xf32>
    %76 = arith.cmpf ogt, %74, %75 : vector<8x4xf32>
    %cst_62 = arith.constant 1.000000e+00 : f32
    %77 = vector.broadcast %cst_62 : f32 to vector<8x4xf32>
    %78 = arith.select %76, %74, %77 : vector<8x4xi1>, vector<8x4xf32>
    %cst_63 = arith.constant 1.000000e+00 : f32
    %79 = vector.broadcast %cst_63 : f32 to vector<8x4xf32>
    %80 = arith.divf %79, %78 : vector<8x4xf32>
    %81 = arith.mulf %72, %80 : vector<8x4xf32>
    %82 = vector.shape_cast %58 : vector<1x4xf32> to vector<1x4xf32>
    %83 = vector.broadcast %82 : vector<1x4xf32> to vector<8x4xf32>
    %84 = arith.select %76, %81, %83 : vector<8x4xi1>, vector<8x4xf32>
    %85 = arith.mulf %73, %80 : vector<8x4xf32>
    %86 = vector.shape_cast %62 : vector<1x4xf32> to vector<1x4xf32>
    %87 = vector.broadcast %86 : vector<1x4xf32> to vector<8x4xf32>
    %88 = arith.select %76, %85, %87 : vector<8x4xi1>, vector<8x4xf32>
    %cst_64 = arith.constant dense<0.000000e+00> : vector<8x128xf32>
    %89 = tpu.matmul %84, %30, %cst_64 {dimension_numbers = #tpu.dot_dimension_numbers<[1], [0], [0], [1], [0, 0, 1, 1], [], []>} : vector<8x4xf32>, vector<4x128xf32>, vector<8x128xf32> -> vector<8x128xf32>
    %90 = arith.addf %64, %89 : vector<8x128xf32>
    %cst_65 = arith.constant dense<0.000000e+00> : vector<8x128xf32>
    %91 = tpu.matmul %88, %38, %cst_65 {dimension_numbers = #tpu.dot_dimension_numbers<[1], [0], [0], [1], [0, 0, 1, 1], [], []>} : vector<8x4xf32>, vector<4x128xf32>, vector<8x128xf32> -> vector<8x128xf32>
    %92 = arith.addf %90, %91 : vector<8x128xf32>
    %93 = vector.extract_strided_slice %63 {offsets = [0, 8], sizes = [8, 8], strides = [1, 1]} : vector<8x32xf32> to vector<8x8xf32>
    %cst_66 = arith.constant dense<0.000000e+00> : vector<8x8xf32>
    %94 = tpu.matmul %24, %93, %cst_66 {dimension_numbers = #tpu.dot_dimension_numbers<[1], [1], [0], [0], [0, 0, 1, 0], [], []>} : vector<8x8xf32>, vector<8x8xf32>, vector<8x8xf32> -> vector<8x8xf32>
    %cst_67 = arith.constant dense<0xFF800000> : vector<8xf32>
    %95 = vector.multi_reduction <maximumf>, %94, %cst_67 [1] : vector<8x8xf32> to vector<8xf32>
    %96 = vector.shape_cast %95 : vector<8xf32> to vector<8x1xf32>
    %97 = vector.broadcast %96 : vector<8x1xf32> to vector<8x8xf32>
    %98 = arith.subf %94, %97 : vector<8x8xf32>
    %99 = math.exp %98 : vector<8x8xf32>
    %cst_68 = arith.constant dense<0.000000e+00> : vector<8x4xf32>
    %100 = tpu.matmul %99, %53, %cst_68 {dimension_numbers = #tpu.dot_dimension_numbers<[1], [0], [0], [1], [0, 0, 1, 1], [], []>} : vector<8x8xf32>, vector<8x4xf32>, vector<8x4xf32> -> vector<8x4xf32>
    %cst_69 = arith.constant dense<0.000000e+00> : vector<8x4xf32>
    %101 = tpu.matmul %99, %54, %cst_69 {dimension_numbers = #tpu.dot_dimension_numbers<[1], [0], [0], [1], [0, 0, 1, 1], [], []>} : vector<8x8xf32>, vector<8x4xf32>, vector<8x4xf32> -> vector<8x4xf32>
    %cst_70 = arith.constant dense<0.000000e+00> : vector<8x4xf32>
    %102 = tpu.matmul %99, %52, %cst_70 {dimension_numbers = #tpu.dot_dimension_numbers<[1], [0], [0], [1], [0, 0, 1, 1], [], []>} : vector<8x8xf32>, vector<8x4xf32>, vector<8x4xf32> -> vector<8x4xf32>
    %cst_71 = arith.constant 0.000000e+00 : f32
    %103 = vector.broadcast %cst_71 : f32 to vector<8x4xf32>
    %104 = arith.cmpf ogt, %102, %103 : vector<8x4xf32>
    %cst_72 = arith.constant 1.000000e+00 : f32
    %105 = vector.broadcast %cst_72 : f32 to vector<8x4xf32>
    %106 = arith.select %104, %102, %105 : vector<8x4xi1>, vector<8x4xf32>
    %cst_73 = arith.constant 1.000000e+00 : f32
    %107 = vector.broadcast %cst_73 : f32 to vector<8x4xf32>
    %108 = arith.divf %107, %106 : vector<8x4xf32>
    %109 = arith.mulf %100, %108 : vector<8x4xf32>
    %110 = vector.shape_cast %58 : vector<1x4xf32> to vector<1x4xf32>
    %111 = vector.broadcast %110 : vector<1x4xf32> to vector<8x4xf32>
    %112 = arith.select %104, %109, %111 : vector<8x4xi1>, vector<8x4xf32>
    %113 = arith.mulf %101, %108 : vector<8x4xf32>
    %114 = vector.shape_cast %62 : vector<1x4xf32> to vector<1x4xf32>
    %115 = vector.broadcast %114 : vector<1x4xf32> to vector<8x4xf32>
    %116 = arith.select %104, %113, %115 : vector<8x4xi1>, vector<8x4xf32>
    %cst_74 = arith.constant dense<0.000000e+00> : vector<8x128xf32>
    %117 = tpu.matmul %112, %32, %cst_74 {dimension_numbers = #tpu.dot_dimension_numbers<[1], [0], [0], [1], [0, 0, 1, 1], [], []>} : vector<8x4xf32>, vector<4x128xf32>, vector<8x128xf32> -> vector<8x128xf32>
    %118 = arith.addf %92, %117 : vector<8x128xf32>
    %cst_75 = arith.constant dense<0.000000e+00> : vector<8x128xf32>
    %119 = tpu.matmul %116, %40, %cst_75 {dimension_numbers = #tpu.dot_dimension_numbers<[1], [0], [0], [1], [0, 0, 1, 1], [], []>} : vector<8x4xf32>, vector<4x128xf32>, vector<8x128xf32> -> vector<8x128xf32>
    %120 = arith.addf %118, %119 : vector<8x128xf32>
    %121 = vector.extract_strided_slice %63 {offsets = [0, 16], sizes = [8, 8], strides = [1, 1]} : vector<8x32xf32> to vector<8x8xf32>
    %cst_76 = arith.constant dense<0.000000e+00> : vector<8x8xf32>
    %122 = tpu.matmul %26, %121, %cst_76 {dimension_numbers = #tpu.dot_dimension_numbers<[1], [1], [0], [0], [0, 0, 1, 0], [], []>} : vector<8x8xf32>, vector<8x8xf32>, vector<8x8xf32> -> vector<8x8xf32>
    %cst_77 = arith.constant dense<0xFF800000> : vector<8xf32>
    %123 = vector.multi_reduction <maximumf>, %122, %cst_77 [1] : vector<8x8xf32> to vector<8xf32>
    %124 = vector.shape_cast %123 : vector<8xf32> to vector<8x1xf32>
    %125 = vector.broadcast %124 : vector<8x1xf32> to vector<8x8xf32>
    %126 = arith.subf %122, %125 : vector<8x8xf32>
    %127 = math.exp %126 : vector<8x8xf32>
    %cst_78 = arith.constant dense<0.000000e+00> : vector<8x4xf32>
    %128 = tpu.matmul %127, %53, %cst_78 {dimension_numbers = #tpu.dot_dimension_numbers<[1], [0], [0], [1], [0, 0, 1, 1], [], []>} : vector<8x8xf32>, vector<8x4xf32>, vector<8x4xf32> -> vector<8x4xf32>
    %cst_79 = arith.constant dense<0.000000e+00> : vector<8x4xf32>
    %129 = tpu.matmul %127, %54, %cst_79 {dimension_numbers = #tpu.dot_dimension_numbers<[1], [0], [0], [1], [0, 0, 1, 1], [], []>} : vector<8x8xf32>, vector<8x4xf32>, vector<8x4xf32> -> vector<8x4xf32>
    %cst_80 = arith.constant dense<0.000000e+00> : vector<8x4xf32>
    %130 = tpu.matmul %127, %52, %cst_80 {dimension_numbers = #tpu.dot_dimension_numbers<[1], [0], [0], [1], [0, 0, 1, 1], [], []>} : vector<8x8xf32>, vector<8x4xf32>, vector<8x4xf32> -> vector<8x4xf32>
    %cst_81 = arith.constant 0.000000e+00 : f32
    %131 = vector.broadcast %cst_81 : f32 to vector<8x4xf32>
    %132 = arith.cmpf ogt, %130, %131 : vector<8x4xf32>
    %cst_82 = arith.constant 1.000000e+00 : f32
    %133 = vector.broadcast %cst_82 : f32 to vector<8x4xf32>
    %134 = arith.select %132, %130, %133 : vector<8x4xi1>, vector<8x4xf32>
    %cst_83 = arith.constant 1.000000e+00 : f32
    %135 = vector.broadcast %cst_83 : f32 to vector<8x4xf32>
    %136 = arith.divf %135, %134 : vector<8x4xf32>
    %137 = arith.mulf %128, %136 : vector<8x4xf32>
    %138 = vector.shape_cast %58 : vector<1x4xf32> to vector<1x4xf32>
    %139 = vector.broadcast %138 : vector<1x4xf32> to vector<8x4xf32>
    %140 = arith.select %132, %137, %139 : vector<8x4xi1>, vector<8x4xf32>
    %141 = arith.mulf %129, %136 : vector<8x4xf32>
    %142 = vector.shape_cast %62 : vector<1x4xf32> to vector<1x4xf32>
    %143 = vector.broadcast %142 : vector<1x4xf32> to vector<8x4xf32>
    %144 = arith.select %132, %141, %143 : vector<8x4xi1>, vector<8x4xf32>
    %cst_84 = arith.constant dense<0.000000e+00> : vector<8x128xf32>
    %145 = tpu.matmul %140, %34, %cst_84 {dimension_numbers = #tpu.dot_dimension_numbers<[1], [0], [0], [1], [0, 0, 1, 1], [], []>} : vector<8x4xf32>, vector<4x128xf32>, vector<8x128xf32> -> vector<8x128xf32>
    %146 = arith.addf %120, %145 : vector<8x128xf32>
    %cst_85 = arith.constant dense<0.000000e+00> : vector<8x128xf32>
    %147 = tpu.matmul %144, %42, %cst_85 {dimension_numbers = #tpu.dot_dimension_numbers<[1], [0], [0], [1], [0, 0, 1, 1], [], []>} : vector<8x4xf32>, vector<4x128xf32>, vector<8x128xf32> -> vector<8x128xf32>
    %148 = arith.addf %146, %147 : vector<8x128xf32>
    %149 = vector.extract_strided_slice %63 {offsets = [0, 24], sizes = [8, 8], strides = [1, 1]} : vector<8x32xf32> to vector<8x8xf32>
    %cst_86 = arith.constant dense<0.000000e+00> : vector<8x8xf32>
    %150 = tpu.matmul %28, %149, %cst_86 {dimension_numbers = #tpu.dot_dimension_numbers<[1], [1], [0], [0], [0, 0, 1, 0], [], []>} : vector<8x8xf32>, vector<8x8xf32>, vector<8x8xf32> -> vector<8x8xf32>
    %cst_87 = arith.constant dense<0xFF800000> : vector<8xf32>
    %151 = vector.multi_reduction <maximumf>, %150, %cst_87 [1] : vector<8x8xf32> to vector<8xf32>
    %152 = vector.shape_cast %151 : vector<8xf32> to vector<8x1xf32>
    %153 = vector.broadcast %152 : vector<8x1xf32> to vector<8x8xf32>
    %154 = arith.subf %150, %153 : vector<8x8xf32>
    %155 = math.exp %154 : vector<8x8xf32>
    %cst_88 = arith.constant dense<0.000000e+00> : vector<8x4xf32>
    %156 = tpu.matmul %155, %53, %cst_88 {dimension_numbers = #tpu.dot_dimension_numbers<[1], [0], [0], [1], [0, 0, 1, 1], [], []>} : vector<8x8xf32>, vector<8x4xf32>, vector<8x4xf32> -> vector<8x4xf32>
    %cst_89 = arith.constant dense<0.000000e+00> : vector<8x4xf32>
    %157 = tpu.matmul %155, %54, %cst_89 {dimension_numbers = #tpu.dot_dimension_numbers<[1], [0], [0], [1], [0, 0, 1, 1], [], []>} : vector<8x8xf32>, vector<8x4xf32>, vector<8x4xf32> -> vector<8x4xf32>
    %cst_90 = arith.constant dense<0.000000e+00> : vector<8x4xf32>
    %158 = tpu.matmul %155, %52, %cst_90 {dimension_numbers = #tpu.dot_dimension_numbers<[1], [0], [0], [1], [0, 0, 1, 1], [], []>} : vector<8x8xf32>, vector<8x4xf32>, vector<8x4xf32> -> vector<8x4xf32>
    %cst_91 = arith.constant 0.000000e+00 : f32
    %159 = vector.broadcast %cst_91 : f32 to vector<8x4xf32>
    %160 = arith.cmpf ogt, %158, %159 : vector<8x4xf32>
    %cst_92 = arith.constant 1.000000e+00 : f32
    %161 = vector.broadcast %cst_92 : f32 to vector<8x4xf32>
    %162 = arith.select %160, %158, %161 : vector<8x4xi1>, vector<8x4xf32>
    %cst_93 = arith.constant 1.000000e+00 : f32
    %163 = vector.broadcast %cst_93 : f32 to vector<8x4xf32>
    %164 = arith.divf %163, %162 : vector<8x4xf32>
    %165 = arith.mulf %156, %164 : vector<8x4xf32>
    %166 = vector.shape_cast %58 : vector<1x4xf32> to vector<1x4xf32>
    %167 = vector.broadcast %166 : vector<1x4xf32> to vector<8x4xf32>
    %168 = arith.select %160, %165, %167 : vector<8x4xi1>, vector<8x4xf32>
    %169 = arith.mulf %157, %164 : vector<8x4xf32>
    %170 = vector.shape_cast %62 : vector<1x4xf32> to vector<1x4xf32>
    %171 = vector.broadcast %170 : vector<1x4xf32> to vector<8x4xf32>
    %172 = arith.select %160, %169, %171 : vector<8x4xi1>, vector<8x4xf32>
    %cst_94 = arith.constant dense<0.000000e+00> : vector<8x128xf32>
    %173 = tpu.matmul %168, %36, %cst_94 {dimension_numbers = #tpu.dot_dimension_numbers<[1], [0], [0], [1], [0, 0, 1, 1], [], []>} : vector<8x4xf32>, vector<4x128xf32>, vector<8x128xf32> -> vector<8x128xf32>
    %174 = arith.addf %148, %173 : vector<8x128xf32>
    %cst_95 = arith.constant dense<0.000000e+00> : vector<8x128xf32>
    %175 = tpu.matmul %172, %44, %cst_95 {dimension_numbers = #tpu.dot_dimension_numbers<[1], [0], [0], [1], [0, 0, 1, 1], [], []>} : vector<8x4xf32>, vector<4x128xf32>, vector<8x128xf32> -> vector<8x128xf32>
    %176 = arith.addf %174, %175 : vector<8x128xf32>
    %177 = vector.broadcast %20 : vector<1x128xf32> to vector<8x128xf32>
    %178 = arith.addf %176, %177 : vector<8x128xf32>
    %c0_96 = arith.constant 0 : index
    %c0_97 = arith.constant 0 : index
    %c0_98 = arith.constant 0 : index
    %179 = vector.load %arg12[%c0_96, %c0_97, %c0_98] : memref<4x8x128xf32, #tpu.memory_space<vmem>>, vector<1x8x128xf32>
    %180 = vector.shape_cast %179 : vector<1x8x128xf32> to vector<8x128xf32>
    %181 = vector.shape_cast %178 : vector<8x128xf32> to vector<1x8x128xf32>
    tpu.vector_store %arg12[%c0_96, %c0_97, %c0_98], %181 {strides = array<i32>} : memref<4x8x128xf32, #tpu.memory_space<vmem>>, vector<1x8x128xf32>,
    %c1_99 = arith.constant 1 : index
    %c0_100 = arith.constant 0 : index
    %c0_101 = arith.constant 0 : index
    %182 = vector.load %arg2[%c1_99, %c0_100, %c0_101] : memref<4x8x4xf32, #tpu.memory_space<vmem>>, vector<1x8x4xf32>
    %183 = vector.shape_cast %182 : vector<1x8x4xf32> to vector<8x4xf32>
    %c1_102 = arith.constant 1 : index
    %c0_103 = arith.constant 0 : index
    %c0_104 = arith.constant 0 : index
    %184 = vector.load %arg3[%c1_102, %c0_103, %c0_104] : memref<4x8x4xf32, #tpu.memory_space<vmem>>, vector<1x8x4xf32>
    %185 = vector.shape_cast %184 : vector<1x8x4xf32> to vector<8x4xf32>
    %cst_105 = arith.constant 0.000000e+00 : f32
    %186 = vector.broadcast %cst_105 : f32 to vector<8x4xf32>
    %187 = arith.cmpf one, %185, %186 : vector<8x4xf32>
    %188 = arith.extui %187 : vector<8x4xi1> to vector<8x4xi32>
    %189 = arith.sitofp %188 : vector<8x4xi32> to vector<8x4xf32>
    %190 = arith.mulf %189, %183 : vector<8x4xf32>
    %191 = arith.mulf %189, %185 : vector<8x4xf32>
    %cst_106 = arith.constant dense<0.000000e+00> : vector<4xf32>
    %192 = vector.multi_reduction <add>, %183, %cst_106 [0] : vector<8x4xf32> to vector<4xf32>
    %193 = vector.shape_cast %192 : vector<4xf32> to vector<1x4xf32>
    %cst_107 = arith.constant 8.000000e+00 : f32
    %194 = vector.broadcast %cst_107 : f32 to vector<1x4xf32>
    %195 = arith.divf %193, %194 : vector<1x4xf32>
    %cst_108 = arith.constant dense<0.000000e+00> : vector<4xf32>
    %196 = vector.multi_reduction <add>, %185, %cst_108 [0] : vector<8x4xf32> to vector<4xf32>
    %197 = vector.shape_cast %196 : vector<4xf32> to vector<1x4xf32>
    %cst_109 = arith.constant 8.000000e+00 : f32
    %198 = vector.broadcast %cst_109 : f32 to vector<1x4xf32>
    %199 = arith.divf %197, %198 : vector<1x4xf32>
    %200 = vector.extract_strided_slice %19 {offsets = [8, 0], sizes = [8, 32], strides = [1, 1]} : vector<32x32xf32> to vector<8x32xf32>
    %cst_110 = arith.constant 0.000000e+00 : f32
    %201 = vector.broadcast %cst_110 : f32 to vector<8x128xf32>
    %202 = vector.extract_strided_slice %200 {offsets = [0, 0], sizes = [8, 8], strides = [1, 1]} : vector<8x32xf32> to vector<8x8xf32>
    %cst_111 = arith.constant dense<0.000000e+00> : vector<8x8xf32>
    %203 = tpu.matmul %22, %202, %cst_111 {dimension_numbers = #tpu.dot_dimension_numbers<[1], [1], [0], [0], [0, 0, 1, 0], [], []>} : vector<8x8xf32>, vector<8x8xf32>, vector<8x8xf32> -> vector<8x8xf32>
    %cst_112 = arith.constant dense<0xFF800000> : vector<8xf32>
    %204 = vector.multi_reduction <maximumf>, %203, %cst_112 [1] : vector<8x8xf32> to vector<8xf32>
    %205 = vector.shape_cast %204 : vector<8xf32> to vector<8x1xf32>
    %206 = vector.broadcast %205 : vector<8x1xf32> to vector<8x8xf32>
    %207 = arith.subf %203, %206 : vector<8x8xf32>
    %208 = math.exp %207 : vector<8x8xf32>
    %cst_113 = arith.constant dense<0.000000e+00> : vector<8x4xf32>
    %209 = tpu.matmul %208, %190, %cst_113 {dimension_numbers = #tpu.dot_dimension_numbers<[1], [0], [0], [1], [0, 0, 1, 1], [], []>} : vector<8x8xf32>, vector<8x4xf32>, vector<8x4xf32> -> vector<8x4xf32>
    %cst_114 = arith.constant dense<0.000000e+00> : vector<8x4xf32>
    %210 = tpu.matmul %208, %191, %cst_114 {dimension_numbers = #tpu.dot_dimension_numbers<[1], [0], [0], [1], [0, 0, 1, 1], [], []>} : vector<8x8xf32>, vector<8x4xf32>, vector<8x4xf32> -> vector<8x4xf32>
    %cst_115 = arith.constant dense<0.000000e+00> : vector<8x4xf32>
    %211 = tpu.matmul %208, %189, %cst_115 {dimension_numbers = #tpu.dot_dimension_numbers<[1], [0], [0], [1], [0, 0, 1, 1], [], []>} : vector<8x8xf32>, vector<8x4xf32>, vector<8x4xf32> -> vector<8x4xf32>
    %cst_116 = arith.constant 0.000000e+00 : f32
    %212 = vector.broadcast %cst_116 : f32 to vector<8x4xf32>
    %213 = arith.cmpf ogt, %211, %212 : vector<8x4xf32>
    %cst_117 = arith.constant 1.000000e+00 : f32
    %214 = vector.broadcast %cst_117 : f32 to vector<8x4xf32>
    %215 = arith.select %213, %211, %214 : vector<8x4xi1>, vector<8x4xf32>
    %cst_118 = arith.constant 1.000000e+00 : f32
    %216 = vector.broadcast %cst_118 : f32 to vector<8x4xf32>
    %217 = arith.divf %216, %215 : vector<8x4xf32>
    %218 = arith.mulf %209, %217 : vector<8x4xf32>
    %219 = vector.shape_cast %195 : vector<1x4xf32> to vector<1x4xf32>
    %220 = vector.broadcast %219 : vector<1x4xf32> to vector<8x4xf32>
    %221 = arith.select %213, %218, %220 : vector<8x4xi1>, vector<8x4xf32>
    %222 = arith.mulf %210, %217 : vector<8x4xf32>
    %223 = vector.shape_cast %199 : vector<1x4xf32> to vector<1x4xf32>
    %224 = vector.broadcast %223 : vector<1x4xf32> to vector<8x4xf32>
    %225 = arith.select %213, %222, %224 : vector<8x4xi1>, vector<8x4xf32>
    %cst_119 = arith.constant dense<0.000000e+00> : vector<8x128xf32>
    %226 = tpu.matmul %221, %30, %cst_119 {dimension_numbers = #tpu.dot_dimension_numbers<[1], [0], [0], [1], [0, 0, 1, 1], [], []>} : vector<8x4xf32>, vector<4x128xf32>, vector<8x128xf32> -> vector<8x128xf32>
    %227 = arith.addf %201, %226 : vector<8x128xf32>
    %cst_120 = arith.constant dense<0.000000e+00> : vector<8x128xf32>
    %228 = tpu.matmul %225, %38, %cst_120 {dimension_numbers = #tpu.dot_dimension_numbers<[1], [0], [0], [1], [0, 0, 1, 1], [], []>} : vector<8x4xf32>, vector<4x128xf32>, vector<8x128xf32> -> vector<8x128xf32>
    %229 = arith.addf %227, %228 : vector<8x128xf32>
    %230 = vector.extract_strided_slice %200 {offsets = [0, 8], sizes = [8, 8], strides = [1, 1]} : vector<8x32xf32> to vector<8x8xf32>
    %cst_121 = arith.constant dense<0.000000e+00> : vector<8x8xf32>
    %231 = tpu.matmul %24, %230, %cst_121 {dimension_numbers = #tpu.dot_dimension_numbers<[1], [1], [0], [0], [0, 0, 1, 0], [], []>} : vector<8x8xf32>, vector<8x8xf32>, vector<8x8xf32> -> vector<8x8xf32>
    %cst_122 = arith.constant dense<0xFF800000> : vector<8xf32>
    %232 = vector.multi_reduction <maximumf>, %231, %cst_122 [1] : vector<8x8xf32> to vector<8xf32>
    %233 = vector.shape_cast %232 : vector<8xf32> to vector<8x1xf32>
    %234 = vector.broadcast %233 : vector<8x1xf32> to vector<8x8xf32>
    %235 = arith.subf %231, %234 : vector<8x8xf32>
    %236 = math.exp %235 : vector<8x8xf32>
    %cst_123 = arith.constant dense<0.000000e+00> : vector<8x4xf32>
    %237 = tpu.matmul %236, %190, %cst_123 {dimension_numbers = #tpu.dot_dimension_numbers<[1], [0], [0], [1], [0, 0, 1, 1], [], []>} : vector<8x8xf32>, vector<8x4xf32>, vector<8x4xf32> -> vector<8x4xf32>
    %cst_124 = arith.constant dense<0.000000e+00> : vector<8x4xf32>
    %238 = tpu.matmul %236, %191, %cst_124 {dimension_numbers = #tpu.dot_dimension_numbers<[1], [0], [0], [1], [0, 0, 1, 1], [], []>} : vector<8x8xf32>, vector<8x4xf32>, vector<8x4xf32> -> vector<8x4xf32>
    %cst_125 = arith.constant dense<0.000000e+00> : vector<8x4xf32>
    %239 = tpu.matmul %236, %189, %cst_125 {dimension_numbers = #tpu.dot_dimension_numbers<[1], [0], [0], [1], [0, 0, 1, 1], [], []>} : vector<8x8xf32>, vector<8x4xf32>, vector<8x4xf32> -> vector<8x4xf32>
    %cst_126 = arith.constant 0.000000e+00 : f32
    %240 = vector.broadcast %cst_126 : f32 to vector<8x4xf32>
    %241 = arith.cmpf ogt, %239, %240 : vector<8x4xf32>
    %cst_127 = arith.constant 1.000000e+00 : f32
    %242 = vector.broadcast %cst_127 : f32 to vector<8x4xf32>
    %243 = arith.select %241, %239, %242 : vector<8x4xi1>, vector<8x4xf32>
    %cst_128 = arith.constant 1.000000e+00 : f32
    %244 = vector.broadcast %cst_128 : f32 to vector<8x4xf32>
    %245 = arith.divf %244, %243 : vector<8x4xf32>
    %246 = arith.mulf %237, %245 : vector<8x4xf32>
    %247 = vector.shape_cast %195 : vector<1x4xf32> to vector<1x4xf32>
    %248 = vector.broadcast %247 : vector<1x4xf32> to vector<8x4xf32>
    %249 = arith.select %241, %246, %248 : vector<8x4xi1>, vector<8x4xf32>
    %250 = arith.mulf %238, %245 : vector<8x4xf32>
    %251 = vector.shape_cast %199 : vector<1x4xf32> to vector<1x4xf32>
    %252 = vector.broadcast %251 : vector<1x4xf32> to vector<8x4xf32>
    %253 = arith.select %241, %250, %252 : vector<8x4xi1>, vector<8x4xf32>
    %cst_129 = arith.constant dense<0.000000e+00> : vector<8x128xf32>
    %254 = tpu.matmul %249, %32, %cst_129 {dimension_numbers = #tpu.dot_dimension_numbers<[1], [0], [0], [1], [0, 0, 1, 1], [], []>} : vector<8x4xf32>, vector<4x128xf32>, vector<8x128xf32> -> vector<8x128xf32>
    %255 = arith.addf %229, %254 : vector<8x128xf32>
    %cst_130 = arith.constant dense<0.000000e+00> : vector<8x128xf32>
    %256 = tpu.matmul %253, %40, %cst_130 {dimension_numbers = #tpu.dot_dimension_numbers<[1], [0], [0], [1], [0, 0, 1, 1], [], []>} : vector<8x4xf32>, vector<4x128xf32>, vector<8x128xf32> -> vector<8x128xf32>
    %257 = arith.addf %255, %256 : vector<8x128xf32>
    %258 = vector.extract_strided_slice %200 {offsets = [0, 16], sizes = [8, 8], strides = [1, 1]} : vector<8x32xf32> to vector<8x8xf32>
    %cst_131 = arith.constant dense<0.000000e+00> : vector<8x8xf32>
    %259 = tpu.matmul %26, %258, %cst_131 {dimension_numbers = #tpu.dot_dimension_numbers<[1], [1], [0], [0], [0, 0, 1, 0], [], []>} : vector<8x8xf32>, vector<8x8xf32>, vector<8x8xf32> -> vector<8x8xf32>
    %cst_132 = arith.constant dense<0xFF800000> : vector<8xf32>
    %260 = vector.multi_reduction <maximumf>, %259, %cst_132 [1] : vector<8x8xf32> to vector<8xf32>
    %261 = vector.shape_cast %260 : vector<8xf32> to vector<8x1xf32>
    %262 = vector.broadcast %261 : vector<8x1xf32> to vector<8x8xf32>
    %263 = arith.subf %259, %262 : vector<8x8xf32>
    %264 = math.exp %263 : vector<8x8xf32>
    %cst_133 = arith.constant dense<0.000000e+00> : vector<8x4xf32>
    %265 = tpu.matmul %264, %190, %cst_133 {dimension_numbers = #tpu.dot_dimension_numbers<[1], [0], [0], [1], [0, 0, 1, 1], [], []>} : vector<8x8xf32>, vector<8x4xf32>, vector<8x4xf32> -> vector<8x4xf32>
    %cst_134 = arith.constant dense<0.000000e+00> : vector<8x4xf32>
    %266 = tpu.matmul %264, %191, %cst_134 {dimension_numbers = #tpu.dot_dimension_numbers<[1], [0], [0], [1], [0, 0, 1, 1], [], []>} : vector<8x8xf32>, vector<8x4xf32>, vector<8x4xf32> -> vector<8x4xf32>
    %cst_135 = arith.constant dense<0.000000e+00> : vector<8x4xf32>
    %267 = tpu.matmul %264, %189, %cst_135 {dimension_numbers = #tpu.dot_dimension_numbers<[1], [0], [0], [1], [0, 0, 1, 1], [], []>} : vector<8x8xf32>, vector<8x4xf32>, vector<8x4xf32> -> vector<8x4xf32>
    %cst_136 = arith.constant 0.000000e+00 : f32
    %268 = vector.broadcast %cst_136 : f32 to vector<8x4xf32>
    %269 = arith.cmpf ogt, %267, %268 : vector<8x4xf32>
    %cst_137 = arith.constant 1.000000e+00 : f32
    %270 = vector.broadcast %cst_137 : f32 to vector<8x4xf32>
    %271 = arith.select %269, %267, %270 : vector<8x4xi1>, vector<8x4xf32>
    %cst_138 = arith.constant 1.000000e+00 : f32
    %272 = vector.broadcast %cst_138 : f32 to vector<8x4xf32>
    %273 = arith.divf %272, %271 : vector<8x4xf32>
    %274 = arith.mulf %265, %273 : vector<8x4xf32>
    %275 = vector.shape_cast %195 : vector<1x4xf32> to vector<1x4xf32>
    %276 = vector.broadcast %275 : vector<1x4xf32> to vector<8x4xf32>
    %277 = arith.select %269, %274, %276 : vector<8x4xi1>, vector<8x4xf32>
    %278 = arith.mulf %266, %273 : vector<8x4xf32>
    %279 = vector.shape_cast %199 : vector<1x4xf32> to vector<1x4xf32>
    %280 = vector.broadcast %279 : vector<1x4xf32> to vector<8x4xf32>
    %281 = arith.select %269, %278, %280 : vector<8x4xi1>, vector<8x4xf32>
    %cst_139 = arith.constant dense<0.000000e+00> : vector<8x128xf32>
    %282 = tpu.matmul %277, %34, %cst_139 {dimension_numbers = #tpu.dot_dimension_numbers<[1], [0], [0], [1], [0, 0, 1, 1], [], []>} : vector<8x4xf32>, vector<4x128xf32>, vector<8x128xf32> -> vector<8x128xf32>
    %283 = arith.addf %257, %282 : vector<8x128xf32>
    %cst_140 = arith.constant dense<0.000000e+00> : vector<8x128xf32>
    %284 = tpu.matmul %281, %42, %cst_140 {dimension_numbers = #tpu.dot_dimension_numbers<[1], [0], [0], [1], [0, 0, 1, 1], [], []>} : vector<8x4xf32>, vector<4x128xf32>, vector<8x128xf32> -> vector<8x128xf32>
    %285 = arith.addf %283, %284 : vector<8x128xf32>
    %286 = vector.extract_strided_slice %200 {offsets = [0, 24], sizes = [8, 8], strides = [1, 1]} : vector<8x32xf32> to vector<8x8xf32>
    %cst_141 = arith.constant dense<0.000000e+00> : vector<8x8xf32>
    %287 = tpu.matmul %28, %286, %cst_141 {dimension_numbers = #tpu.dot_dimension_numbers<[1], [1], [0], [0], [0, 0, 1, 0], [], []>} : vector<8x8xf32>, vector<8x8xf32>, vector<8x8xf32> -> vector<8x8xf32>
    %cst_142 = arith.constant dense<0xFF800000> : vector<8xf32>
    %288 = vector.multi_reduction <maximumf>, %287, %cst_142 [1] : vector<8x8xf32> to vector<8xf32>
    %289 = vector.shape_cast %288 : vector<8xf32> to vector<8x1xf32>
    %290 = vector.broadcast %289 : vector<8x1xf32> to vector<8x8xf32>
    %291 = arith.subf %287, %290 : vector<8x8xf32>
    %292 = math.exp %291 : vector<8x8xf32>
    %cst_143 = arith.constant dense<0.000000e+00> : vector<8x4xf32>
    %293 = tpu.matmul %292, %190, %cst_143 {dimension_numbers = #tpu.dot_dimension_numbers<[1], [0], [0], [1], [0, 0, 1, 1], [], []>} : vector<8x8xf32>, vector<8x4xf32>, vector<8x4xf32> -> vector<8x4xf32>
    %cst_144 = arith.constant dense<0.000000e+00> : vector<8x4xf32>
    %294 = tpu.matmul %292, %191, %cst_144 {dimension_numbers = #tpu.dot_dimension_numbers<[1], [0], [0], [1], [0, 0, 1, 1], [], []>} : vector<8x8xf32>, vector<8x4xf32>, vector<8x4xf32> -> vector<8x4xf32>
    %cst_145 = arith.constant dense<0.000000e+00> : vector<8x4xf32>
    %295 = tpu.matmul %292, %189, %cst_145 {dimension_numbers = #tpu.dot_dimension_numbers<[1], [0], [0], [1], [0, 0, 1, 1], [], []>} : vector<8x8xf32>, vector<8x4xf32>, vector<8x4xf32> -> vector<8x4xf32>
    %cst_146 = arith.constant 0.000000e+00 : f32
    %296 = vector.broadcast %cst_146 : f32 to vector<8x4xf32>
    %297 = arith.cmpf ogt, %295, %296 : vector<8x4xf32>
    %cst_147 = arith.constant 1.000000e+00 : f32
    %298 = vector.broadcast %cst_147 : f32 to vector<8x4xf32>
    %299 = arith.select %297, %295, %298 : vector<8x4xi1>, vector<8x4xf32>
    %cst_148 = arith.constant 1.000000e+00 : f32
    %300 = vector.broadcast %cst_148 : f32 to vector<8x4xf32>
    %301 = arith.divf %300, %299 : vector<8x4xf32>
    %302 = arith.mulf %293, %301 : vector<8x4xf32>
    %303 = vector.shape_cast %195 : vector<1x4xf32> to vector<1x4xf32>
    %304 = vector.broadcast %303 : vector<1x4xf32> to vector<8x4xf32>
    %305 = arith.select %297, %302, %304 : vector<8x4xi1>, vector<8x4xf32>
    %306 = arith.mulf %294, %301 : vector<8x4xf32>
    %307 = vector.shape_cast %199 : vector<1x4xf32> to vector<1x4xf32>
    %308 = vector.broadcast %307 : vector<1x4xf32> to vector<8x4xf32>
    %309 = arith.select %297, %306, %308 : vector<8x4xi1>, vector<8x4xf32>
    %cst_149 = arith.constant dense<0.000000e+00> : vector<8x128xf32>
    %310 = tpu.matmul %305, %36, %cst_149 {dimension_numbers = #tpu.dot_dimension_numbers<[1], [0], [0], [1], [0, 0, 1, 1], [], []>} : vector<8x4xf32>, vector<4x128xf32>, vector<8x128xf32> -> vector<8x128xf32>
    %311 = arith.addf %285, %310 : vector<8x128xf32>
    %cst_150 = arith.constant dense<0.000000e+00> : vector<8x128xf32>
    %312 = tpu.matmul %309, %44, %cst_150 {dimension_numbers = #tpu.dot_dimension_numbers<[1], [0], [0], [1], [0, 0, 1, 1], [], []>} : vector<8x4xf32>, vector<4x128xf32>, vector<8x128xf32> -> vector<8x128xf32>
    %313 = arith.addf %311, %312 : vector<8x128xf32>
    %314 = vector.broadcast %20 : vector<1x128xf32> to vector<8x128xf32>
    %315 = arith.addf %313, %314 : vector<8x128xf32>
    %c1_151 = arith.constant 1 : index
    %c0_152 = arith.constant 0 : index
    %c0_153 = arith.constant 0 : index
    %316 = vector.load %arg12[%c1_151, %c0_152, %c0_153] : memref<4x8x128xf32, #tpu.memory_space<vmem>>, vector<1x8x128xf32>
    %317 = vector.shape_cast %316 : vector<1x8x128xf32> to vector<8x128xf32>
    %318 = vector.shape_cast %315 : vector<8x128xf32> to vector<1x8x128xf32>
    tpu.vector_store %arg12[%c1_151, %c0_152, %c0_153], %318 {strides = array<i32>} : memref<4x8x128xf32, #tpu.memory_space<vmem>>, vector<1x8x128xf32>,
    %c2_154 = arith.constant 2 : index
    %c0_155 = arith.constant 0 : index
    %c0_156 = arith.constant 0 : index
    %319 = vector.load %arg2[%c2_154, %c0_155, %c0_156] : memref<4x8x4xf32, #tpu.memory_space<vmem>>, vector<1x8x4xf32>
    %320 = vector.shape_cast %319 : vector<1x8x4xf32> to vector<8x4xf32>
    %c2_157 = arith.constant 2 : index
    %c0_158 = arith.constant 0 : index
    %c0_159 = arith.constant 0 : index
    %321 = vector.load %arg3[%c2_157, %c0_158, %c0_159] : memref<4x8x4xf32, #tpu.memory_space<vmem>>, vector<1x8x4xf32>
    %322 = vector.shape_cast %321 : vector<1x8x4xf32> to vector<8x4xf32>
    %cst_160 = arith.constant 0.000000e+00 : f32
    %323 = vector.broadcast %cst_160 : f32 to vector<8x4xf32>
    %324 = arith.cmpf one, %322, %323 : vector<8x4xf32>
    %325 = arith.extui %324 : vector<8x4xi1> to vector<8x4xi32>
    %326 = arith.sitofp %325 : vector<8x4xi32> to vector<8x4xf32>
    %327 = arith.mulf %326, %320 : vector<8x4xf32>
    %328 = arith.mulf %326, %322 : vector<8x4xf32>
    %cst_161 = arith.constant dense<0.000000e+00> : vector<4xf32>
    %329 = vector.multi_reduction <add>, %320, %cst_161 [0] : vector<8x4xf32> to vector<4xf32>
    %330 = vector.shape_cast %329 : vector<4xf32> to vector<1x4xf32>
    %cst_162 = arith.constant 8.000000e+00 : f32
    %331 = vector.broadcast %cst_162 : f32 to vector<1x4xf32>
    %332 = arith.divf %330, %331 : vector<1x4xf32>
    %cst_163 = arith.constant dense<0.000000e+00> : vector<4xf32>
    %333 = vector.multi_reduction <add>, %322, %cst_163 [0] : vector<8x4xf32> to vector<4xf32>
    %334 = vector.shape_cast %333 : vector<4xf32> to vector<1x4xf32>
    %cst_164 = arith.constant 8.000000e+00 : f32
    %335 = vector.broadcast %cst_164 : f32 to vector<1x4xf32>
    %336 = arith.divf %334, %335 : vector<1x4xf32>
    %337 = vector.extract_strided_slice %19 {offsets = [16, 0], sizes = [8, 32], strides = [1, 1]} : vector<32x32xf32> to vector<8x32xf32>
    %cst_165 = arith.constant 0.000000e+00 : f32
    %338 = vector.broadcast %cst_165 : f32 to vector<8x128xf32>
    %339 = vector.extract_strided_slice %337 {offsets = [0, 0], sizes = [8, 8], strides = [1, 1]} : vector<8x32xf32> to vector<8x8xf32>
    %cst_166 = arith.constant dense<0.000000e+00> : vector<8x8xf32>
    %340 = tpu.matmul %22, %339, %cst_166 {dimension_numbers = #tpu.dot_dimension_numbers<[1], [1], [0], [0], [0, 0, 1, 0], [], []>} : vector<8x8xf32>, vector<8x8xf32>, vector<8x8xf32> -> vector<8x8xf32>
    %cst_167 = arith.constant dense<0xFF800000> : vector<8xf32>
    %341 = vector.multi_reduction <maximumf>, %340, %cst_167 [1] : vector<8x8xf32> to vector<8xf32>
    %342 = vector.shape_cast %341 : vector<8xf32> to vector<8x1xf32>
    %343 = vector.broadcast %342 : vector<8x1xf32> to vector<8x8xf32>
    %344 = arith.subf %340, %343 : vector<8x8xf32>
    %345 = math.exp %344 : vector<8x8xf32>
    %cst_168 = arith.constant dense<0.000000e+00> : vector<8x4xf32>
    %346 = tpu.matmul %345, %327, %cst_168 {dimension_numbers = #tpu.dot_dimension_numbers<[1], [0], [0], [1], [0, 0, 1, 1], [], []>} : vector<8x8xf32>, vector<8x4xf32>, vector<8x4xf32> -> vector<8x4xf32>
    %cst_169 = arith.constant dense<0.000000e+00> : vector<8x4xf32>
    %347 = tpu.matmul %345, %328, %cst_169 {dimension_numbers = #tpu.dot_dimension_numbers<[1], [0], [0], [1], [0, 0, 1, 1], [], []>} : vector<8x8xf32>, vector<8x4xf32>, vector<8x4xf32> -> vector<8x4xf32>
    %cst_170 = arith.constant dense<0.000000e+00> : vector<8x4xf32>
    %348 = tpu.matmul %345, %326, %cst_170 {dimension_numbers = #tpu.dot_dimension_numbers<[1], [0], [0], [1], [0, 0, 1, 1], [], []>} : vector<8x8xf32>, vector<8x4xf32>, vector<8x4xf32> -> vector<8x4xf32>
    %cst_171 = arith.constant 0.000000e+00 : f32
    %349 = vector.broadcast %cst_171 : f32 to vector<8x4xf32>
    %350 = arith.cmpf ogt, %348, %349 : vector<8x4xf32>
    %cst_172 = arith.constant 1.000000e+00 : f32
    %351 = vector.broadcast %cst_172 : f32 to vector<8x4xf32>
    %352 = arith.select %350, %348, %351 : vector<8x4xi1>, vector<8x4xf32>
    %cst_173 = arith.constant 1.000000e+00 : f32
    %353 = vector.broadcast %cst_173 : f32 to vector<8x4xf32>
    %354 = arith.divf %353, %352 : vector<8x4xf32>
    %355 = arith.mulf %346, %354 : vector<8x4xf32>
    %356 = vector.shape_cast %332 : vector<1x4xf32> to vector<1x4xf32>
    %357 = vector.broadcast %356 : vector<1x4xf32> to vector<8x4xf32>
    %358 = arith.select %350, %355, %357 : vector<8x4xi1>, vector<8x4xf32>
    %359 = arith.mulf %347, %354 : vector<8x4xf32>
    %360 = vector.shape_cast %336 : vector<1x4xf32> to vector<1x4xf32>
    %361 = vector.broadcast %360 : vector<1x4xf32> to vector<8x4xf32>
    %362 = arith.select %350, %359, %361 : vector<8x4xi1>, vector<8x4xf32>
    %cst_174 = arith.constant dense<0.000000e+00> : vector<8x128xf32>
    %363 = tpu.matmul %358, %30, %cst_174 {dimension_numbers = #tpu.dot_dimension_numbers<[1], [0], [0], [1], [0, 0, 1, 1], [], []>} : vector<8x4xf32>, vector<4x128xf32>, vector<8x128xf32> -> vector<8x128xf32>
    %364 = arith.addf %338, %363 : vector<8x128xf32>
    %cst_175 = arith.constant dense<0.000000e+00> : vector<8x128xf32>
    %365 = tpu.matmul %362, %38, %cst_175 {dimension_numbers = #tpu.dot_dimension_numbers<[1], [0], [0], [1], [0, 0, 1, 1], [], []>} : vector<8x4xf32>, vector<4x128xf32>, vector<8x128xf32> -> vector<8x128xf32>
    %366 = arith.addf %364, %365 : vector<8x128xf32>
    %367 = vector.extract_strided_slice %337 {offsets = [0, 8], sizes = [8, 8], strides = [1, 1]} : vector<8x32xf32> to vector<8x8xf32>
    %cst_176 = arith.constant dense<0.000000e+00> : vector<8x8xf32>
    %368 = tpu.matmul %24, %367, %cst_176 {dimension_numbers = #tpu.dot_dimension_numbers<[1], [1], [0], [0], [0, 0, 1, 0], [], []>} : vector<8x8xf32>, vector<8x8xf32>, vector<8x8xf32> -> vector<8x8xf32>
    %cst_177 = arith.constant dense<0xFF800000> : vector<8xf32>
    %369 = vector.multi_reduction <maximumf>, %368, %cst_177 [1] : vector<8x8xf32> to vector<8xf32>
    %370 = vector.shape_cast %369 : vector<8xf32> to vector<8x1xf32>
    %371 = vector.broadcast %370 : vector<8x1xf32> to vector<8x8xf32>
    %372 = arith.subf %368, %371 : vector<8x8xf32>
    %373 = math.exp %372 : vector<8x8xf32>
    %cst_178 = arith.constant dense<0.000000e+00> : vector<8x4xf32>
    %374 = tpu.matmul %373, %327, %cst_178 {dimension_numbers = #tpu.dot_dimension_numbers<[1], [0], [0], [1], [0, 0, 1, 1], [], []>} : vector<8x8xf32>, vector<8x4xf32>, vector<8x4xf32> -> vector<8x4xf32>
    %cst_179 = arith.constant dense<0.000000e+00> : vector<8x4xf32>
    %375 = tpu.matmul %373, %328, %cst_179 {dimension_numbers = #tpu.dot_dimension_numbers<[1], [0], [0], [1], [0, 0, 1, 1], [], []>} : vector<8x8xf32>, vector<8x4xf32>, vector<8x4xf32> -> vector<8x4xf32>
    %cst_180 = arith.constant dense<0.000000e+00> : vector<8x4xf32>
    %376 = tpu.matmul %373, %326, %cst_180 {dimension_numbers = #tpu.dot_dimension_numbers<[1], [0], [0], [1], [0, 0, 1, 1], [], []>} : vector<8x8xf32>, vector<8x4xf32>, vector<8x4xf32> -> vector<8x4xf32>
    %cst_181 = arith.constant 0.000000e+00 : f32
    %377 = vector.broadcast %cst_181 : f32 to vector<8x4xf32>
    %378 = arith.cmpf ogt, %376, %377 : vector<8x4xf32>
    %cst_182 = arith.constant 1.000000e+00 : f32
    %379 = vector.broadcast %cst_182 : f32 to vector<8x4xf32>
    %380 = arith.select %378, %376, %379 : vector<8x4xi1>, vector<8x4xf32>
    %cst_183 = arith.constant 1.000000e+00 : f32
    %381 = vector.broadcast %cst_183 : f32 to vector<8x4xf32>
    %382 = arith.divf %381, %380 : vector<8x4xf32>
    %383 = arith.mulf %374, %382 : vector<8x4xf32>
    %384 = vector.shape_cast %332 : vector<1x4xf32> to vector<1x4xf32>
    %385 = vector.broadcast %384 : vector<1x4xf32> to vector<8x4xf32>
    %386 = arith.select %378, %383, %385 : vector<8x4xi1>, vector<8x4xf32>
    %387 = arith.mulf %375, %382 : vector<8x4xf32>
    %388 = vector.shape_cast %336 : vector<1x4xf32> to vector<1x4xf32>
    %389 = vector.broadcast %388 : vector<1x4xf32> to vector<8x4xf32>
    %390 = arith.select %378, %387, %389 : vector<8x4xi1>, vector<8x4xf32>
    %cst_184 = arith.constant dense<0.000000e+00> : vector<8x128xf32>
    %391 = tpu.matmul %386, %32, %cst_184 {dimension_numbers = #tpu.dot_dimension_numbers<[1], [0], [0], [1], [0, 0, 1, 1], [], []>} : vector<8x4xf32>, vector<4x128xf32>, vector<8x128xf32> -> vector<8x128xf32>
    %392 = arith.addf %366, %391 : vector<8x128xf32>
    %cst_185 = arith.constant dense<0.000000e+00> : vector<8x128xf32>
    %393 = tpu.matmul %390, %40, %cst_185 {dimension_numbers = #tpu.dot_dimension_numbers<[1], [0], [0], [1], [0, 0, 1, 1], [], []>} : vector<8x4xf32>, vector<4x128xf32>, vector<8x128xf32> -> vector<8x128xf32>
    %394 = arith.addf %392, %393 : vector<8x128xf32>
    %395 = vector.extract_strided_slice %337 {offsets = [0, 16], sizes = [8, 8], strides = [1, 1]} : vector<8x32xf32> to vector<8x8xf32>
    %cst_186 = arith.constant dense<0.000000e+00> : vector<8x8xf32>
    %396 = tpu.matmul %26, %395, %cst_186 {dimension_numbers = #tpu.dot_dimension_numbers<[1], [1], [0], [0], [0, 0, 1, 0], [], []>} : vector<8x8xf32>, vector<8x8xf32>, vector<8x8xf32> -> vector<8x8xf32>
    %cst_187 = arith.constant dense<0xFF800000> : vector<8xf32>
    %397 = vector.multi_reduction <maximumf>, %396, %cst_187 [1] : vector<8x8xf32> to vector<8xf32>
    %398 = vector.shape_cast %397 : vector<8xf32> to vector<8x1xf32>
    %399 = vector.broadcast %398 : vector<8x1xf32> to vector<8x8xf32>
    %400 = arith.subf %396, %399 : vector<8x8xf32>
    %401 = math.exp %400 : vector<8x8xf32>
    %cst_188 = arith.constant dense<0.000000e+00> : vector<8x4xf32>
    %402 = tpu.matmul %401, %327, %cst_188 {dimension_numbers = #tpu.dot_dimension_numbers<[1], [0], [0], [1], [0, 0, 1, 1], [], []>} : vector<8x8xf32>, vector<8x4xf32>, vector<8x4xf32> -> vector<8x4xf32>
    %cst_189 = arith.constant dense<0.000000e+00> : vector<8x4xf32>
    %403 = tpu.matmul %401, %328, %cst_189 {dimension_numbers = #tpu.dot_dimension_numbers<[1], [0], [0], [1], [0, 0, 1, 1], [], []>} : vector<8x8xf32>, vector<8x4xf32>, vector<8x4xf32> -> vector<8x4xf32>
    %cst_190 = arith.constant dense<0.000000e+00> : vector<8x4xf32>
    %404 = tpu.matmul %401, %326, %cst_190 {dimension_numbers = #tpu.dot_dimension_numbers<[1], [0], [0], [1], [0, 0, 1, 1], [], []>} : vector<8x8xf32>, vector<8x4xf32>, vector<8x4xf32> -> vector<8x4xf32>
    %cst_191 = arith.constant 0.000000e+00 : f32
    %405 = vector.broadcast %cst_191 : f32 to vector<8x4xf32>
    %406 = arith.cmpf ogt, %404, %405 : vector<8x4xf32>
    %cst_192 = arith.constant 1.000000e+00 : f32
    %407 = vector.broadcast %cst_192 : f32 to vector<8x4xf32>
    %408 = arith.select %406, %404, %407 : vector<8x4xi1>, vector<8x4xf32>
    %cst_193 = arith.constant 1.000000e+00 : f32
    %409 = vector.broadcast %cst_193 : f32 to vector<8x4xf32>
    %410 = arith.divf %409, %408 : vector<8x4xf32>
    %411 = arith.mulf %402, %410 : vector<8x4xf32>
    %412 = vector.shape_cast %332 : vector<1x4xf32> to vector<1x4xf32>
    %413 = vector.broadcast %412 : vector<1x4xf32> to vector<8x4xf32>
    %414 = arith.select %406, %411, %413 : vector<8x4xi1>, vector<8x4xf32>
    %415 = arith.mulf %403, %410 : vector<8x4xf32>
    %416 = vector.shape_cast %336 : vector<1x4xf32> to vector<1x4xf32>
    %417 = vector.broadcast %416 : vector<1x4xf32> to vector<8x4xf32>
    %418 = arith.select %406, %415, %417 : vector<8x4xi1>, vector<8x4xf32>
    %cst_194 = arith.constant dense<0.000000e+00> : vector<8x128xf32>
    %419 = tpu.matmul %414, %34, %cst_194 {dimension_numbers = #tpu.dot_dimension_numbers<[1], [0], [0], [1], [0, 0, 1, 1], [], []>} : vector<8x4xf32>, vector<4x128xf32>, vector<8x128xf32> -> vector<8x128xf32>
    %420 = arith.addf %394, %419 : vector<8x128xf32>
    %cst_195 = arith.constant dense<0.000000e+00> : vector<8x128xf32>
    %421 = tpu.matmul %418, %42, %cst_195 {dimension_numbers = #tpu.dot_dimension_numbers<[1], [0], [0], [1], [0, 0, 1, 1], [], []>} : vector<8x4xf32>, vector<4x128xf32>, vector<8x128xf32> -> vector<8x128xf32>
    %422 = arith.addf %420, %421 : vector<8x128xf32>
    %423 = vector.extract_strided_slice %337 {offsets = [0, 24], sizes = [8, 8], strides = [1, 1]} : vector<8x32xf32> to vector<8x8xf32>
    %cst_196 = arith.constant dense<0.000000e+00> : vector<8x8xf32>
    %424 = tpu.matmul %28, %423, %cst_196 {dimension_numbers = #tpu.dot_dimension_numbers<[1], [1], [0], [0], [0, 0, 1, 0], [], []>} : vector<8x8xf32>, vector<8x8xf32>, vector<8x8xf32> -> vector<8x8xf32>
    %cst_197 = arith.constant dense<0xFF800000> : vector<8xf32>
    %425 = vector.multi_reduction <maximumf>, %424, %cst_197 [1] : vector<8x8xf32> to vector<8xf32>
    %426 = vector.shape_cast %425 : vector<8xf32> to vector<8x1xf32>
    %427 = vector.broadcast %426 : vector<8x1xf32> to vector<8x8xf32>
    %428 = arith.subf %424, %427 : vector<8x8xf32>
    %429 = math.exp %428 : vector<8x8xf32>
    %cst_198 = arith.constant dense<0.000000e+00> : vector<8x4xf32>
    %430 = tpu.matmul %429, %327, %cst_198 {dimension_numbers = #tpu.dot_dimension_numbers<[1], [0], [0], [1], [0, 0, 1, 1], [], []>} : vector<8x8xf32>, vector<8x4xf32>, vector<8x4xf32> -> vector<8x4xf32>
    %cst_199 = arith.constant dense<0.000000e+00> : vector<8x4xf32>
    %431 = tpu.matmul %429, %328, %cst_199 {dimension_numbers = #tpu.dot_dimension_numbers<[1], [0], [0], [1], [0, 0, 1, 1], [], []>} : vector<8x8xf32>, vector<8x4xf32>, vector<8x4xf32> -> vector<8x4xf32>
    %cst_200 = arith.constant dense<0.000000e+00> : vector<8x4xf32>
    %432 = tpu.matmul %429, %326, %cst_200 {dimension_numbers = #tpu.dot_dimension_numbers<[1], [0], [0], [1], [0, 0, 1, 1], [], []>} : vector<8x8xf32>, vector<8x4xf32>, vector<8x4xf32> -> vector<8x4xf32>
    %cst_201 = arith.constant 0.000000e+00 : f32
    %433 = vector.broadcast %cst_201 : f32 to vector<8x4xf32>
    %434 = arith.cmpf ogt, %432, %433 : vector<8x4xf32>
    %cst_202 = arith.constant 1.000000e+00 : f32
    %435 = vector.broadcast %cst_202 : f32 to vector<8x4xf32>
    %436 = arith.select %434, %432, %435 : vector<8x4xi1>, vector<8x4xf32>
    %cst_203 = arith.constant 1.000000e+00 : f32
    %437 = vector.broadcast %cst_203 : f32 to vector<8x4xf32>
    %438 = arith.divf %437, %436 : vector<8x4xf32>
    %439 = arith.mulf %430, %438 : vector<8x4xf32>
    %440 = vector.shape_cast %332 : vector<1x4xf32> to vector<1x4xf32>
    %441 = vector.broadcast %440 : vector<1x4xf32> to vector<8x4xf32>
    %442 = arith.select %434, %439, %441 : vector<8x4xi1>, vector<8x4xf32>
    %443 = arith.mulf %431, %438 : vector<8x4xf32>
    %444 = vector.shape_cast %336 : vector<1x4xf32> to vector<1x4xf32>
    %445 = vector.broadcast %444 : vector<1x4xf32> to vector<8x4xf32>
    %446 = arith.select %434, %443, %445 : vector<8x4xi1>, vector<8x4xf32>
    %cst_204 = arith.constant dense<0.000000e+00> : vector<8x128xf32>
    %447 = tpu.matmul %442, %36, %cst_204 {dimension_numbers = #tpu.dot_dimension_numbers<[1], [0], [0], [1], [0, 0, 1, 1], [], []>} : vector<8x4xf32>, vector<4x128xf32>, vector<8x128xf32> -> vector<8x128xf32>
    %448 = arith.addf %422, %447 : vector<8x128xf32>
    %cst_205 = arith.constant dense<0.000000e+00> : vector<8x128xf32>
    %449 = tpu.matmul %446, %44, %cst_205 {dimension_numbers = #tpu.dot_dimension_numbers<[1], [0], [0], [1], [0, 0, 1, 1], [], []>} : vector<8x4xf32>, vector<4x128xf32>, vector<8x128xf32> -> vector<8x128xf32>
    %450 = arith.addf %448, %449 : vector<8x128xf32>
    %451 = vector.broadcast %20 : vector<1x128xf32> to vector<8x128xf32>
    %452 = arith.addf %450, %451 : vector<8x128xf32>
    %c2_206 = arith.constant 2 : index
    %c0_207 = arith.constant 0 : index
    %c0_208 = arith.constant 0 : index
    %453 = vector.load %arg12[%c2_206, %c0_207, %c0_208] : memref<4x8x128xf32, #tpu.memory_space<vmem>>, vector<1x8x128xf32>
    %454 = vector.shape_cast %453 : vector<1x8x128xf32> to vector<8x128xf32>
    %455 = vector.shape_cast %452 : vector<8x128xf32> to vector<1x8x128xf32>
    tpu.vector_store %arg12[%c2_206, %c0_207, %c0_208], %455 {strides = array<i32>} : memref<4x8x128xf32, #tpu.memory_space<vmem>>, vector<1x8x128xf32>,
    %c3_209 = arith.constant 3 : index
    %c0_210 = arith.constant 0 : index
    %c0_211 = arith.constant 0 : index
    %456 = vector.load %arg2[%c3_209, %c0_210, %c0_211] : memref<4x8x4xf32, #tpu.memory_space<vmem>>, vector<1x8x4xf32>
    %457 = vector.shape_cast %456 : vector<1x8x4xf32> to vector<8x4xf32>
    %c3_212 = arith.constant 3 : index
    %c0_213 = arith.constant 0 : index
    %c0_214 = arith.constant 0 : index
    %458 = vector.load %arg3[%c3_212, %c0_213, %c0_214] : memref<4x8x4xf32, #tpu.memory_space<vmem>>, vector<1x8x4xf32>
    %459 = vector.shape_cast %458 : vector<1x8x4xf32> to vector<8x4xf32>
    %cst_215 = arith.constant 0.000000e+00 : f32
    %460 = vector.broadcast %cst_215 : f32 to vector<8x4xf32>
    %461 = arith.cmpf one, %459, %460 : vector<8x4xf32>
    %462 = arith.extui %461 : vector<8x4xi1> to vector<8x4xi32>
    %463 = arith.sitofp %462 : vector<8x4xi32> to vector<8x4xf32>
    %464 = arith.mulf %463, %457 : vector<8x4xf32>
    %465 = arith.mulf %463, %459 : vector<8x4xf32>
    %cst_216 = arith.constant dense<0.000000e+00> : vector<4xf32>
    %466 = vector.multi_reduction <add>, %457, %cst_216 [0] : vector<8x4xf32> to vector<4xf32>
    %467 = vector.shape_cast %466 : vector<4xf32> to vector<1x4xf32>
    %cst_217 = arith.constant 8.000000e+00 : f32
    %468 = vector.broadcast %cst_217 : f32 to vector<1x4xf32>
    %469 = arith.divf %467, %468 : vector<1x4xf32>
    %cst_218 = arith.constant dense<0.000000e+00> : vector<4xf32>
    %470 = vector.multi_reduction <add>, %459, %cst_218 [0] : vector<8x4xf32> to vector<4xf32>
    %471 = vector.shape_cast %470 : vector<4xf32> to vector<1x4xf32>
    %cst_219 = arith.constant 8.000000e+00 : f32
    %472 = vector.broadcast %cst_219 : f32 to vector<1x4xf32>
    %473 = arith.divf %471, %472 : vector<1x4xf32>
    %474 = vector.extract_strided_slice %19 {offsets = [24, 0], sizes = [8, 32], strides = [1, 1]} : vector<32x32xf32> to vector<8x32xf32>
    %cst_220 = arith.constant 0.000000e+00 : f32
    %475 = vector.broadcast %cst_220 : f32 to vector<8x128xf32>
    %476 = vector.extract_strided_slice %474 {offsets = [0, 0], sizes = [8, 8], strides = [1, 1]} : vector<8x32xf32> to vector<8x8xf32>
    %cst_221 = arith.constant dense<0.000000e+00> : vector<8x8xf32>
    %477 = tpu.matmul %22, %476, %cst_221 {dimension_numbers = #tpu.dot_dimension_numbers<[1], [1], [0], [0], [0, 0, 1, 0], [], []>} : vector<8x8xf32>, vector<8x8xf32>, vector<8x8xf32> -> vector<8x8xf32>
    %cst_222 = arith.constant dense<0xFF800000> : vector<8xf32>
    %478 = vector.multi_reduction <maximumf>, %477, %cst_222 [1] : vector<8x8xf32> to vector<8xf32>
    %479 = vector.shape_cast %478 : vector<8xf32> to vector<8x1xf32>
    %480 = vector.broadcast %479 : vector<8x1xf32> to vector<8x8xf32>
    %481 = arith.subf %477, %480 : vector<8x8xf32>
    %482 = math.exp %481 : vector<8x8xf32>
    %cst_223 = arith.constant dense<0.000000e+00> : vector<8x4xf32>
    %483 = tpu.matmul %482, %464, %cst_223 {dimension_numbers = #tpu.dot_dimension_numbers<[1], [0], [0], [1], [0, 0, 1, 1], [], []>} : vector<8x8xf32>, vector<8x4xf32>, vector<8x4xf32> -> vector<8x4xf32>
    %cst_224 = arith.constant dense<0.000000e+00> : vector<8x4xf32>
    %484 = tpu.matmul %482, %465, %cst_224 {dimension_numbers = #tpu.dot_dimension_numbers<[1], [0], [0], [1], [0, 0, 1, 1], [], []>} : vector<8x8xf32>, vector<8x4xf32>, vector<8x4xf32> -> vector<8x4xf32>
    %cst_225 = arith.constant dense<0.000000e+00> : vector<8x4xf32>
    %485 = tpu.matmul %482, %463, %cst_225 {dimension_numbers = #tpu.dot_dimension_numbers<[1], [0], [0], [1], [0, 0, 1, 1], [], []>} : vector<8x8xf32>, vector<8x4xf32>, vector<8x4xf32> -> vector<8x4xf32>
    %cst_226 = arith.constant 0.000000e+00 : f32
    %486 = vector.broadcast %cst_226 : f32 to vector<8x4xf32>
    %487 = arith.cmpf ogt, %485, %486 : vector<8x4xf32>
    %cst_227 = arith.constant 1.000000e+00 : f32
    %488 = vector.broadcast %cst_227 : f32 to vector<8x4xf32>
    %489 = arith.select %487, %485, %488 : vector<8x4xi1>, vector<8x4xf32>
    %cst_228 = arith.constant 1.000000e+00 : f32
    %490 = vector.broadcast %cst_228 : f32 to vector<8x4xf32>
    %491 = arith.divf %490, %489 : vector<8x4xf32>
    %492 = arith.mulf %483, %491 : vector<8x4xf32>
    %493 = vector.shape_cast %469 : vector<1x4xf32> to vector<1x4xf32>
    %494 = vector.broadcast %493 : vector<1x4xf32> to vector<8x4xf32>
    %495 = arith.select %487, %492, %494 : vector<8x4xi1>, vector<8x4xf32>
    %496 = arith.mulf %484, %491 : vector<8x4xf32>
    %497 = vector.shape_cast %473 : vector<1x4xf32> to vector<1x4xf32>
    %498 = vector.broadcast %497 : vector<1x4xf32> to vector<8x4xf32>
    %499 = arith.select %487, %496, %498 : vector<8x4xi1>, vector<8x4xf32>
    %cst_229 = arith.constant dense<0.000000e+00> : vector<8x128xf32>
    %500 = tpu.matmul %495, %30, %cst_229 {dimension_numbers = #tpu.dot_dimension_numbers<[1], [0], [0], [1], [0, 0, 1, 1], [], []>} : vector<8x4xf32>, vector<4x128xf32>, vector<8x128xf32> -> vector<8x128xf32>
    %501 = arith.addf %475, %500 : vector<8x128xf32>
    %cst_230 = arith.constant dense<0.000000e+00> : vector<8x128xf32>
    %502 = tpu.matmul %499, %38, %cst_230 {dimension_numbers = #tpu.dot_dimension_numbers<[1], [0], [0], [1], [0, 0, 1, 1], [], []>} : vector<8x4xf32>, vector<4x128xf32>, vector<8x128xf32> -> vector<8x128xf32>
    %503 = arith.addf %501, %502 : vector<8x128xf32>
    %504 = vector.extract_strided_slice %474 {offsets = [0, 8], sizes = [8, 8], strides = [1, 1]} : vector<8x32xf32> to vector<8x8xf32>
    %cst_231 = arith.constant dense<0.000000e+00> : vector<8x8xf32>
    %505 = tpu.matmul %24, %504, %cst_231 {dimension_numbers = #tpu.dot_dimension_numbers<[1], [1], [0], [0], [0, 0, 1, 0], [], []>} : vector<8x8xf32>, vector<8x8xf32>, vector<8x8xf32> -> vector<8x8xf32>
    %cst_232 = arith.constant dense<0xFF800000> : vector<8xf32>
    %506 = vector.multi_reduction <maximumf>, %505, %cst_232 [1] : vector<8x8xf32> to vector<8xf32>
    %507 = vector.shape_cast %506 : vector<8xf32> to vector<8x1xf32>
    %508 = vector.broadcast %507 : vector<8x1xf32> to vector<8x8xf32>
    %509 = arith.subf %505, %508 : vector<8x8xf32>
    %510 = math.exp %509 : vector<8x8xf32>
    %cst_233 = arith.constant dense<0.000000e+00> : vector<8x4xf32>
    %511 = tpu.matmul %510, %464, %cst_233 {dimension_numbers = #tpu.dot_dimension_numbers<[1], [0], [0], [1], [0, 0, 1, 1], [], []>} : vector<8x8xf32>, vector<8x4xf32>, vector<8x4xf32> -> vector<8x4xf32>
    %cst_234 = arith.constant dense<0.000000e+00> : vector<8x4xf32>
    %512 = tpu.matmul %510, %465, %cst_234 {dimension_numbers = #tpu.dot_dimension_numbers<[1], [0], [0], [1], [0, 0, 1, 1], [], []>} : vector<8x8xf32>, vector<8x4xf32>, vector<8x4xf32> -> vector<8x4xf32>
    %cst_235 = arith.constant dense<0.000000e+00> : vector<8x4xf32>
    %513 = tpu.matmul %510, %463, %cst_235 {dimension_numbers = #tpu.dot_dimension_numbers<[1], [0], [0], [1], [0, 0, 1, 1], [], []>} : vector<8x8xf32>, vector<8x4xf32>, vector<8x4xf32> -> vector<8x4xf32>
    %cst_236 = arith.constant 0.000000e+00 : f32
    %514 = vector.broadcast %cst_236 : f32 to vector<8x4xf32>
    %515 = arith.cmpf ogt, %513, %514 : vector<8x4xf32>
    %cst_237 = arith.constant 1.000000e+00 : f32
    %516 = vector.broadcast %cst_237 : f32 to vector<8x4xf32>
    %517 = arith.select %515, %513, %516 : vector<8x4xi1>, vector<8x4xf32>
    %cst_238 = arith.constant 1.000000e+00 : f32
    %518 = vector.broadcast %cst_238 : f32 to vector<8x4xf32>
    %519 = arith.divf %518, %517 : vector<8x4xf32>
    %520 = arith.mulf %511, %519 : vector<8x4xf32>
    %521 = vector.shape_cast %469 : vector<1x4xf32> to vector<1x4xf32>
    %522 = vector.broadcast %521 : vector<1x4xf32> to vector<8x4xf32>
    %523 = arith.select %515, %520, %522 : vector<8x4xi1>, vector<8x4xf32>
    %524 = arith.mulf %512, %519 : vector<8x4xf32>
    %525 = vector.shape_cast %473 : vector<1x4xf32> to vector<1x4xf32>
    %526 = vector.broadcast %525 : vector<1x4xf32> to vector<8x4xf32>
    %527 = arith.select %515, %524, %526 : vector<8x4xi1>, vector<8x4xf32>
    %cst_239 = arith.constant dense<0.000000e+00> : vector<8x128xf32>
    %528 = tpu.matmul %523, %32, %cst_239 {dimension_numbers = #tpu.dot_dimension_numbers<[1], [0], [0], [1], [0, 0, 1, 1], [], []>} : vector<8x4xf32>, vector<4x128xf32>, vector<8x128xf32> -> vector<8x128xf32>
    %529 = arith.addf %503, %528 : vector<8x128xf32>
    %cst_240 = arith.constant dense<0.000000e+00> : vector<8x128xf32>
    %530 = tpu.matmul %527, %40, %cst_240 {dimension_numbers = #tpu.dot_dimension_numbers<[1], [0], [0], [1], [0, 0, 1, 1], [], []>} : vector<8x4xf32>, vector<4x128xf32>, vector<8x128xf32> -> vector<8x128xf32>
    %531 = arith.addf %529, %530 : vector<8x128xf32>
    %532 = vector.extract_strided_slice %474 {offsets = [0, 16], sizes = [8, 8], strides = [1, 1]} : vector<8x32xf32> to vector<8x8xf32>
    %cst_241 = arith.constant dense<0.000000e+00> : vector<8x8xf32>
    %533 = tpu.matmul %26, %532, %cst_241 {dimension_numbers = #tpu.dot_dimension_numbers<[1], [1], [0], [0], [0, 0, 1, 0], [], []>} : vector<8x8xf32>, vector<8x8xf32>, vector<8x8xf32> -> vector<8x8xf32>
    %cst_242 = arith.constant dense<0xFF800000> : vector<8xf32>
    %534 = vector.multi_reduction <maximumf>, %533, %cst_242 [1] : vector<8x8xf32> to vector<8xf32>
    %535 = vector.shape_cast %534 : vector<8xf32> to vector<8x1xf32>
    %536 = vector.broadcast %535 : vector<8x1xf32> to vector<8x8xf32>
    %537 = arith.subf %533, %536 : vector<8x8xf32>
    %538 = math.exp %537 : vector<8x8xf32>
    %cst_243 = arith.constant dense<0.000000e+00> : vector<8x4xf32>
    %539 = tpu.matmul %538, %464, %cst_243 {dimension_numbers = #tpu.dot_dimension_numbers<[1], [0], [0], [1], [0, 0, 1, 1], [], []>} : vector<8x8xf32>, vector<8x4xf32>, vector<8x4xf32> -> vector<8x4xf32>
    %cst_244 = arith.constant dense<0.000000e+00> : vector<8x4xf32>
    %540 = tpu.matmul %538, %465, %cst_244 {dimension_numbers = #tpu.dot_dimension_numbers<[1], [0], [0], [1], [0, 0, 1, 1], [], []>} : vector<8x8xf32>, vector<8x4xf32>, vector<8x4xf32> -> vector<8x4xf32>
    %cst_245 = arith.constant dense<0.000000e+00> : vector<8x4xf32>
    %541 = tpu.matmul %538, %463, %cst_245 {dimension_numbers = #tpu.dot_dimension_numbers<[1], [0], [0], [1], [0, 0, 1, 1], [], []>} : vector<8x8xf32>, vector<8x4xf32>, vector<8x4xf32> -> vector<8x4xf32>
    %cst_246 = arith.constant 0.000000e+00 : f32
    %542 = vector.broadcast %cst_246 : f32 to vector<8x4xf32>
    %543 = arith.cmpf ogt, %541, %542 : vector<8x4xf32>
    %cst_247 = arith.constant 1.000000e+00 : f32
    %544 = vector.broadcast %cst_247 : f32 to vector<8x4xf32>
    %545 = arith.select %543, %541, %544 : vector<8x4xi1>, vector<8x4xf32>
    %cst_248 = arith.constant 1.000000e+00 : f32
    %546 = vector.broadcast %cst_248 : f32 to vector<8x4xf32>
    %547 = arith.divf %546, %545 : vector<8x4xf32>
    %548 = arith.mulf %539, %547 : vector<8x4xf32>
    %549 = vector.shape_cast %469 : vector<1x4xf32> to vector<1x4xf32>
    %550 = vector.broadcast %549 : vector<1x4xf32> to vector<8x4xf32>
    %551 = arith.select %543, %548, %550 : vector<8x4xi1>, vector<8x4xf32>
    %552 = arith.mulf %540, %547 : vector<8x4xf32>
    %553 = vector.shape_cast %473 : vector<1x4xf32> to vector<1x4xf32>
    %554 = vector.broadcast %553 : vector<1x4xf32> to vector<8x4xf32>
    %555 = arith.select %543, %552, %554 : vector<8x4xi1>, vector<8x4xf32>
    %cst_249 = arith.constant dense<0.000000e+00> : vector<8x128xf32>
    %556 = tpu.matmul %551, %34, %cst_249 {dimension_numbers = #tpu.dot_dimension_numbers<[1], [0], [0], [1], [0, 0, 1, 1], [], []>} : vector<8x4xf32>, vector<4x128xf32>, vector<8x128xf32> -> vector<8x128xf32>
    %557 = arith.addf %531, %556 : vector<8x128xf32>
    %cst_250 = arith.constant dense<0.000000e+00> : vector<8x128xf32>
    %558 = tpu.matmul %555, %42, %cst_250 {dimension_numbers = #tpu.dot_dimension_numbers<[1], [0], [0], [1], [0, 0, 1, 1], [], []>} : vector<8x4xf32>, vector<4x128xf32>, vector<8x128xf32> -> vector<8x128xf32>
    %559 = arith.addf %557, %558 : vector<8x128xf32>
    %560 = vector.extract_strided_slice %474 {offsets = [0, 24], sizes = [8, 8], strides = [1, 1]} : vector<8x32xf32> to vector<8x8xf32>
    %cst_251 = arith.constant dense<0.000000e+00> : vector<8x8xf32>
    %561 = tpu.matmul %28, %560, %cst_251 {dimension_numbers = #tpu.dot_dimension_numbers<[1], [1], [0], [0], [0, 0, 1, 0], [], []>} : vector<8x8xf32>, vector<8x8xf32>, vector<8x8xf32> -> vector<8x8xf32>
    %cst_252 = arith.constant dense<0xFF800000> : vector<8xf32>
    %562 = vector.multi_reduction <maximumf>, %561, %cst_252 [1] : vector<8x8xf32> to vector<8xf32>
    %563 = vector.shape_cast %562 : vector<8xf32> to vector<8x1xf32>
    %564 = vector.broadcast %563 : vector<8x1xf32> to vector<8x8xf32>
    %565 = arith.subf %561, %564 : vector<8x8xf32>
    %566 = math.exp %565 : vector<8x8xf32>
    %cst_253 = arith.constant dense<0.000000e+00> : vector<8x4xf32>
    %567 = tpu.matmul %566, %464, %cst_253 {dimension_numbers = #tpu.dot_dimension_numbers<[1], [0], [0], [1], [0, 0, 1, 1], [], []>} : vector<8x8xf32>, vector<8x4xf32>, vector<8x4xf32> -> vector<8x4xf32>
    %cst_254 = arith.constant dense<0.000000e+00> : vector<8x4xf32>
    %568 = tpu.matmul %566, %465, %cst_254 {dimension_numbers = #tpu.dot_dimension_numbers<[1], [0], [0], [1], [0, 0, 1, 1], [], []>} : vector<8x8xf32>, vector<8x4xf32>, vector<8x4xf32> -> vector<8x4xf32>
    %cst_255 = arith.constant dense<0.000000e+00> : vector<8x4xf32>
    %569 = tpu.matmul %566, %463, %cst_255 {dimension_numbers = #tpu.dot_dimension_numbers<[1], [0], [0], [1], [0, 0, 1, 1], [], []>} : vector<8x8xf32>, vector<8x4xf32>, vector<8x4xf32> -> vector<8x4xf32>
    %cst_256 = arith.constant 0.000000e+00 : f32
    %570 = vector.broadcast %cst_256 : f32 to vector<8x4xf32>
    %571 = arith.cmpf ogt, %569, %570 : vector<8x4xf32>
    %cst_257 = arith.constant 1.000000e+00 : f32
    %572 = vector.broadcast %cst_257 : f32 to vector<8x4xf32>
    %573 = arith.select %571, %569, %572 : vector<8x4xi1>, vector<8x4xf32>
    %cst_258 = arith.constant 1.000000e+00 : f32
    %574 = vector.broadcast %cst_258 : f32 to vector<8x4xf32>
    %575 = arith.divf %574, %573 : vector<8x4xf32>
    %576 = arith.mulf %567, %575 : vector<8x4xf32>
    %577 = vector.shape_cast %469 : vector<1x4xf32> to vector<1x4xf32>
    %578 = vector.broadcast %577 : vector<1x4xf32> to vector<8x4xf32>
    %579 = arith.select %571, %576, %578 : vector<8x4xi1>, vector<8x4xf32>
    %580 = arith.mulf %568, %575 : vector<8x4xf32>
    %581 = vector.shape_cast %473 : vector<1x4xf32> to vector<1x4xf32>
    %582 = vector.broadcast %581 : vector<1x4xf32> to vector<8x4xf32>
    %583 = arith.select %571, %580, %582 : vector<8x4xi1>, vector<8x4xf32>
    %cst_259 = arith.constant dense<0.000000e+00> : vector<8x128xf32>
    %584 = tpu.matmul %579, %36, %cst_259 {dimension_numbers = #tpu.dot_dimension_numbers<[1], [0], [0], [1], [0, 0, 1, 1], [], []>} : vector<8x4xf32>, vector<4x128xf32>, vector<8x128xf32> -> vector<8x128xf32>
    %585 = arith.addf %559, %584 : vector<8x128xf32>
    %cst_260 = arith.constant dense<0.000000e+00> : vector<8x128xf32>
    %586 = tpu.matmul %583, %44, %cst_260 {dimension_numbers = #tpu.dot_dimension_numbers<[1], [0], [0], [1], [0, 0, 1, 1], [], []>} : vector<8x4xf32>, vector<4x128xf32>, vector<8x128xf32> -> vector<8x128xf32>
    %587 = arith.addf %585, %586 : vector<8x128xf32>
    %588 = vector.broadcast %20 : vector<1x128xf32> to vector<8x128xf32>
    %589 = arith.addf %587, %588 : vector<8x128xf32>
    %c3_261 = arith.constant 3 : index
    %c0_262 = arith.constant 0 : index
    %c0_263 = arith.constant 0 : index
    %590 = vector.load %arg12[%c3_261, %c0_262, %c0_263] : memref<4x8x128xf32, #tpu.memory_space<vmem>>, vector<1x8x128xf32>
    %591 = vector.shape_cast %590 : vector<1x8x128xf32> to vector<8x128xf32>
    %592 = vector.shape_cast %589 : vector<8x128xf32> to vector<1x8x128xf32>
    tpu.vector_store %arg12[%c3_261, %c0_262, %c0_263], %592 {strides = array<i32>} : memref<4x8x128xf32, #tpu.memory_space<vmem>>, vector<1x8x128xf32>,
    return
  }
  func.func @transform_0(%arg0: i32) -> (i32, i32) {
    %c0_i32 = arith.constant 0 : i32
    %c0_i32_0 = arith.constant 0 : i32
    return %arg0, %c0_i32 : i32, i32
  }
  func.func @transform_1(%arg0: i32) -> (i32, i32, i32) {
    %c0_i32 = arith.constant 0 : i32
    %c0_i32_0 = arith.constant 0 : i32
    %c0_i32_1 = arith.constant 0 : i32
    return %arg0, %c0_i32, %c0_i32_0 : i32, i32, i32
  }
  func.func @transform_2(%arg0: i32) -> (i32, i32, i32) {
    %c0_i32 = arith.constant 0 : i32
    %c0_i32_0 = arith.constant 0 : i32
    %c0_i32_1 = arith.constant 0 : i32
    return %arg0, %c0_i32, %c0_i32_0 : i32, i32, i32
  }
  func.func @transform_3(%arg0: i32) -> (i32, i32, i32) {
    %c0_i32 = arith.constant 0 : i32
    %c0_i32_0 = arith.constant 0 : i32
    %c0_i32_1 = arith.constant 0 : i32
    %c0_i32_2 = arith.constant 0 : i32
    return %c0_i32, %c0_i32_0, %c0_i32_1 : i32, i32, i32
  }
  func.func @transform_4(%arg0: i32) -> (i32, i32) {
    %c0_i32 = arith.constant 0 : i32
    %c0_i32_0 = arith.constant 0 : i32
    %c0_i32_1 = arith.constant 0 : i32
    return %c0_i32, %c0_i32_0 : i32, i32
  }
  func.func @transform_5(%arg0: i32) -> (i32, i32) {
    %c0_i32 = arith.constant 0 : i32
    %c0_i32_0 = arith.constant 0 : i32
    %c0_i32_1 = arith.constant 0 : i32
    return %c0_i32, %c0_i32_0 : i32, i32
  }
  func.func @transform_6(%arg0: i32) -> (i32, i32) {
    %c0_i32 = arith.constant 0 : i32
    %c0_i32_0 = arith.constant 0 : i32
    %c0_i32_1 = arith.constant 0 : i32
    return %c0_i32, %c0_i32_0 : i32, i32
  }
  func.func @transform_7(%arg0: i32) -> (i32, i32) {
    %c0_i32 = arith.constant 0 : i32
    %c0_i32_0 = arith.constant 0 : i32
    %c0_i32_1 = arith.constant 0 : i32
    return %c0_i32, %c0_i32_0 : i32, i32
  }
  func.func @transform_8(%arg0: i32) -> (i32, i32, i32) {
    %c0_i32 = arith.constant 0 : i32
    %c0_i32_0 = arith.constant 0 : i32
    %c0_i32_1 = arith.constant 0 : i32
    %c0_i32_2 = arith.constant 0 : i32
    return %c0_i32, %c0_i32_0, %c0_i32_1 : i32, i32, i32
  }
  func.func @transform_9(%arg0: i32) -> (i32, i32, i32) {
    %c0_i32 = arith.constant 0 : i32
    %c0_i32_0 = arith.constant 0 : i32
    %c0_i32_1 = arith.constant 0 : i32
    %c0_i32_2 = arith.constant 0 : i32
    return %c0_i32, %c0_i32_0, %c0_i32_1 : i32, i32, i32
  }
  func.func @transform_10(%arg0: i32) -> (i32, i32) {
    %c0_i32 = arith.constant 0 : i32
    %c0_i32_0 = arith.constant 0 : i32
    %c0_i32_1 = arith.constant 0 : i32
    return %c0_i32, %c0_i32_0 : i32, i32
  }
  func.func @transform_11(%arg0: i32) -> (i32, i32, i32) {
    %c0_i32 = arith.constant 0 : i32
    %c0_i32_0 = arith.constant 0 : i32
    %c0_i32_1 = arith.constant 0 : i32
    return %arg0, %c0_i32, %c0_i32_0 : i32, i32, i32
  }
}

</mosaic_0001>

<bundles_post_ra>
// kernel: mtan_forward.1
= control target key start
LH: loop header
LB: loop body
LE: loop exit
PB: predicated region body
PF: predicated region fallthrough
CT: control target
= control target key end

     0   :  { %s9572_s17 = smov 0   ;;  %s10718_s0 = inlined_call_operand.vmem [shape: f32[64,1], index: 0, kind: input, shape index: {}]   ;;  %s10719_s1 = inlined_call_operand.vmem [shape: f32[8,8,4], index: 1, kind: input, shape index: {}]   ;;  %s10720_s2 = inlined_call_operand.vmem [shape: f32[8,8,4], index: 2, kind: input, shape index: {}]   ;;  %s10721_s3 = inlined_call_operand.vmem [shape: f32[4,8,8], index: 3, kind: input, shape index: {}]   ;;  %s10722_s4 = inlined_call_operand.vmem [shape: f32[1,32], index: 4, kind: input, shape index: {}]   ;;  %s10723_s5 = inlined_call_operand.vmem [shape: f32[1,32], index: 5, kind: input, shape index: {}]   ;;  %s10724_s6 = inlined_call_operand.vmem [shape: f32[32,32], index: 6, kind: input, shape index: {}]   ;;  %s10725_s7 = inlined_call_operand.vmem [shape: f32[1,32], index: 7, kind: input, shape index: {}]   ;;  %s10726_s8 = inlined_call_operand.vmem [shape: f32[4,4,128], index: 8, kind: input, shape index: {}]   ;;  %s10727_s9 = inlined_call_operand.vmem [shape: f32[4,4,128], index: 9, kind: input, shape index: {}]   ;;  %s10728_s10 = inlined_call_operand.vmem [shape: f32[1,128], index: 10, kind: input, shape index: {}]   ;;  %s10729_s11 = inlined_call_operand.vmem [shape: f32[8,8,128], index: 11, kind: output, shape index: {}]  }
   0x1 LB: > { %s8443_s18 = sadd.s32 4294967295, %s9497_s17   ;;  %p8447_p0 = scmp.ge.s32.totalorder %s9497_s17, 1  ;;  %s9497_s17 = sphi %s9572_s17, %s21_s17  }
   0x2   : > { %p360_p1 = scmp.lt.s32.totalorder %s9497_s17, 3 }
   0x4   : > { %p361_p2 = pnand %p8447_p0, %p360_p1 }
   0x5   : > { %s8448_s19 = sshll.u32 (!%p361_p2), %s8443_s18, 2  ;;  %s9508_s21 = smov (!%p361_p2), 120  }
   0x6   : > { %364 = sbr.rel (%p361_p2) target bundleno = 9749 (0x2615), region = 64  ;;  %p411_p3 = scmp.lt.s32.totalorder (!%p361_p2), %s8448_s19, 7 }
   0x7   : > { %s9510_s30 = smov (!%p361_p2), 112   ;;  %s9511_s28 = smov (!%p361_p2), 104  }
   0xb   : > { %v9499_v0 = vmov 0   ;;  %s10737_s19 = smov (!%p411_p3, %s8448_s19), 7  ;;  %v908_v3 = vld [vmem:[%s10724_s6 + $0x18] sm:$0xff]  ;;  %v907_v4 = vld [vmem:[%s10724_s6 + $0x10] sm:$0xff]  ;;  %v906_v5 = vld [vmem:[%s10724_s6 + $0x8] sm:$0xff] }
   0xc   : > { %9395 = vset.pattern.permute.xlu0 %v9499_v0  ;;  %9396 = vset.pattern.permute.xlu1 %v9499_v0  ;;  %s9580_s20 = sshll.u32 %s10737_s19, 3  ;;  %v905_v6 = vld [vmem:[%s10724_s6] sm:$0xff]  ;;  %v9500_v38 = vmov 683565275   ;;  %v9501_v40 = vmov 2475754826  }
   0xd   : > { %s414_s23 = scalar_lea.vmem %s10718_s0, %s9580_s20  ;;  %8864 = vmatprep.subr.mxu0 %v908_v3  ;;  %v9601_v9 = vld [vmem:[%s10722_s4] ss:$0 sm:$0xff]  ;;  %v9502_v42 = vmov 2131351028   ;;  %v9503_v46 = vmov 2102212464   ;;  %s9877_s26 = scalar_lea.vmem %s10720_s2, %s9580_s20 }
   0xe   : > { %v434_v1 = vld [vmem:[%s414_s23] sm:$0xff]  ;;  %v435_v2 = vld [vmem:[%s414_s23 + $0x8] sm:$0xff]  ;;  %8865 = vmatpush3.msra.mxu0 %v908_v3  ;;  %v436_v7 = vld [vmem:[%s414_s23 + $0x10] sm:$0xff]  ;;  %v9504_v48 = vmov 920167782   ;;  %s9883_s29 = scalar_lea.vmem %s10719_s1, %s9580_s20  ;;  %s10138_s14 = scalar_lea.vmem %s10729_s11, %s9580_s20 }
   0xf   : > { %441 = vperm.xlu0 %9395, %v434_v1   ;;  %8866 = vmatprep.subr.mxu0 %v907_v4  ;;  %v437_v8 = vld [vmem:[%s414_s23 + $0x18] sm:$0xff]  ;;  %v9606_v10 = vld [vmem:[%s10723_s5] ss:$0 sm:$0xff]  ;;  %v9505_v53 = vmov 1326507024  }
  0x10   : > { %8867 = vmatpush3.msra.mxu0 %v907_v4  ;;  %451 = vperm.xlu1 %9396, %v436_v7  }
  0x11   : > { %8868 = vmatprep.subr.mxu0 %v906_v5 }
  0x12   : > { %8869 = vmatpush3.msra.mxu0 %v906_v5 }
  0x13   : > { %446 = vperm.xlu0 %9395, %v435_v2   ;;  %8870 = vmatprep.subr.mxu0 %v905_v6 }
  0x14   : > { %8871 = vmatpush3.msra.mxu0 %v905_v6  ;;  %456 = vperm.xlu1 %9396, %v437_v8  }
  0x8a   : > { %v442_v11 = vpop.permute.xlu0 %441 }
  0x8b   : > { %v465_v12 = vmul.f32 %v9601_v9, %v442_v11 }
  0x8d   : > { %v9610_v13 = vadd.f32 %v9606_v10, %v465_v12 }
  0x8e   : > { %v447_v14 = vpop.permute.xlu0 %446 }
  0x8f   : > { %v486_v15 = vand.u32 2139095040, %v9610_v13  ;;  %v466_v16 = vmul.f32 %v9601_v9, %v447_v14  ;;  %v483_v17 = vand.u32 2147483647, %v9610_v13  ;;  %vm485_vm14 = vcmp.lt.s32.totalorder %v9610_v13, 0 }
  0x91   : > { %v487_v18 = vshrl.u32 %v486_v15, 23  ;;  %v9616_v19 = vadd.f32 %v9606_v10, %v466_v16  ;;  %v490_v20 = vand.u32 8388607, %v483_v17  ;;  %vm484_vm15 = vcmp.le.f32.partialorder %v483_v17, 0.7853982 }
  0x93   : > { %v8458_v21 = vadd.s32 4294967169, %v487_v18  ;;  %v590_v22 = vand.u32 2139095040, %v9616_v19  ;;  %v587_v23 = vand.u32 2147483647, %v9616_v19  ;;  %v491_v26 = vor.u32 8388608, %v490_v20 }
  0x95   : > { %v493_v24 = vadd.s32 1, %v8458_v21  ;;  %v591_v25 = vshrl.u32 %v590_v22, 23  ;;  %v594_v27 = vand.u32 8388607, %v587_v23  ;;  %v9624_v33 = vshll.u32 %v491_v26, 8 }
  0x97   : > { %vm494_vm0 = vcmp.gt.s32.totalorder %v493_v24, 0  ;;  %v8462_v28 = vadd.s32 4294967169, %v591_v25  ;;  %v595_v30 = vor.u32 8388608, %v594_v27 }
  0x98   : > { %v495_v29 = vsel %vm494_vm0, %v493_v24, 0  ;;  %vm589_vm0 = vcmp.lt.s32.totalorder %v9616_v19, 0 }
  0x99   : > { %v497_v31 = vand.u32 31, %v495_v29  ;;  %v597_v32 = vadd.s32 1, %v8462_v28  ;;  %v496_v34 = vshrl.u32 %v495_v29, 5  ;;  %v9626_v36 = vshll.u32 %v595_v30, 8 }
  0x9b   : > { %v498_v35 = vsub.s32 32, %v497_v31  ;;  %vm598_vm1 = vcmp.gt.s32.totalorder %v597_v32, 0  ;;  %v500_v39 = vshll.u32 %v9500_v38, %v497_v31  ;;  %v503_v41 = vshll.u32 %v9501_v40, %v497_v31 }
  0x9c   : > { %v599_v37 = vsel %vm598_vm1, %v597_v32, 0  ;;  %v506_v43 = vshll.u32 %v9502_v42, %v497_v31  ;;  %v509_v47 = vshll.u32 %v9503_v46, %v497_v31  ;;  %v512_v49 = vshll.u32 %v9504_v48, %v497_v31 }
  0x9d   : > { %v601_v44 = vand.u32 31, %v599_v37  ;;  %v501_v45 = vshrl.u32 %v9501_v40, %v498_v35  ;;  %v504_v50 = vshrl.u32 %v9502_v42, %v498_v35  ;;  %v507_v51 = vshrl.u32 %v9503_v46, %v498_v35 }
  0x9e   : > { %v510_v52 = vshrl.u32 %v9504_v48, %v498_v35  ;;  %v513_v54 = vshrl.u32 %v9505_v53, %v498_v35  ;;  %v9638_v55 = vshrl.u32 %v599_v37, 5  ;;  %v499_v57 = vshrl.u32 %v9500_v38, %v498_v35 }
  0x9f   : > { %v602_v56 = vsub.s32 32, %v601_v44  ;;  %v502_v58 = vor.u32 %v501_v45, %v500_v39  ;;  %v505_v59 = vor.u32 %v504_v50, %v503_v41  ;;  %v508_v60 = vor.u32 %v507_v51, %v506_v43 }
  0xa0   : > { %v511_v61 = vor.u32 %v510_v52, %v509_v47  ;;  %v514_v62 = vor.u32 %v513_v54, %v512_v49  ;;  %vm515_vm2 = vcmp.lt.s32.totalorder %v496_v34, 1  ;;  %vm516_vm3 = vcmp.lt.s32.totalorder %v496_v34, 2 }
  0xa1   : > { %vm517_vm4 = vcmp.lt.s32.totalorder %v496_v34, 3  ;;  %vm518_vm5 = vcmp.lt.s32.totalorder %v496_v34, 4  ;;  %v523_v0 = vsel %vm515_vm2, %v502_v58, %v505_v59  ;;  %v527_v2 = vsel %vm515_vm2, %v505_v59, %v508_v60 }
  0xa2   : > { %v520_v63 = vsel %vm518_vm5, %v508_v60, 2102212464  ;;  %v524_v1 = vsel %vm518_vm5, %v511_v61, 920167782  ;;  %v519_v3 = vsel %vm515_vm2, %v499_v57, %v502_v58  ;;  %v528_v6 = vsel %vm518_vm5, %v514_v62, 1326507024 }
  0xa3   : > { %v521_v4 = vsel %vm517_vm4, %v505_v59, %v520_v63  ;;  %v525_v5 = vsel %vm517_vm4, %v508_v60, %v524_v1  ;;  %v529_v8 = vsel %vm517_vm4, %v511_v61, %v528_v6  ;;  %v604_v11 = vshll.u32 %v9500_v38, %v601_v44 }
  0xa4   : > { %v526_v7 = vsel %vm516_vm3, %v523_v0, %v525_v5  ;;  %v605_v12 = vshrl.u32 %v9501_v40, %v602_v56  ;;  %v530_v14 = vsel %vm516_vm3, %v527_v2, %v529_v8  ;;  %v603_v18 = vshrl.u32 %v9500_v38, %v602_v56 }
  0xa5   : > { %v9646_v15 = vmul.u32.u64.low %v9624_v33, %v526_v7  ;;  %v9647_v16 = vmul.u32.u64.high %v9624_v33, %v526_v7, %v9646_v15  ;;  %v522_v20 = vsel %vm516_vm3, %v519_v3, %v521_v4  ;;  %v607_v25 = vshll.u32 %v9501_v40, %v601_v44 }
  0xa6   : > { %v9653_v21 = vmul.u32.u64.low %v9624_v33, %v530_v14  ;;  %v9654_v22 = vmul.u32.u64.high %v9624_v33, %v530_v14, %v9653_v21  ;;  %v606_v24 = vor.u32 %v605_v12, %v604_v11  ;;  %v608_v26 = vshrl.u32 %v9502_v42, %v602_v56 }
  0xa7   : > { %v610_v27 = vshll.u32 %v9502_v42, %v601_v44  ;;  %v611_v28 = vshrl.u32 %v9503_v46, %v602_v56  ;;  %v613_v29 = vshll.u32 %v9503_v46, %v601_v44  ;;  %v614_v30 = vshrl.u32 %v9504_v48, %v602_v56 }
  0xa8   : > { %v616_v31 = vshll.u32 %v9504_v48, %v601_v44  ;;  %v617_v32 = vshrl.u32 %v9505_v53, %v602_v56  ;;  %v538_v34 = vmul.u32 %v9624_v33, %v522_v20  ;;  %v541_v35 = vadd.s32 1, %v9647_v16 }
  0xa9   : > { %v609_v37 = vor.u32 %v608_v26, %v607_v25  ;;  %v612_v39 = vor.u32 %v611_v28, %v610_v27  ;;  %vm540_vm6 = vc.u32 %v9654_v22, %v9646_v15  ;;  %v615_v41 = vor.u32 %v614_v30, %v613_v29 }
  0xaa   : > { %v618_v43 = vor.u32 %v617_v32, %v616_v31  ;;  %vm619_vm7 = vcmp.lt.s32.totalorder %v9638_v55, 1  ;;  %v542_v45 = vsel %vm540_vm6, %v541_v35, %v9647_v16  ;;  %vm620_vm8 = vcmp.lt.s32.totalorder %v9638_v55, 2 }
  0xab   : > { %vm621_vm9 = vcmp.lt.s32.totalorder %v9638_v55, 3  ;;  %vm622_vm10 = vcmp.lt.s32.totalorder %v9638_v55, 4  ;;  %v543_v33 = vadd.s32 %v542_v45, %v538_v34  ;;  %v627_v47 = vsel %vm619_vm7, %v606_v24, %v609_v37 }
  0xac   : > { %v624_v44 = vsel %vm622_vm10, %v612_v39, 2102212464  ;;  %v628_v49 = vsel %vm622_vm10, %v615_v41, 920167782  ;;  %v623_v50 = vsel %vm619_vm7, %v603_v18, %v606_v24  ;;  %v631_v52 = vsel %vm619_vm7, %v609_v37, %v612_v39 }
  0xad   : > { %v629_v51 = vsel %vm621_vm9, %v612_v39, %v628_v49  ;;  %v632_v54 = vsel %vm622_vm10, %v618_v43, 1326507024  ;;  %v544_v56 = vadd.s32 536870912, %v543_v33  ;;  %v625_v57 = vsel %vm621_vm9, %v609_v37, %v624_v44 }
  0xae   : > { %v630_v58 = vsel %vm620_vm8, %v627_v47, %v629_v51  ;;  %v633_v59 = vsel %vm621_vm9, %v615_v41, %v632_v54  ;;  %v626_v2 = vsel %vm620_vm8, %v623_v50, %v625_v57  ;;  %v539_v25 = vadd.s32 %v9646_v15, %v9654_v22 }
  0xaf   : > { %v634_v60 = vsel %vm620_vm8, %v631_v52, %v633_v59  ;;  %v9678_v61 = vmul.u32.u64.low %v9626_v36, %v630_v58  ;;  %v9679_v62 = vmul.u32.u64.high %v9626_v36, %v630_v58, %v9678_v61  ;;  %v545_v63 = vshrl.u32 %v544_v56, 30 }
  0xb0   : > { %v9682_v0 = vmul.u32.u64.low %v9626_v36, %v634_v60  ;;  %v9683_v1 = vmul.u32.u64.high %v9626_v36, %v634_v60, %v9682_v0  ;;  %v642_v6 = vmul.u32 %v9626_v36, %v626_v2  ;;  %vm9701_vm1 = vcmp.le.f32.partialorder %v587_v23, 0.7853982 }
  0xb1   : > { %v546_v3 = vshll.u32 %v545_v63, 30  ;;  %v645_v4 = vadd.s32 1, %v9679_v62  ;;  %v569_v49 = vsub.s32 4, %v545_v63  ;;  %vm575_vm6 = vweird.f32 %v9610_v13 }
  0xb2   : > { %vm644_vm11 = vc.u32 %v9683_v1, %v9678_v61  ;;  %v643_v44 = vadd.s32 %v9678_v61, %v9683_v1  ;;  %vm916_vm7 = vcmask 261120  }
  0xb3   : > { %v547_v5 = vsub.s32 %v543_v33, %v546_v3  ;;  %v646_v7 = vsel %vm644_vm11, %v645_v4, %v9679_v62  ;;  %v570_v59 = vsel %vm485_vm14, %v569_v49, %v545_v63  ;;  %vm679_vm11 = vweird.f32 %v9616_v19 }
  0xb4   : > { %v647_v11 = vadd.s32 %v646_v7, %v642_v6  ;;  %v572_v0 = vsel %vm484_vm15, 0, %v570_v59 }
  0xb5   : > { %v549_v8 = vsub.s32 0, %v547_v5  ;;  %v576_v2 = vadd.s32 3, %v572_v0 }
  0xb6   : > { %v648_v14 = vadd.s32 536870912, %v647_v11 }
  0xb7   : > { %v8459_v12 = vmin.u32 %v549_v8, %v547_v5  ;;  %v577_v7 = vand.u32 3, %v576_v2 }
  0xb8   : > { %v649_v18 = vshrl.u32 %v648_v14, 30 }
  0xb9   : > { %v551_v16 = vclz %v8459_v12  ;;  %vm582_vm2 = vcmp.eq.s32.totalorder %v577_v7, 2  ;;  %vm579_vm3 = vcmp.eq.s32.totalorder %v577_v7, 0  ;;  %vm578_vm5 = vcmp.lt.s32.totalorder %v577_v7, 2 }
  0xba   : > { %v650_v21 = vshll.u32 %v649_v18, 30  ;;  %v673_v4 = vsub.s32 4, %v649_v18 }
  0xbb   : > { %v8460_v20 = vadd.s32 4294967294, %v551_v16 }
  0xbc   : > { %v651_v24 = vsub.s32 %v647_v11, %v650_v21  ;;  %v674_v8 = vsel %vm589_vm0, %v673_v4, %v649_v18 }
  0xbd   : > { %vm8461_vm12 = vcmp.lt.s32.totalorder %v8460_v20, 0  ;;  %v676_v23 = vsel %vm9701_vm1, 0, %v674_v8 }
  0xbe   : > { %v554_v55 = vsel %vm8461_vm12, 0, %v8460_v20  ;;  %v653_v27 = vsub.s32 0, %v651_v24  ;;  %vm9507_vm12 = vmmov 0  }
  0xbf   : > { %v555_v26 = vsub.s32 32, %v554_v55  ;;  %v559_v36 = vsub.s32 4294967266, %v554_v55  ;;  %v556_v28 = vshll.u32 %v547_v5, %v554_v55  ;;  %v480_v5 = vlaneseq }
  0xc0   : > { %v8463_v31 = vmin.u32 %v653_v27, %v651_v24 }
  0xc1   : > { %v557_v29 = vshrl.u32 %v539_v25, %v555_v26  ;;  %v560_v30 = vadd.s32 127, %v559_v36  ;;  %v9708_v12 = vand.u32 127, %v480_v5 }
  0xc2   : > { %v655_v35 = vclz %v8463_v31 }
  0xc3   : > { %v558_v32 = vor.u32 %v557_v29, %v556_v28  ;;  %v561_v34 = vshll.u32 %v560_v30, 23  ;;  %vm482_vm4 = vcmp.eq.s32.totalorder %v9708_v12, 0  ;;  %v9886_v12 = vld [vmem:[%s9877_s26] sm:$0xff] }
  0xc4   : > { %v8464_v39 = vadd.s32 4294967294, %v655_v35 }
  0xc5   : > { %v562_v37 = vor.u32 4788187, %v561_v34  ;;  %v565_v43 = vcvt.s32.f32 %v558_v32 }
  0xc6   : > { %vm8465_vm13 = vcmp.lt.s32.totalorder %v8464_v39, 0 }
  0xc7   : > { %v563_v41 = vand.u32 2147483647, %v562_v37  ;;  %v658_v33 = vsel %vm8465_vm13, 0, %v8464_v39  ;;  %v9506_v37 = vmov 0.0   ;;  %vm1061_vm13 = vcmask 64512  }
  0xc8   : > { %v659_v15 = vsub.s32 32, %v658_v33  ;;  %v663_v22 = vsub.s32 4294967266, %v658_v33  ;;  %v660_v50 = vshll.u32 %v651_v24, %v658_v33  ;;  %v680_v24 = vadd.s32 3, %v676_v23  ;;  %8878 = vmatprep.subr.mxu1 %v9506_v37  ;;  %8893 = vmatprep.subr.mxu0 %v9506_v37  ;;  %v452_v33 = vpop.permute.xlu1 %451 }
  0xc9   : > { %v566_v45 = vmul.f32 %v565_v43, %v563_v41  ;;  %8880 = vmatprep.mubr.msk.f32.mxu1 %vm9507_vm12, %v9506_v37  ;;  %v9732_v41 = vld [vmem:[%s10725_s7] ss:$0 sm:$0xff] }
  0xca   : > { %v661_v51 = vshrl.u32 %v643_v44, %v659_v15  ;;  %v664_v52 = vadd.s32 127, %v663_v22  ;;  %v681_v36 = vand.u32 3, %v680_v24  ;;  %v467_v44 = vmul.f32 %v9601_v9, %v452_v33 }
  0xcb   : > { %v567_v47 = vxor.u32 2147483648, %v566_v45 }
  0xcc   : > { %v662_v57 = vor.u32 %v661_v51, %v660_v50  ;;  %v665_v58 = vshll.u32 %v664_v52, 23  ;;  %vm686_vm8 = vcmp.eq.s32.totalorder %v681_v36, 2  ;;  %vm683_vm9 = vcmp.eq.s32.totalorder %v681_v36, 0  ;;  %v457_v15 = vpop.permute.xlu1 %456 }
  0xcd   : > { %v568_v54 = vsel %vm485_vm14, %v567_v47, %v566_v45  ;;  %vm682_vm10 = vcmp.lt.s32.totalorder %v681_v36, 2  ;;  %v9744_v45 = vld [vmem:[%s10721_s3] sm:$0xff]  ;;  %v9753_v22 = vadd.f32 %v9606_v10, %v467_v44  ;;  %v468_v47 = vmul.f32 %v9601_v9, %v457_v15 }
  0xce   : > { %v571_v56 = vsel %vm484_vm15, %v9610_v13, %v568_v54  ;;  %v666_v60 = vor.u32 4788187, %v665_v58  ;;  %v669_v62 = vcvt.s32.f32 %v662_v57 }
  0xcf   : > { %9397 = vcosq.f32 %v571_v56  ;;  %v694_v49 = vand.u32 2139095040, %v9753_v22  ;;  %v9758_v50 = vadd.f32 %v9606_v10, %v468_v47  ;;  %v691_v10 = vand.u32 2147483647, %v9753_v22 }
  0xd0   : > { %9399 = vsinq.f32 %v571_v56  ;;  %v667_v61 = vand.u32 2147483647, %v666_v60 }
  0xd1   : > { %v695_v51 = vshrl.u32 %v694_v49, 23  ;;  %v798_v52 = vand.u32 2139095040, %v9758_v50  ;;  %v795_v17 = vand.u32 2147483647, %v9758_v50 }
  0xd2   : > { %v670_v1 = vmul.f32 %v669_v62, %v667_v61 }
  0xd3   : > { %v8466_v54 = vadd.s32 4294967169, %v695_v51  ;;  %v799_v56 = vshrl.u32 %v798_v52, 23 }
  0xd4   : > { %v671_v3 = vxor.u32 2147483648, %v670_v1 }
  0xd5   : > { %v701_v57 = vadd.s32 1, %v8466_v54  ;;  %v8470_v58 = vadd.s32 4294967169, %v799_v56 }
  0xd6   : > { %v672_v6 = vsel %vm589_vm0, %v671_v3, %v670_v1 }
  0xd7   : > { %v675_v63 = vsel %vm9701_vm1, %v9616_v19, %v672_v6  ;;  %vm702_vm14 = vcmp.gt.s32.totalorder %v701_v57, 0  ;;  %v805_v59 = vadd.s32 1, %v8470_v58  ;;  %v698_v6 = vand.u32 8388607, %v691_v10 }
  0xd8   : > { %9401 = vcosq.f32 %v675_v63  ;;  %v703_v60 = vsel %vm702_vm14, %v701_v57, 0 }
  0xd9   : > { %9403 = vsinq.f32 %v675_v63  ;;  %vm806_vm15 = vcmp.gt.s32.totalorder %v805_v59, 0  ;;  %v705_v61 = vand.u32 31, %v703_v60  ;;  %v704_v1 = vshrl.u32 %v703_v60, 5 }
  0xda   : > { %v807_v62 = vsel %vm806_vm15, %v805_v59, 0  ;;  %v699_v23 = vor.u32 8388608, %v698_v6  ;;  %vm693_vm15 = vcmp.lt.s32.totalorder %v9753_v22, 0 }
  0xdb   : > { %v706_v0 = vsub.s32 32, %v705_v61  ;;  %v809_v9 = vand.u32 31, %v807_v62  ;;  %v9761_v2 = vshrl.u32 %v807_v62, 5  ;;  %v717_v4 = vshll.u32 %v9503_v46, %v705_v61 }
  0xdc   : > { %v9398_v11 = vpop.eup %9397  ;;  %v708_v63 = vshll.u32 %v9500_v38, %v705_v61  ;;  %v711_v8 = vshll.u32 %v9501_v40, %v705_v61  ;;  %vm723_vm0 = vcmp.lt.s32.totalorder %v704_v1, 1  ;;  %vm725_vm1 = vcmp.lt.s32.totalorder %v704_v1, 3 }
  0xdd   : > { %v9400_v14 = vpop.eup %9399  ;;  %v583_v16 = vxor.u32 2147483648, %v9398_v11  ;;  %v810_v3 = vsub.s32 32, %v809_v9  ;;  %v718_v5 = vshrl.u32 %v9504_v48, %v706_v0  ;;  %v709_v7 = vshrl.u32 %v9501_v40, %v706_v0 }
  0xde   : > { %v580_v20 = vxor.u32 2147483648, %v9400_v14  ;;  %v739_v36 = vshll.u32 %v699_v23, 8 }
  0xdf   : > { %v584_v21 = vsel %vm582_vm2, %v583_v16, %v9400_v14  ;;  %v714_v14 = vshll.u32 %v9502_v42, %v705_v61  ;;  %v715_v16 = vshrl.u32 %v9503_v46, %v706_v0  ;;  %vm724_vm2 = vcmp.lt.s32.totalorder %v704_v1, 2 }
  0xe0   : > { %v581_v55 = vsel %vm579_vm3, %v9398_v11, %v580_v20  ;;  %v712_v11 = vshrl.u32 %v9502_v42, %v706_v0  ;;  %v719_v20 = vor.u32 %v718_v5, %v717_v4  ;;  %vm726_vm3 = vcmp.lt.s32.totalorder %v704_v1, 4 }
  0xe1   : > { %v585_v18 = vsel %vm578_vm5, %v581_v55, %v584_v21  ;;  %v710_v21 = vor.u32 %v709_v7, %v708_v63  ;;  %v720_v55 = vshll.u32 %v9504_v48, %v705_v61  ;;  %v811_v59 = vshrl.u32 %v9500_v38, %v810_v3 }
  0xe2   : > { %v586_v25 = vsel %vm575_vm6, nan, %v585_v18  ;;  %v721_v18 = vshrl.u32 %v9505_v53, %v706_v0  ;;  %v713_v24 = vor.u32 %v712_v11, %v711_v8  ;;  %v815_v61 = vshll.u32 %v9501_v40, %v809_v9 }
  0xe3   : > { %v901_v26 = vsel %vm482_vm4, %v9610_v13, %v586_v25  ;;  %v716_v25 = vor.u32 %v715_v16, %v714_v14  ;;  %v818_v4 = vshll.u32 %v9502_v42, %v809_v9  ;;  %v819_v5 = vshrl.u32 %v9503_v46, %v810_v3 }
  0xe4   : > { %8872 = vmatprep.mubr.msk.f32.mxu0 %vm916_vm7, %v901_v26  ;;  %v722_v26 = vor.u32 %v721_v18, %v720_v55  ;;  %v821_v63 = vshll.u32 %v9503_v46, %v809_v9  ;;  %v822_v7 = vshrl.u32 %v9504_v48, %v810_v3  ;;  %v824_v1 = vshll.u32 %v9504_v48, %v809_v9 }
  0xe5   : > { %v9402_v27 = vpop.eup %9401  ;;  %v728_v15 = vsel %vm726_vm3, %v716_v25, 2102212464  ;;  %v820_v8 = vor.u32 %v819_v5, %v818_v4  ;;  %vm827_vm6 = vcmp.lt.s32.totalorder %v9761_v2, 1 }
  0xe6   : > { %v9404_v28 = vpop.eup %9403  ;;  %v687_v29 = vxor.u32 2147483648, %v9402_v27  ;;  %v729_v54 = vsel %vm725_vm1, %v713_v24, %v728_v15  ;;  %v823_v14 = vor.u32 %v822_v7, %v821_v63 }
  0xe7   : > { %v684_v30 = vxor.u32 2147483648, %v9404_v28 }
  0xe8   : > { %v688_v31 = vsel %vm686_vm8, %v687_v29, %v9404_v28  ;;  %v732_v28 = vsel %vm726_vm3, %v719_v20, 920167782  ;;  %v735_v29 = vsel %vm723_vm0, %v713_v24, %v716_v25  ;;  %vm828_vm8 = vcmp.lt.s32.totalorder %v9761_v2, 2 }
  0xe9   : > { %v685_v32 = vsel %vm683_vm9, %v9402_v27, %v684_v30  ;;  %v731_v27 = vsel %vm723_vm0, %v710_v21, %v713_v24  ;;  %v802_v30 = vand.u32 8388607, %v795_v17  ;;  %vm829_vm9 = vcmp.lt.s32.totalorder %v9761_v2, 3 }
  0xea   : > { %v689_v34 = vsel %vm682_vm10, %v685_v32, %v688_v31  ;;  %v733_v31 = vsel %vm725_vm1, %v716_v25, %v732_v28  ;;  %v736_v32 = vsel %vm726_vm3, %v722_v26, 1326507024  ;;  %vm830_vm10 = vcmp.lt.s32.totalorder %v9761_v2, 4 }
  0xeb   : > { %v690_v35 = vsel %vm679_vm11, nan, %v689_v34  ;;  %v812_v34 = vshll.u32 %v9500_v38, %v809_v9  ;;  %v737_v33 = vsel %vm725_vm1, %v719_v20, %v736_v32  ;;  %v803_v44 = vor.u32 8388608, %v802_v30 }
  0xec   : > { %v902_v13 = vsel %vm482_vm4, %v9616_v19, %v690_v35  ;;  %v813_v35 = vshrl.u32 %v9501_v40, %v810_v3  ;;  %v738_v47 = vsel %vm724_vm2, %v735_v29, %v737_v33  ;;  %v825_v40 = vshrl.u32 %v9505_v53, %v810_v3 }
  0xed   : > { %8873 = vmatmul.mubr.msk.f32.vlgmr.msra.gmra.mxu0 %vm916_vm7, %v902_v13  ;;  %v707_v13 = vshrl.u32 %v9500_v38, %v706_v0  ;;  %v9793_v56 = vmul.u32.u64.low %v739_v36, %v738_v47  ;;  %v9794_v57 = vmul.u32.u64.high %v739_v36, %v738_v47, %v9793_v56  ;;  %v816_v0 = vshrl.u32 %v9502_v42, %v810_v3 }
  0xee   : > { %v814_v60 = vor.u32 %v813_v35, %v812_v34  ;;  %v826_v16 = vor.u32 %v825_v40, %v824_v1  ;;  %v832_v46 = vsel %vm830_vm10, %v820_v8, 2102212464  ;;  %v836_v9 = vsel %vm830_vm10, %v823_v14, 920167782 }
  0xef   : > { %v727_v52 = vsel %vm723_vm0, %v707_v13, %v710_v21  ;;  %v817_v38 = vor.u32 %v816_v0, %v815_v61  ;;  %v837_v53 = vsel %vm829_vm9, %v820_v8, %v836_v9  ;;  %v843_v55 = vshll.u32 %v803_v44, 8 }
  0xf0   : > { %v730_v58 = vsel %vm724_vm2, %v727_v52, %v729_v54  ;;  %v840_v21 = vsel %vm830_vm10, %v826_v16, 1326507024  ;;  %v831_v24 = vsel %vm827_vm6, %v811_v59, %v814_v60  ;;  %vm9838_vm0 = vcmp.le.f32.partialorder %v691_v10, 0.7853982 }
  0xf1   : > { %v746_v62 = vmul.u32 %v739_v36, %v730_v58  ;;  %v835_v48 = vsel %vm827_vm6, %v814_v60, %v817_v38  ;;  %v839_v3 = vsel %vm827_vm6, %v817_v38, %v820_v8  ;;  %v833_v25 = vsel %vm829_vm9, %v817_v38, %v832_v46 }
  0xf2   : > { %v838_v23 = vsel %vm828_vm8, %v835_v48, %v837_v53  ;;  %v841_v26 = vsel %vm829_vm9, %v823_v14, %v840_v21  ;;  %v834_v32 = vsel %vm828_vm8, %v831_v24, %v833_v25  ;;  %vm9851_vm3 = vcmp.le.f32.partialorder %v795_v17, 0.7853982 }
  0xf3   : > { %vm783_vm9 = vweird.f32 %v9753_v22 }
 0x1ad   : > { %v9727_v39 = vpop.f32.mrf.mxu0 }
 0x1af   : > { %v995_v43 = vpop.f32.mrf.mxu0 }
 0x1b0   : > { %v9735_v19 = vadd.f32 %v9732_v41, %v995_v43  ;;  %v734_v43 = vsel %vm724_vm2, %v731_v27, %v733_v31  ;;  %v9823_v27 = vmul.u32.u64.low %v843_v55, %v838_v23  ;;  %v9824_v28 = vmul.u32.u64.high %v843_v55, %v838_v23, %v9823_v27 }
 0x1b1   : > { %v9788_v49 = vmul.u32.u64.low %v739_v36, %v734_v43  ;;  %v9789_v51 = vmul.u32.u64.high %v739_v36, %v734_v43, %v9788_v49  ;;  %v842_v36 = vsel %vm828_vm8, %v839_v3, %v841_v26  ;;  %v850_v43 = vmul.u32 %v843_v55, %v834_v32 }
 0x1b2   : > { %1518 = vrot.lane.b32.xlu1 %v9735_v19, %s9508_s21  ;;  %8879 = vmatpush3.xpose.msk.msra.mxu1 %vm1061_vm13, %v9735_v19  ;;  %v9826_v30 = vmul.u32.u64.low %v843_v55, %v842_v36  ;;  %v9827_v31 = vmul.u32.u64.high %v843_v55, %v842_v36, %v9826_v30  ;;  %v853_v35 = vadd.s32 1, %v9824_v28  ;;  %vm797_vm2 = vcmp.lt.s32.totalorder %v9758_v50, 0 }
 0x1b3   : > { %8883 = vmatprep.subr.mxu1 %v9506_v37  ;;  %v749_v6 = vadd.s32 1, %v9789_v51  ;;  %vm748_vm5 = vc.u32 %v9794_v57, %v9788_v49  ;;  %v747_v54 = vadd.s32 %v9788_v49, %v9794_v57 }
 0x1b4   : > { %vm852_vm11 = vc.u32 %v9827_v31, %v9823_v27  ;;  %v851_v16 = vadd.s32 %v9823_v27, %v9827_v31 }
 0x1b5   : > { %8881 = vmatmul.mubr.msk.f32.vlgmr.msra.gmra.mxu1 %vm1061_vm13, %v9744_v45  ;;  %v750_v11 = vsel %vm748_vm5, %v749_v6, %v9789_v51  ;;  %v854_v44 = vsel %vm852_vm11, %v853_v35, %v9824_v28 }
 0x1b6   : > { %8885 = vmatprep.mubr.msk.f32.mxu1 %vm9507_vm12, %v9506_v37  ;;  %v751_v42 = vadd.s32 %v750_v11, %v746_v62  ;;  %v855_v47 = vadd.s32 %v854_v44, %v850_v43 }
 0x1b8   : > { %v752_v20 = vadd.s32 536870912, %v751_v42  ;;  %v856_v52 = vadd.s32 536870912, %v855_v47 }
 0x1ba   : > { %v753_v18 = vshrl.u32 %v752_v20, 30  ;;  %v857_v56 = vshrl.u32 %v856_v52, 30 }
 0x1bc   : > { %v754_v29 = vshll.u32 %v753_v18, 30  ;;  %v858_v61 = vshll.u32 %v857_v56, 30  ;;  %v777_v57 = vsub.s32 4, %v753_v18 }
 0x1be   : > { %v755_v34 = vsub.s32 %v751_v42, %v754_v29  ;;  %v859_v4 = vsub.s32 %v855_v47, %v858_v61  ;;  %v778_v3 = vsel %vm693_vm15, %v777_v57, %v753_v18  ;;  %v881_v18 = vsub.s32 4, %v857_v56 }
 0x1bf   : > { %v780_v55 = vsel %vm9838_vm0, 0, %v778_v3 }
 0x1c0   : > { %v757_v13 = vsub.s32 0, %v755_v34  ;;  %v861_v63 = vsub.s32 0, %v859_v4  ;;  %v784_v27 = vadd.s32 3, %v780_v55 }
 0x1c2   : > { %v8467_v33 = vmin.u32 %v757_v13, %v755_v34  ;;  %v8471_v38 = vmin.u32 %v861_v63, %v859_v4  ;;  %v785_v30 = vand.u32 3, %v784_v27  ;;  %v882_v13 = vsel %vm797_vm2, %v881_v18, %v857_v56 }
 0x1c3   : > { %v884_v47 = vsel %vm9851_vm3, 0, %v882_v13 }
 0x1c4   : > { %v759_v15 = vclz %v8467_v33  ;;  %v863_v40 = vclz %v8471_v38  ;;  %vm790_vm5 = vcmp.eq.s32.totalorder %v785_v30, 2  ;;  %vm787_vm6 = vcmp.eq.s32.totalorder %v785_v30, 0 }
 0x1c5   : > { %vm786_vm8 = vcmp.lt.s32.totalorder %v785_v30, 2  ;;  %v888_v56 = vadd.s32 3, %v884_v47  ;;  %v9509_v38 = vmov 1.0  }
 0x1c6   : > { %v8468_v51 = vadd.s32 4294967294, %v759_v15  ;;  %v8472_v49 = vadd.s32 4294967294, %v863_v40 }
 0x1c8   : > { %vm8469_vm14 = vcmp.lt.s32.totalorder %v8468_v51, 0  ;;  %vm8473_vm1 = vcmp.lt.s32.totalorder %v8472_v49, 0 }
 0x1c9   : > { %v762_v2 = vsel %vm8469_vm14, 0, %v8468_v51  ;;  %v866_v46 = vsel %vm8473_vm1, 0, %v8472_v49 }
 0x1ca   : > { %v763_v58 = vsub.s32 32, %v762_v2  ;;  %v764_v59 = vshll.u32 %v755_v34, %v762_v2  ;;  %v767_v60 = vsub.s32 4294967266, %v762_v2  ;;  %v867_v9 = vsub.s32 32, %v866_v46 }
 0x1cb   : > { %v868_v20 = vshll.u32 %v859_v4, %v866_v46  ;;  %v871_v53 = vsub.s32 4294967266, %v866_v46  ;;  %v9925_v46 = vld [vmem:[%s10726_s8] sm:$0xf] }
 0x1cc   : > { %v765_v62 = vshrl.u32 %v747_v54, %v763_v58  ;;  %v768_v0 = vadd.s32 127, %v767_v60  ;;  %v869_v21 = vshrl.u32 %v851_v16, %v867_v9  ;;  %v889_v58 = vand.u32 3, %v888_v56  ;;  %v9920_v16 = vld [vmem:[%s10727_s9] sm:$0xf] }
 0x1cd   : > { %v872_v10 = vadd.s32 127, %v871_v53 }
 0x1ce   : > { %v766_v5 = vor.u32 %v765_v62, %v764_v59  ;;  %v769_v6 = vshll.u32 %v768_v0, 23  ;;  %v870_v24 = vor.u32 %v869_v21, %v868_v20  ;;  %vm894_vm10 = vcmp.eq.s32.totalorder %v889_v58, 2 }
 0x1cf   : > { %v873_v25 = vshll.u32 %v872_v10, 23  ;;  %vm891_vm11 = vcmp.eq.s32.totalorder %v889_v58, 0  ;;  %vm890_vm14 = vcmp.lt.s32.totalorder %v889_v58, 2 }
 0x1d0   : > { %v770_v7 = vor.u32 4788187, %v769_v6  ;;  %v773_v1 = vcvt.s32.f32 %v766_v5  ;;  %v877_v36 = vcvt.s32.f32 %v870_v24 }
 0x1d1   : > { %v874_v26 = vor.u32 4788187, %v873_v25 }
 0x1d2   : > { %v771_v8 = vand.u32 2147483647, %v770_v7 }
 0x1d3   : > { %v875_v28 = vand.u32 2147483647, %v874_v26 }
 0x1d4   : > { %v774_v11 = vmul.f32 %v773_v1, %v771_v8 }
 0x1d5   : > { %v878_v29 = vmul.f32 %v877_v36, %v875_v28 }
 0x1d6   : > { %v775_v42 = vxor.u32 2147483648, %v774_v11 }
 0x1d7   : > { %v879_v32 = vxor.u32 2147483648, %v878_v29 }
 0x1d8   : > { %v776_v48 = vsel %vm693_vm15, %v775_v42, %v774_v11  ;;  %vm887_vm15 = vweird.f32 %v9758_v50 }
 0x1d9   : > { %v779_v23 = vsel %vm9838_vm0, %v9753_v22, %v776_v48  ;;  %v880_v34 = vsel %vm797_vm2, %v879_v32, %v878_v29  ;;  %vm1043_vm0 = vcmask 31744  }
 0x1da   : > { %9405 = vcosq.f32 %v779_v23  ;;  %v883_v43 = vsel %vm9851_vm3, %v9758_v50, %v880_v34  ;;  %v1053_v48 = vsel %vm1043_vm0, %v9886_v12, 0.0 }
 0x1db   : > { %9407 = vsinq.f32 %v779_v23  ;;  %v1054_v20 = vrot.slane %v1053_v48, 4 }
 0x1dc   : > { %9409 = vcosq.f32 %v883_v43 }
 0x1dd   : > { %9411 = vsinq.f32 %v883_v43  ;;  %v1055_v23 = vadd.f32 %v1054_v20, %v1053_v48 }
 0x1df   : > { %v1056_v55 = vrot.slane %v1055_v23, 2 }
 0x1e1   : > { %v1057_v29 = vadd.f32 %v1056_v55, %v1055_v23  ;;  %v10010_v55 = vld [vmem:[%s10721_s3 + $0x10] sm:$0xff] }
 0x1e3   : > { %v1058_v32 = vrot.slane %v1057_v29, 1 }
 0x1e5   : > { %v1059_v13 = vadd.f32 %v1058_v32, %v1057_v29 }
 0x1e7   : > { %v9406_v35 = vpop.eup %9405 }
 0x1e8   : > { %v9408_v33 = vpop.eup %9407  ;;  %v791_v44 = vxor.u32 2147483648, %v9406_v35 }
 0x1e9   : > { %v788_v15 = vxor.u32 2147483648, %v9408_v33  ;;  %v9410_v59 = vpop.eup %9409 }
 0x1ea   : > { %v792_v17 = vsel %vm790_vm5, %v791_v44, %v9408_v33  ;;  %v9412_v60 = vpop.eup %9411  ;;  %v895_v61 = vxor.u32 2147483648, %v9410_v59  ;;  %v9943_v33 = vmul.f32 0.125, %v1059_v13  ;;  %v10047_v13 = vld [vmem:[%s10727_s9 + $0x8] sm:$0xf] }
 0x1eb   : > { %v789_v51 = vsel %vm787_vm6, %v9406_v35, %v788_v15  ;;  %v892_v62 = vxor.u32 2147483648, %v9412_v60 }
 0x1ec   : > { %v793_v52 = vsel %vm786_vm8, %v789_v51, %v792_v17  ;;  %v896_v0 = vsel %vm894_vm10, %v895_v61, %v9412_v60 }
 0x1ed   : > { %v794_v54 = vsel %vm783_vm9, nan, %v793_v52  ;;  %v893_v4 = vsel %vm891_vm11, %v9410_v59, %v892_v62 }
 0x1ee   : > { %v903_v2 = vsel %vm482_vm4, %v9753_v22, %v794_v54  ;;  %v897_v5 = vsel %vm890_vm14, %v893_v4, %v896_v0  ;;  %v9957_v54 = vld [vmem:[%s10721_s3 + $0x8] sm:$0xff] }
 0x1ef   : > { %8875 = vmatprep.mubr.msk.f32.mxu0 %vm916_vm7, %v903_v2  ;;  %v898_v6 = vsel %vm887_vm15, nan, %v897_v5 }
 0x1f0   : > { %v904_v22 = vsel %vm482_vm4, %v9758_v50, %v898_v6  ;;  %vm1038_vm4 = vcmp.ne.f32.partialorder %v9886_v12, 0.0  ;;  %v1036_v50 = vld [vmem:[%s9883_s29] sm:$0xff] }
 0x1f1   : > { %8876 = vmatmul.mubr.msk.f32.gmra.mxu0 %vm916_vm7, %v904_v22  ;;  %v8488_v8 = vsel %vm1038_vm4, 1.0, %v9506_v37  ;;  %vm1368_vm7 = vcmask 1043456   ;;  %v1044_v9 = vsel %vm1043_vm0, %v1036_v50, 0.0 }
 0x1f2   : > { %8895 = vmatprep.mubr.msk.f32.mxu0 %vm9507_vm12, %v9506_v37  ;;  %8894 = vmatpush3.msk.msra.mxu0 %vm1038_vm4, %v9509_v38  ;;  %v9896_v40 = vmul.f32 %v8488_v8, %v1036_v50  ;;  %v9904_v11 = vmul.f32 %v8488_v8, %v9886_v12  ;;  %v1045_v53 = vrot.slane %v1044_v9, 4 }
 0x1f3   : > { %8903 = vmatprep.subr.mxu0 %v9506_v37 }
 0x1f4   : > { %8884 = vmatpush3.msra.mxu1 %v9896_v40  ;;  %v1046_v21 = vadd.f32 %v1045_v53, %v1044_v9 }
 0x1f5   : > { %8888 = vmatprep.subr.mxu1 %v9506_v37 }
 0x1f6   : > { %v1047_v24 = vrot.slane %v1046_v21, 2 }
 0x1f8   : > { %v1048_v30 = vadd.f32 %v1047_v24, %v1046_v21 }
 0x1fa   : > { %v1049_v34 = vrot.slane %v1048_v30, 1 }
 0x1fc   : > { %v1050_v35 = vadd.f32 %v1049_v34, %v1048_v30 }
 0x1fe   : > { %v9941_v43 = vmul.f32 0.125, %v1050_v35 }
 0x224   : > { %v1519_v52 = vpop.permute.xlu1 %1518 }
 0x275   : > { %v1134_v63 = vpop.f32.mrf.mxu1 }
 0x276   : > { %v1138_v7 = vsel %vm1061_vm13, %v1134_v63, -inf }
 0x277   : > { %1139 = vmax.xlane.f32.xlu0 %v1138_v7  ;;  %v8882_v1 = vpop.f32.mrf.mxu1  ;;  %v9992_v7 = vld [vmem:[%s10727_s9 + $0x4] sm:$0xf] }
 0x28d   : > { %1976 = vrot.lane.b32.xlu0 %v9735_v19, %s9510_s30 }
 0x2b1   : > { %v9936_v3 = vpop.f32.mrf.mxu0 }
 0x2b3   : > { %v9938_v10 = vpop.f32.mrf.mxu0 }
 0x300   : > { %v1140_v49 = vpop.xlane.xlu0 %1139 }
 0x301   : > { %v1141_v57 = vsub.f32 %v1134_v63, %v1140_v49  ;;  %v9987_v63 = vld [vmem:[%s10726_s8 + $0x4] sm:$0xf] }
 0x303   : > { %v1142_v14 = vmul.f32 1.442695, %v1141_v57 }
 0x304   : > { %v1977_v21 = vpop.permute.xlu0 %1976 }
 0x305   : > { %9413 = vpow2.f32 %v1142_v14 }
 0x312   : > { %v9414_v42 = vpop.eup %9413 }
 0x313   : > { %8886 = vmatmul.mubr.msk.f32.vlgmr.msra.gmra.mxu1 %vm1061_vm13, %v9414_v42  ;;  %8896 = vmatmul.mubr.msk.f32.vlgmr.msra.gmra.mxu0 %vm1061_vm13, %v9414_v42 }
 0x314   : > { %8889 = vmatpush3.msra.mxu1 %v9904_v11  ;;  %8890 = vmatprep.mubr.msk.f32.mxu1 %vm9507_vm12, %v9506_v37 }
 0x315   : > { %8898 = vmatprep.subr.mxu1 %v9506_v37  ;;  %8905 = vmatprep.mubr.msk.f32.mxu0 %vm9507_vm12, %v9506_v37 }
 0x316   : > { %8904 = vmatpush3.msk.msra.mxu0 %vm1368_vm7, %v9925_v46 }
 0x317   : > { %8891 = vmatmul.mubr.msk.f32.vlgmr.msra.gmra.mxu1 %vm1061_vm13, %v9414_v42  ;;  %8913 = vmatprep.subr.mxu0 %v9506_v37 }
 0x318   : > { %8900 = vmatprep.mubr.msk.f32.mxu1 %vm9507_vm12, %v9506_v37  ;;  %8899 = vmatpush3.msk.msra.mxu1 %vm1368_vm7, %v9920_v16 }
 0x319   : > { %8908 = vmatprep.subr.mxu1 %v9506_v37 }
 0x3d3   : > { %v1213_v25 = vpop.f32.mrf.mxu1  ;;  %v1353_v26 = vpop.f32.mrf.mxu0 }
 0x3d4   : > { %vm1357_vm1 = vcmp.gt.f32.partialorder %v1353_v26, 0.0 }
 0x3d5   : > { %v1358_v36 = vsel %vm1357_vm1, %v1353_v26, 1.0  ;;  %v8887_v27 = vpop.f32.mrf.mxu1  ;;  %v8897_v28 = vpop.f32.mrf.mxu0 }
 0x3d6   : > { %9415 = vrcp.f32 %v1358_v36 }
 0x3d7   : > { %v1283_v18 = vpop.f32.mrf.mxu1 }
 0x3d9   : > { %v8892_v31 = vpop.f32.mrf.mxu1 }
 0x3e3   : > { %v9416_v44 = vpop.eup %9415 }
 0x3e4   : > { %v1361_v15 = vmul.f32 %v9416_v44, %v1213_v25  ;;  %v1363_v17 = vmul.f32 %v9416_v44, %v1283_v18 }
 0x3e6   : > { %v1362_v47 = vsel %vm1357_vm1, %v1361_v15, %v9941_v43  ;;  %v1364_v51 = vsel %vm1357_vm1, %v1363_v17, %v9943_v33 }
 0x3e7   : > { %8901 = vmatmul.mubr.msk.f32.vlgmr.msra.gmra.mxu1 %vm1043_vm0, %v1364_v51  ;;  %8906 = vmatmul.mubr.msk.f32.vlgmr.msra.gmra.mxu0 %vm1043_vm0, %v1362_v47 }
 0x3e8   : > { %8909 = vmatpush3.xpose.msk.msra.mxu1 %vm1061_vm13, %v1519_v52  ;;  %8910 = vmatprep.mubr.msk.f32.mxu1 %vm9507_vm12, %v9506_v37 }
 0x3e9   : > { %8914 = vmatpush3.msra.mxu0 %v9896_v40  ;;  %8918 = vmatprep.subr.mxu1 %v9506_v37 }
 0x3ea   : > { %8915 = vmatprep.mubr.msk.f32.mxu0 %vm9507_vm12, %v9506_v37  ;;  %8923 = vmatprep.subr.mxu0 %v9506_v37 }
 0x3eb   : > { %8911 = vmatmul.mubr.msk.f32.vlgmr.msra.gmra.mxu1 %vm1061_vm13, %v9957_v54 }
 0x3ec   : > { %8919 = vmatpush3.msra.mxu1 %v9904_v11  ;;  %8920 = vmatprep.mubr.msk.f32.mxu1 %vm9507_vm12, %v9506_v37 }
 0x3ed   : > { %8928 = vmatprep.subr.mxu1 %v9506_v37 }
 0x4a7   : > { %v1438_v56 = vpop.f32.mrf.mxu1  ;;  %v1514_v2 = vpop.f32.mrf.mxu0 }
 0x4a8   : > { %v1515_v58 = vadd.f32 %v1514_v2, %v1438_v56 }
 0x4a9   : > { %v8902_v59 = vpop.f32.mrf.mxu1  ;;  %v8907_v60 = vpop.f32.mrf.mxu0 }
 0x4ab   : > { %v1591_v61 = vpop.f32.mrf.mxu1 }
 0x4ac   : > { %v1595_v62 = vsel %vm1061_vm13, %v1591_v61, -inf }
 0x4ad   : > { %1596 = vmax.xlane.f32.xlu1 %v1595_v62  ;;  %v8912_v0 = vpop.f32.mrf.mxu1 }
 0x4ae   : > { %v10065_v0 = vld [vmem:[%s10721_s3 + $0x18] sm:$0xff] }
 0x536   : > { %v1597_v4 = vpop.xlane.xlu1 %1596 }
 0x537   : > { %v1598_v5 = vsub.f32 %v1591_v61, %v1597_v4 }
 0x539   : > { %v1599_v6 = vmul.f32 1.442695, %v1598_v5 }
 0x53b   : > { %9417 = vpow2.f32 %v1599_v6 }
 0x548   : > { %v9418_v22 = vpop.eup %9417 }
 0x549   : > { %8916 = vmatmul.mubr.msk.f32.vlgmr.msra.gmra.mxu0 %vm1061_vm13, %v9418_v22  ;;  %8921 = vmatmul.mubr.msk.f32.vlgmr.msra.gmra.mxu1 %vm1061_vm13, %v9418_v22 }
 0x54a   : > { %8924 = vmatpush3.msk.msra.mxu0 %vm1038_vm4, %v9509_v38  ;;  %8925 = vmatprep.mubr.msk.f32.mxu0 %vm9507_vm12, %v9506_v37 }
 0x54b   : > { %8933 = vmatprep.subr.mxu0 %v9506_v37  ;;  %8930 = vmatprep.mubr.msk.f32.mxu1 %vm9507_vm12, %v9506_v37 }
 0x54c   : > { %8929 = vmatpush3.msk.msra.mxu1 %vm1368_vm7, %v9987_v63 }
 0x54d   : > { %8926 = vmatmul.mubr.msk.f32.vlgmr.msra.gmra.mxu0 %vm1061_vm13, %v9418_v22  ;;  %8938 = vmatprep.subr.mxu1 %v9506_v37 }
 0x54e   : > { %8935 = vmatprep.mubr.msk.f32.mxu0 %vm9507_vm12, %v9506_v37  ;;  %8934 = vmatpush3.msk.msra.mxu0 %vm1368_vm7, %v9992_v7 }
 0x54f   : > { %8943 = vmatprep.subr.mxu0 %v9506_v37 }
 0x609   : > { %v1670_v1 = vpop.f32.mrf.mxu0  ;;  %v1740_v50 = vpop.f32.mrf.mxu1 }
 0x60b   : > { %v8917_v8 = vpop.f32.mrf.mxu0  ;;  %v8922_v49 = vpop.f32.mrf.mxu1 }
 0x60d   : > { %v1810_v57 = vpop.f32.mrf.mxu0 }
 0x60e   : > { %vm1814_vm2 = vcmp.gt.f32.partialorder %v1810_v57, 0.0 }
 0x60f   : > { %v1815_v14 = vsel %vm1814_vm2, %v1810_v57, 1.0  ;;  %v8927_v42 = vpop.f32.mrf.mxu0  ;;  %v10081_v57 = vadd.f32 %v9727_v39, %v9732_v41  ;;  %v10101_v39 = vld [vmem:[%s10726_s8 + $0xc] sm:$0xf] }
 0x610   : > { %9419 = vrcp.f32 %v1815_v14  ;;  %v10106_v41 = vld [vmem:[%s10727_s9 + $0xc] sm:$0xf] }
 0x61d   : > { %v9420_v48 = vpop.eup %9419 }
 0x61e   : > { %v1818_v9 = vmul.f32 %v9420_v48, %v1670_v1  ;;  %v1820_v20 = vmul.f32 %v9420_v48, %v1740_v50 }
 0x620   : > { %v1819_v53 = vsel %vm1814_vm2, %v1818_v9, %v9941_v43  ;;  %v1821_v23 = vsel %vm1814_vm2, %v1820_v20, %v9943_v33 }
 0x621   : > { %8931 = vmatmul.mubr.msk.f32.vlgmr.msra.gmra.mxu1 %vm1043_vm0, %v1819_v53  ;;  %8936 = vmatmul.mubr.msk.f32.vlgmr.msra.gmra.mxu0 %vm1043_vm0, %v1821_v23 }
 0x622   : > { %8939 = vmatpush3.xpose.msk.msra.mxu1 %vm1061_vm13, %v1977_v21  ;;  %8940 = vmatprep.mubr.msk.f32.mxu1 %vm9507_vm12, %v9506_v37 }
 0x623   : > { %8944 = vmatpush3.msra.mxu0 %v9896_v40  ;;  %8948 = vmatprep.subr.mxu1 %v9506_v37 }
 0x624   : > { %8945 = vmatprep.mubr.msk.f32.mxu0 %vm9507_vm12, %v9506_v37  ;;  %8953 = vmatprep.subr.mxu0 %v9506_v37 }
 0x625   : > { %8941 = vmatmul.mubr.msk.f32.vlgmr.msra.gmra.mxu1 %vm1061_vm13, %v10010_v55 }
 0x626   : > { %8949 = vmatpush3.msra.mxu1 %v9904_v11  ;;  %8950 = vmatprep.mubr.msk.f32.mxu1 %vm9507_vm12, %v9506_v37 }
 0x627   : > { %8958 = vmatprep.subr.mxu1 %v9506_v37 }
 0x6e1   : > { %v1894_v24 = vpop.f32.mrf.mxu1  ;;  %v1971_v25 = vpop.f32.mrf.mxu0 }
 0x6e2   : > { %v1898_v26 = vadd.f32 %v1894_v24, %v1515_v58 }
 0x6e3   : > { %v8932_v36 = vpop.f32.mrf.mxu1  ;;  %v8937_v27 = vpop.f32.mrf.mxu0 }
 0x6e4   : > { %v1975_v28 = vadd.f32 %v1971_v25, %v1898_v26 }
 0x6e5   : > { %v2049_v29 = vpop.f32.mrf.mxu1 }
 0x6e6   : > { %v2053_v30 = vsel %vm1061_vm13, %v2049_v29, -inf }
 0x6e7   : > { %2054 = vmax.xlane.f32.xlu1 %v2053_v30  ;;  %v8942_v18 = vpop.f32.mrf.mxu1  ;;  %v10132_v30 = vld [vmem:[%s10728_s10] ss:$0 sm:$0xff] }
 0x6f8   : > { %2434 = vrot.lane.b32.xlu1 %v9735_v19, %s9511_s28  ;;  %v10042_v19 = vld [vmem:[%s10726_s8 + $0x8] sm:$0xf] }
 0x770   : > { %v2055_v31 = vpop.xlane.xlu1 %2054 }
 0x771   : > { %v2056_v32 = vsub.f32 %v2049_v29, %v2055_v31 }
 0x773   : > { %v2057_v34 = vmul.f32 1.442695, %v2056_v32 }
 0x774   : > { %v2435_v62 = vpop.permute.xlu1 %2434 }
 0x775   : > { %9421 = vpow2.f32 %v2057_v34 }
 0x782   : > { %v9422_v35 = vpop.eup %9421 }
 0x783   : > { %8946 = vmatmul.mubr.msk.f32.vlgmr.msra.gmra.mxu0 %vm1061_vm13, %v9422_v35  ;;  %8951 = vmatmul.mubr.msk.f32.vlgmr.msra.gmra.mxu1 %vm1061_vm13, %v9422_v35 }
 0x784   : > { %8954 = vmatpush3.msk.msra.mxu0 %vm1038_vm4, %v9509_v38  ;;  %8955 = vmatprep.mubr.msk.f32.mxu0 %vm9507_vm12, %v9506_v37 }
 0x785   : > { %8963 = vmatprep.subr.mxu0 %v9506_v37  ;;  %8960 = vmatprep.mubr.msk.f32.mxu1 %vm9507_vm12, %v9506_v37 }
 0x786   : > { %8959 = vmatpush3.msk.msra.mxu1 %vm1368_vm7, %v10042_v19 }
 0x787   : > { %8956 = vmatmul.mubr.msk.f32.vlgmr.msra.gmra.mxu0 %vm1061_vm13, %v9422_v35  ;;  %8968 = vmatprep.subr.mxu1 %v9506_v37 }
 0x788   : > { %8965 = vmatprep.mubr.msk.f32.mxu0 %vm9507_vm12, %v9506_v37  ;;  %8964 = vmatpush3.msk.msra.mxu0 %vm1368_vm7, %v10047_v13 }
 0x789   : > { %8973 = vmatprep.subr.mxu0 %v9506_v37 }
 0x843   : > { %v2128_v44 = vpop.f32.mrf.mxu0  ;;  %v2198_v15 = vpop.f32.mrf.mxu1 }
 0x845   : > { %v8947_v17 = vpop.f32.mrf.mxu0  ;;  %v8952_v47 = vpop.f32.mrf.mxu1 }
 0x846   : > { %v8530_v17 = vld [vmem:[%s9883_s29 + $0x8] sm:$0xff] }
 0x847   : > { %v2268_v51 = vpop.f32.mrf.mxu0 }
 0x848   : > { %vm2272_vm3 = vcmp.gt.f32.partialorder %v2268_v51, 0.0 }
 0x849   : > { %v2273_v52 = vsel %vm2272_vm3, %v2268_v51, 1.0  ;;  %v8957_v56 = vpop.f32.mrf.mxu0 }
 0x84a   : > { %9423 = vrcp.f32 %v2273_v52 }
 0x857   : > { %v9424_v2 = vpop.eup %9423 }
 0x858   : > { %v2276_v58 = vmul.f32 %v9424_v2, %v2128_v44  ;;  %v2278_v59 = vmul.f32 %v9424_v2, %v2198_v15  ;;  %v10144_v15 = vld [vmem:[%s9877_s26 + $0x8] sm:$0xff] }
 0x859   : > { %vm2904_vm6 = vcmp.ne.f32.partialorder %v10144_v15, 0.0 }
 0x85a   : > { %v2277_v60 = vsel %vm2272_vm3, %v2276_v58, %v9941_v43  ;;  %v2279_v61 = vsel %vm2272_vm3, %v2278_v59, %v9943_v33  ;;  %v8532_v47 = vsel %vm2904_vm6, 1.0, %v9506_v37 }
 0x85b   : > { %8961 = vmatmul.mubr.msk.f32.vlgmr.msra.gmra.mxu1 %vm1043_vm0, %v2277_v60  ;;  %8966 = vmatmul.mubr.msk.f32.vlgmr.msra.gmra.mxu0 %vm1043_vm0, %v2279_v61  ;;  %v10151_v51 = vmul.f32 %v8532_v47, %v8530_v17  ;;  %v10154_v52 = vmul.f32 %v8532_v47, %v10144_v15  ;;  %v2909_v60 = vsel %vm1043_vm0, %v8530_v17, 0.0  ;;  %v2917_v61 = vsel %vm1043_vm0, %v10144_v15, 0.0 }
 0x85c   : > { %8969 = vmatpush3.xpose.msk.msra.mxu1 %vm1061_vm13, %v2435_v62  ;;  %8970 = vmatprep.mubr.msk.f32.mxu1 %vm9507_vm12, %v9506_v37  ;;  %v2910_v62 = vrot.slane %v2909_v60, 4 }
 0x85d   : > { %8974 = vmatpush3.msra.mxu0 %v9896_v40  ;;  %8978 = vmatprep.subr.mxu1 %v9506_v37 }
 0x85e   : > { %8975 = vmatprep.mubr.msk.f32.mxu0 %vm9507_vm12, %v9506_v37  ;;  %8983 = vmatprep.subr.mxu0 %v9506_v37 }
 0x85f   : > { %8971 = vmatmul.mubr.msk.f32.vlgmr.msra.gmra.mxu1 %vm1061_vm13, %v10065_v0 }
 0x860   : > { %8979 = vmatpush3.msra.mxu1 %v9904_v11  ;;  %8980 = vmatprep.mubr.msk.f32.mxu1 %vm9507_vm12, %v9506_v37 }
 0x861   : > { %8988 = vmatprep.subr.mxu1 %v9506_v37 }
 0x91b   : > { %v2352_v4 = vpop.f32.mrf.mxu1  ;;  %v2429_v5 = vpop.f32.mrf.mxu0 }
 0x91c   : > { %v2356_v40 = vadd.f32 %v2352_v4, %v1975_v28  ;;  %v2918_v4 = vrot.slane %v2917_v61, 4 }
 0x91d   : > { %v8962_v6 = vpop.f32.mrf.mxu1  ;;  %v8967_v22 = vpop.f32.mrf.mxu0 }
 0x91e   : > { %v2433_v1 = vadd.f32 %v2429_v5, %v2356_v40  ;;  %v2911_v5 = vadd.f32 %v2910_v62, %v2909_v60  ;;  %v2919_v40 = vadd.f32 %v2918_v4, %v2917_v61 }
 0x91f   : > { %v2507_v50 = vpop.f32.mrf.mxu1 }
 0x920   : > { %v2511_v8 = vsel %vm1061_vm13, %v2507_v50, -inf }
 0x921   : > { %2512 = vmax.xlane.f32.xlu0 %v2511_v8  ;;  %v8972_v49 = vpop.f32.mrf.mxu1  ;;  %v2912_v8 = vrot.slane %v2911_v5, 2 }
 0x922   : > { %v2920_v49 = vrot.slane %v2919_v40, 2 }
 0x937   : > { %3371 = vrot.lane.b32.xlu0 %v10081_v57, %s9508_s21 }
 0x9aa   : > { %v2513_v11 = vpop.xlane.xlu0 %2512 }
 0x9ab   : > { %v2514_v14 = vsub.f32 %v2507_v50, %v2513_v11 }
 0x9ad   : > { %v2515_v42 = vmul.f32 1.442695, %v2514_v14 }
 0x9af   : > { %9425 = vpow2.f32 %v2515_v42 }
 0x9bc   : > { %v9426_v48 = vpop.eup %9425 }
 0x9bd   : > { %8976 = vmatmul.mubr.msk.f32.vlgmr.msra.gmra.mxu0 %vm1061_vm13, %v9426_v48  ;;  %8981 = vmatmul.mubr.msk.f32.vlgmr.msra.gmra.mxu1 %vm1061_vm13, %v9426_v48 }
 0x9be   : > { %8984 = vmatpush3.msk.msra.mxu0 %vm1038_vm4, %v9509_v38  ;;  %8985 = vmatprep.mubr.msk.f32.mxu0 %vm9507_vm12, %v9506_v37 }
 0x9bf   : > { %8993 = vmatprep.subr.mxu0 %v9506_v37  ;;  %8990 = vmatprep.mubr.msk.f32.mxu1 %vm9507_vm12, %v9506_v37 }
 0x9c0   : > { %8989 = vmatpush3.msk.msra.mxu1 %vm1368_vm7, %v10101_v39 }
 0x9c1   : > { %8986 = vmatmul.mubr.msk.f32.vlgmr.msra.gmra.mxu0 %vm1061_vm13, %v9426_v48  ;;  %8998 = vmatprep.subr.mxu1 %v9506_v37  ;;  %v2913_v48 = vadd.f32 %v2912_v8, %v2911_v5 }
 0x9c2   : > { %8995 = vmatprep.mubr.msk.f32.mxu0 %vm9507_vm12, %v9506_v37  ;;  %8994 = vmatpush3.msk.msra.mxu0 %vm1368_vm7, %v10106_v41 }
 0x9c3   : > { %9003 = vmatprep.subr.mxu0 %v9506_v37 }
 0xa7d   : > { %v2586_v12 = vpop.f32.mrf.mxu0  ;;  %v2656_v9 = vpop.f32.mrf.mxu1 }
 0xa7f   : > { %v8977_v20 = vpop.f32.mrf.mxu0  ;;  %v8982_v53 = vpop.f32.mrf.mxu1 }
 0xa81   : > { %v2726_v23 = vpop.f32.mrf.mxu0 }
 0xa82   : > { %vm2730_vm5 = vcmp.gt.f32.partialorder %v2726_v23, 0.0 }
 0xa83   : > { %v2731_v21 = vsel %vm2730_vm5, %v2726_v23, 1.0  ;;  %v8987_v24 = vpop.f32.mrf.mxu0 }
 0xa84   : > { %9427 = vrcp.f32 %v2731_v21 }
 0xa91   : > { %v9428_v25 = vpop.eup %9427 }
 0xa92   : > { %v2734_v26 = vmul.f32 %v9428_v25, %v2586_v12  ;;  %v2736_v36 = vmul.f32 %v9428_v25, %v2656_v9  ;;  %v2921_v12 = vadd.f32 %v2920_v49, %v2919_v40  ;;  %v2914_v9 = vrot.slane %v2913_v48, 1 }
 0xa94   : > { %v2735_v27 = vsel %vm2730_vm5, %v2734_v26, %v9941_v43  ;;  %v2737_v28 = vsel %vm2730_vm5, %v2736_v36, %v9943_v33  ;;  %v2922_v20 = vrot.slane %v2921_v12, 1  ;;  %v2915_v53 = vadd.f32 %v2914_v9, %v2913_v48 }
 0xa95   : > { %8991 = vmatmul.mubr.msk.f32.vlgmr.msra.gmra.mxu1 %vm1043_vm0, %v2735_v27  ;;  %8996 = vmatmul.mubr.msk.f32.vlgmr.msra.gmra.mxu0 %vm1043_vm0, %v2737_v28 }
 0xa96   : > { %8999 = vmatpush3.xpose.msk.msra.mxu1 %vm1061_vm13, %v10081_v57  ;;  %9000 = vmatprep.mubr.msk.f32.mxu1 %vm9507_vm12, %v9506_v37  ;;  %v2923_v23 = vadd.f32 %v2922_v20, %v2921_v12  ;;  %v10183_v21 = vmul.f32 0.125, %v2915_v53 }
 0xa97   : > { %9008 = vmatprep.subr.mxu1 %v9506_v37  ;;  %9005 = vmatprep.mubr.msk.f32.mxu0 %vm9507_vm12, %v9506_v37 }
 0xa98   : > { %9004 = vmatpush3.msra.mxu0 %v10151_v51  ;;  %v10185_v24 = vmul.f32 0.125, %v2923_v23 }
 0xa99   : > { %9001 = vmatmul.mubr.msk.f32.vlgmr.msra.gmra.mxu1 %vm1061_vm13, %v9744_v45  ;;  %9013 = vmatprep.subr.mxu0 %v9506_v37 }
 0xa9a   : > { %9010 = vmatprep.mubr.msk.f32.mxu1 %vm9507_vm12, %v9506_v37  ;;  %9009 = vmatpush3.msra.mxu1 %v10154_v52 }
 0xa9b   : > { %9018 = vmatprep.subr.mxu1 %v9506_v37 }
 0xb55   : > { %v2810_v43 = vpop.f32.mrf.mxu1  ;;  %v2887_v33 = vpop.f32.mrf.mxu0 }
 0xb56   : > { %v2814_v29 = vadd.f32 %v2810_v43, %v2433_v1  ;;  %v3372_v43 = vpop.permute.xlu0 %3371 }
 0xb57   : > { %v8992_v18 = vpop.f32.mrf.mxu1  ;;  %v8997_v31 = vpop.f32.mrf.mxu0 }
 0xb58   : > { %v2891_v32 = vadd.f32 %v2887_v33, %v2814_v29 }
 0xb59   : > { %v2994_v45 = vpop.f32.mrf.mxu1 }
 0xb5a   : > { %v2898_v34 = vadd.f32 %v10132_v30, %v2891_v32  ;;  %v2998_v35 = vsel %vm1061_vm13, %v2994_v45, -inf }
 0xb5b   : > { %2999 = vmax.xlane.f32.xlu1 %v2998_v35  ;;  %v9002_v44 = vpop.f32.mrf.mxu1 }
 0xb5c   : > { %2899 = vst [vmem:[%s10138_s14] sm:$0xff] %v2898_v34 }
 0xbe4   : > { %v3000_v56 = vpop.xlane.xlu1 %2999 }
 0xbe5   : > { %v3001_v2 = vsub.f32 %v2994_v45, %v3000_v56 }
 0xbe7   : > { %v3002_v58 = vmul.f32 1.442695, %v3001_v2 }
 0xbe9   : > { %9429 = vpow2.f32 %v3002_v58 }
 0xbf6   : > { %v9430_v59 = vpop.eup %9429 }
 0xbf7   : > { %9006 = vmatmul.mubr.msk.f32.vlgmr.msra.gmra.mxu0 %vm1061_vm13, %v9430_v59  ;;  %9011 = vmatmul.mubr.msk.f32.vlgmr.msra.gmra.mxu1 %vm1061_vm13, %v9430_v59 }
 0xbf8   : > { %9014 = vmatpush3.msk.msra.mxu0 %vm2904_vm6, %v9509_v38  ;;  %9015 = vmatprep.mubr.msk.f32.mxu0 %vm9507_vm12, %v9506_v37 }
 0xbf9   : > { %9019 = vmatpush3.msk.msra.mxu1 %vm1368_vm7, %v9920_v16  ;;  %9023 = vmatprep.subr.mxu0 %v9506_v37 }
 0xbfa   : > { %9020 = vmatprep.mubr.msk.f32.mxu1 %vm9507_vm12, %v9506_v37  ;;  %9028 = vmatprep.subr.mxu1 %v9506_v37 }
 0xbfb   : > { %9016 = vmatmul.mubr.msk.f32.vlgmr.msra.gmra.mxu0 %vm1061_vm13, %v9430_v59 }
 0xbfc   : > { %9024 = vmatpush3.msk.msra.mxu0 %vm1368_vm7, %v9925_v46  ;;  %9025 = vmatprep.mubr.msk.f32.mxu0 %vm9507_vm12, %v9506_v37 }
 0xbfd   : > { %9033 = vmatprep.subr.mxu0 %v9506_v37 }
 0xcb7   : > { %v3073_v6 = vpop.f32.mrf.mxu0  ;;  %v3143_v22 = vpop.f32.mrf.mxu1 }
 0xcb9   : > { %v9007_v1 = vpop.f32.mrf.mxu0  ;;  %v9012_v50 = vpop.f32.mrf.mxu1 }
 0xcbb   : > { %v3213_v11 = vpop.f32.mrf.mxu0 }
 0xcbc   : > { %vm3217_vm8 = vcmp.gt.f32.partialorder %v3213_v11, 0.0 }
 0xcbd   : > { %v3218_v14 = vsel %vm3217_vm8, %v3213_v11, 1.0  ;;  %v9017_v42 = vpop.f32.mrf.mxu0 }
 0xcbe   : > { %9431 = vrcp.f32 %v3218_v14 }
 0xccb   : > { %v9432_v25 = vpop.eup %9431 }
 0xccc   : > { %v3221_v26 = vmul.f32 %v9432_v25, %v3073_v6  ;;  %v3223_v36 = vmul.f32 %v9432_v25, %v3143_v22 }
 0xcce   : > { %v3222_v27 = vsel %vm3217_vm8, %v3221_v26, %v10183_v21  ;;  %v3224_v28 = vsel %vm3217_vm8, %v3223_v36, %v10185_v24 }
 0xccf   : > { %9021 = vmatmul.mubr.msk.f32.vlgmr.msra.gmra.mxu1 %vm1043_vm0, %v3224_v28  ;;  %9026 = vmatmul.mubr.msk.f32.vlgmr.msra.gmra.mxu0 %vm1043_vm0, %v3222_v27 }
 0xcd0   : > { %9029 = vmatpush3.xpose.msk.msra.mxu1 %vm1061_vm13, %v3372_v43  ;;  %9030 = vmatprep.mubr.msk.f32.mxu1 %vm9507_vm12, %v9506_v37 }
 0xcd1   : > { %9034 = vmatpush3.msra.mxu0 %v10151_v51  ;;  %9038 = vmatprep.subr.mxu1 %v9506_v37 }
 0xcd2   : > { %9035 = vmatprep.mubr.msk.f32.mxu0 %vm9507_vm12, %v9506_v37  ;;  %9043 = vmatprep.subr.mxu0 %v9506_v37 }
 0xcd3   : > { %9031 = vmatmul.mubr.msk.f32.vlgmr.msra.gmra.mxu1 %vm1061_vm13, %v9957_v54 }
 0xcd4   : > { %9039 = vmatpush3.msra.mxu1 %v10154_v52  ;;  %9040 = vmatprep.mubr.msk.f32.mxu1 %vm9507_vm12, %v9506_v37 }
 0xcd5   : > { %9048 = vmatprep.subr.mxu1 %v9506_v37 }
 0xd8f   : > { %v3294_v33 = vpop.f32.mrf.mxu1  ;;  %v3367_v29 = vpop.f32.mrf.mxu0 }
 0xd90   : > { %v3368_v18 = vadd.f32 %v3367_v29, %v3294_v33 }
 0xd91   : > { %v9022_v31 = vpop.f32.mrf.mxu1  ;;  %v9027_v32 = vpop.f32.mrf.mxu0 }
 0xd93   : > { %v3441_v45 = vpop.f32.mrf.mxu1 }
 0xd94   : > { %v3445_v34 = vsel %vm1061_vm13, %v3441_v45, -inf }
 0xd95   : > { %3446 = vmax.xlane.f32.xlu1 %v3445_v34  ;;  %v9032_v35 = vpop.f32.mrf.mxu1 }
 0xda6   : > { %3820 = vrot.lane.b32.xlu1 %v10081_v57, %s9510_s30 }
 0xdaa   : > { %4269 = vrot.lane.b32.xlu1 %v10081_v57, %s9511_s28 }
 0xe1e   : > { %v3447_v44 = vpop.xlane.xlu1 %3446 }
 0xe1f   : > { %v3448_v17 = vsub.f32 %v3441_v45, %v3447_v44 }
 0xe21   : > { %v3449_v47 = vmul.f32 1.442695, %v3448_v17 }
 0xe22   : > { %v3821_v1 = vpop.permute.xlu1 %3820 }
 0xe23   : > { %9433 = vpow2.f32 %v3449_v47 }
 0xe26   : > { %v4270_v35 = vpop.permute.xlu1 %4269 }
 0xe30   : > { %v9434_v56 = vpop.eup %9433 }
 0xe31   : > { %9036 = vmatmul.mubr.msk.f32.vlgmr.msra.gmra.mxu0 %vm1061_vm13, %v9434_v56  ;;  %9041 = vmatmul.mubr.msk.f32.vlgmr.msra.gmra.mxu1 %vm1061_vm13, %v9434_v56 }
 0xe32   : > { %9044 = vmatpush3.msk.msra.mxu0 %vm2904_vm6, %v9509_v38  ;;  %9045 = vmatprep.mubr.msk.f32.mxu0 %vm9507_vm12, %v9506_v37 }
 0xe33   : > { %9049 = vmatpush3.msk.msra.mxu1 %vm1368_vm7, %v9987_v63  ;;  %9053 = vmatprep.subr.mxu0 %v9506_v37 }
 0xe34   : > { %9050 = vmatprep.mubr.msk.f32.mxu1 %vm9507_vm12, %v9506_v37  ;;  %9058 = vmatprep.subr.mxu1 %v9506_v37 }
 0xe35   : > { %9046 = vmatmul.mubr.msk.f32.vlgmr.msra.gmra.mxu0 %vm1061_vm13, %v9434_v56 }
 0xe36   : > { %9054 = vmatpush3.msk.msra.mxu0 %vm1368_vm7, %v9992_v7  ;;  %9055 = vmatprep.mubr.msk.f32.mxu0 %vm9507_vm12, %v9506_v37 }
 0xe37   : > { %9063 = vmatprep.subr.mxu0 %v9506_v37 }
 0xef1   : > { %v3520_v57 = vpop.f32.mrf.mxu0  ;;  %v3590_v2 = vpop.f32.mrf.mxu1 }
 0xef3   : > { %v9037_v58 = vpop.f32.mrf.mxu0  ;;  %v9042_v59 = vpop.f32.mrf.mxu1 }
 0xef5   : > { %v3660_v60 = vpop.f32.mrf.mxu0 }
 0xef6   : > { %vm3664_vm9 = vcmp.gt.f32.partialorder %v3660_v60, 0.0 }
 0xef7   : > { %v3665_v61 = vsel %vm3664_vm9, %v3660_v60, 1.0  ;;  %v9047_v62 = vpop.f32.mrf.mxu0 }
 0xef8   : > { %9435 = vrcp.f32 %v3665_v61 }
 0xf05   : > { %v9436_v4 = vpop.eup %9435 }
 0xf06   : > { %v3668_v5 = vmul.f32 %v9436_v4, %v3520_v57  ;;  %v3670_v40 = vmul.f32 %v9436_v4, %v3590_v2 }
 0xf08   : > { %v3669_v6 = vsel %vm3664_vm9, %v3668_v5, %v10183_v21  ;;  %v3671_v22 = vsel %vm3664_vm9, %v3670_v40, %v10185_v24 }
 0xf09   : > { %9051 = vmatmul.mubr.msk.f32.vlgmr.msra.gmra.mxu1 %vm1043_vm0, %v3669_v6  ;;  %9056 = vmatmul.mubr.msk.f32.vlgmr.msra.gmra.mxu0 %vm1043_vm0, %v3671_v22 }
 0xf0a   : > { %9059 = vmatpush3.xpose.msk.msra.mxu1 %vm1061_vm13, %v3821_v1  ;;  %9060 = vmatprep.mubr.msk.f32.mxu1 %vm9507_vm12, %v9506_v37 }
 0xf0b   : > { %9064 = vmatpush3.msra.mxu0 %v10151_v51  ;;  %9068 = vmatprep.subr.mxu1 %v9506_v37 }
 0xf0c   : > { %9065 = vmatprep.mubr.msk.f32.mxu0 %vm9507_vm12, %v9506_v37  ;;  %9073 = vmatprep.subr.mxu0 %v9506_v37 }
 0xf0d   : > { %9061 = vmatmul.mubr.msk.f32.vlgmr.msra.gmra.mxu1 %vm1061_vm13, %v10010_v55 }
 0xf0e   : > { %9069 = vmatpush3.msra.mxu1 %v10154_v52  ;;  %9070 = vmatprep.mubr.msk.f32.mxu1 %vm9507_vm12, %v9506_v37 }
 0xf0f   : > { %9078 = vmatprep.subr.mxu1 %v9506_v37 }
 0xfc9   : > { %v3741_v50 = vpop.f32.mrf.mxu1  ;;  %v3815_v8 = vpop.f32.mrf.mxu0 }
 0xfca   : > { %v3745_v49 = vadd.f32 %v3741_v50, %v3368_v18 }
 0xfcb   : > { %v9052_v11 = vpop.f32.mrf.mxu1  ;;  %v9057_v14 = vpop.f32.mrf.mxu0 }
 0xfcc   : > { %v3819_v42 = vadd.f32 %v3815_v8, %v3745_v49  ;;  %v10310_v11 = vld [vmem:[%s10725_s7] ss:$0 sm:$0xff] }
 0xfcd   : > { %v3890_v48 = vpop.f32.mrf.mxu1  ;;  %v10314_v14 = vadd.f32 %v10310_v11, %v9938_v10  ;;  %v10330_v10 = vld [vmem:[%s10721_s3] sm:$0xff] }
 0xfce   : > { %v3894_v12 = vsel %vm1061_vm13, %v3890_v48, -inf }
 0xfcf   : > { %3895 = vmax.xlane.f32.xlu0 %v3894_v12  ;;  %v9062_v9 = vpop.f32.mrf.mxu1 }
0x1058   : > { %v3896_v20 = vpop.xlane.xlu0 %3895 }
0x1059   : > { %v3897_v53 = vsub.f32 %v3890_v48, %v3896_v20 }
0x105b   : > { %v3898_v23 = vmul.f32 1.442695, %v3897_v53 }
0x105d   : > { %9437 = vpow2.f32 %v3898_v23 }
0x106a   : > { %v9438_v25 = vpop.eup %9437 }
0x106b   : > { %9066 = vmatmul.mubr.msk.f32.vlgmr.msra.gmra.mxu0 %vm1061_vm13, %v9438_v25  ;;  %9071 = vmatmul.mubr.msk.f32.vlgmr.msra.gmra.mxu1 %vm1061_vm13, %v9438_v25 }
0x106c   : > { %9074 = vmatpush3.msk.msra.mxu0 %vm2904_vm6, %v9509_v38  ;;  %9075 = vmatprep.mubr.msk.f32.mxu0 %vm9507_vm12, %v9506_v37 }
0x106d   : > { %9079 = vmatpush3.msk.msra.mxu1 %vm1368_vm7, %v10042_v19  ;;  %9083 = vmatprep.subr.mxu0 %v9506_v37 }
0x106e   : > { %9080 = vmatprep.mubr.msk.f32.mxu1 %vm9507_vm12, %v9506_v37  ;;  %9088 = vmatprep.subr.mxu1 %v9506_v37 }
0x106f   : > { %9076 = vmatmul.mubr.msk.f32.vlgmr.msra.gmra.mxu0 %vm1061_vm13, %v9438_v25 }
0x1070   : > { %9084 = vmatpush3.msk.msra.mxu0 %vm1368_vm7, %v10047_v13  ;;  %9085 = vmatprep.mubr.msk.f32.mxu0 %vm9507_vm12, %v9506_v37 }
0x1071   : > { %9093 = vmatprep.subr.mxu0 %v9506_v37 }
0x112b   : > { %v3969_v26 = vpop.f32.mrf.mxu0  ;;  %v4039_v36 = vpop.f32.mrf.mxu1 }
0x112d   : > { %v9067_v27 = vpop.f32.mrf.mxu0  ;;  %v9072_v28 = vpop.f32.mrf.mxu1 }
0x112e   : > { %v10340_v27 = vld [vmem:[%s9877_s26 + $0x10] sm:$0xff] }
0x112f   : > { %v4109_v43 = vpop.f32.mrf.mxu0  ;;  %v8574_v28 = vld [vmem:[%s9883_s29 + $0x10] sm:$0xff]  ;;  %vm4725_vm14 = vcmp.ne.f32.partialorder %v10340_v27, 0.0 }
0x1130   : > { %vm4113_vm10 = vcmp.gt.f32.partialorder %v4109_v43, 0.0 }
0x1131   : > { %v4114_v33 = vsel %vm4113_vm10, %v4109_v43, 1.0  ;;  %v9077_v29 = vpop.f32.mrf.mxu0  ;;  %v8576_v43 = vsel %vm4725_vm14, 1.0, %v9506_v37 }
0x1132   : > { %9439 = vrcp.f32 %v4114_v33  ;;  %v10347_v33 = vmul.f32 %v8576_v43, %v8574_v28  ;;  %v10350_v29 = vmul.f32 %v8576_v43, %v10340_v27 }
0x113f   : > { %v9440_v18 = vpop.eup %9439 }
0x1140   : > { %v4117_v31 = vmul.f32 %v9440_v18, %v3969_v26  ;;  %v4119_v32 = vmul.f32 %v9440_v18, %v4039_v36 }
0x1142   : > { %v4118_v45 = vsel %vm4113_vm10, %v4117_v31, %v10183_v21  ;;  %v4120_v34 = vsel %vm4113_vm10, %v4119_v32, %v10185_v24 }
0x1143   : > { %9081 = vmatmul.mubr.msk.f32.vlgmr.msra.gmra.mxu1 %vm1043_vm0, %v4118_v45  ;;  %9086 = vmatmul.mubr.msk.f32.vlgmr.msra.gmra.mxu0 %vm1043_vm0, %v4120_v34  ;;  %v4730_v34 = vsel %vm1043_vm0, %v8574_v28, 0.0 }
0x1144   : > { %9089 = vmatpush3.xpose.msk.msra.mxu1 %vm1061_vm13, %v4270_v35  ;;  %9090 = vmatprep.mubr.msk.f32.mxu1 %vm9507_vm12, %v9506_v37  ;;  %v4731_v35 = vrot.slane %v4730_v34, 4 }
0x1145   : > { %9094 = vmatpush3.msra.mxu0 %v10151_v51  ;;  %9098 = vmatprep.subr.mxu1 %v9506_v37 }
0x1146   : > { %9095 = vmatprep.mubr.msk.f32.mxu0 %vm9507_vm12, %v9506_v37  ;;  %9103 = vmatprep.subr.mxu0 %v9506_v37 }
0x1147   : > { %9091 = vmatmul.mubr.msk.f32.vlgmr.msra.gmra.mxu1 %vm1061_vm13, %v10065_v0 }
0x1148   : > { %9099 = vmatpush3.msra.mxu1 %v10154_v52  ;;  %9100 = vmatprep.mubr.msk.f32.mxu1 %vm9507_vm12, %v9506_v37 }
0x1149   : > { %9108 = vmatprep.subr.mxu1 %v9506_v37 }
0x1203   : > { %v4190_v44 = vpop.f32.mrf.mxu1  ;;  %v4264_v17 = vpop.f32.mrf.mxu0 }
0x1204   : > { %v4194_v51 = vadd.f32 %v4190_v44, %v3819_v42 }
0x1205   : > { %v9082_v47 = vpop.f32.mrf.mxu1  ;;  %v9087_v56 = vpop.f32.mrf.mxu0 }
0x1206   : > { %v4268_v57 = vadd.f32 %v4264_v17, %v4194_v51  ;;  %v4732_v17 = vadd.f32 %v4731_v35, %v4730_v34 }
0x1207   : > { %v4339_v2 = vpop.f32.mrf.mxu1 }
0x1208   : > { %v4343_v58 = vsel %vm1061_vm13, %v4339_v2, -inf }
0x1209   : > { %4344 = vmax.xlane.f32.xlu1 %v4343_v58  ;;  %v9092_v59 = vpop.f32.mrf.mxu1  ;;  %v4733_v58 = vrot.slane %v4732_v17, 2 }
0x1292   : > { %v4345_v60 = vpop.xlane.xlu1 %4344 }
0x1293   : > { %v4346_v61 = vsub.f32 %v4339_v2, %v4345_v60 }
0x1295   : > { %v4347_v62 = vmul.f32 1.442695, %v4346_v61 }
0x1297   : > { %9441 = vpow2.f32 %v4347_v62  ;;  %v4734_v62 = vadd.f32 %v4733_v58, %v4732_v17 }
0x12a4   : > { %v9442_v52 = vpop.eup %9441 }
0x12a5   : > { %9096 = vmatmul.mubr.msk.f32.vlgmr.msra.gmra.mxu0 %vm1061_vm13, %v9442_v52  ;;  %9101 = vmatmul.mubr.msk.f32.vlgmr.msra.gmra.mxu1 %vm1061_vm13, %v9442_v52 }
0x12a6   : > { %9104 = vmatpush3.msk.msra.mxu0 %vm2904_vm6, %v9509_v38  ;;  %9105 = vmatprep.mubr.msk.f32.mxu0 %vm9507_vm12, %v9506_v37 }
0x12a7   : > { %9109 = vmatpush3.msk.msra.mxu1 %vm1368_vm7, %v10101_v39  ;;  %9113 = vmatprep.subr.mxu0 %v9506_v37 }
0x12a8   : > { %9110 = vmatprep.mubr.msk.f32.mxu1 %vm9507_vm12, %v9506_v37  ;;  %9118 = vmatprep.subr.mxu1 %v9506_v37 }
0x12a9   : > { %9106 = vmatmul.mubr.msk.f32.vlgmr.msra.gmra.mxu0 %vm1061_vm13, %v9442_v52 }
0x12aa   : > { %9114 = vmatpush3.msk.msra.mxu0 %vm1368_vm7, %v10106_v41  ;;  %9115 = vmatprep.mubr.msk.f32.mxu0 %vm9507_vm12, %v9506_v37 }
0x12ab   : > { %9123 = vmatprep.subr.mxu0 %v9506_v37 }
0x1365   : > { %v4418_v15 = vpop.f32.mrf.mxu0  ;;  %v4488_v4 = vpop.f32.mrf.mxu1 }
0x1367   : > { %v9097_v5 = vpop.f32.mrf.mxu0  ;;  %v9102_v40 = vpop.f32.mrf.mxu1 }
0x1369   : > { %v4558_v6 = vpop.f32.mrf.mxu0 }
0x136a   : > { %vm4562_vm11 = vcmp.gt.f32.partialorder %v4558_v6, 0.0 }
0x136b   : > { %v4563_v22 = vsel %vm4562_vm11, %v4558_v6, 1.0  ;;  %v9107_v1 = vpop.f32.mrf.mxu0 }
0x136c   : > { %9443 = vrcp.f32 %v4563_v22 }
0x1379   : > { %v9444_v50 = vpop.eup %9443 }
0x137a   : > { %v4566_v8 = vmul.f32 %v9444_v50, %v4418_v15  ;;  %v4568_v49 = vmul.f32 %v9444_v50, %v4488_v4  ;;  %v4735_v15 = vrot.slane %v4734_v62, 1 }
0x137c   : > { %v4567_v42 = vsel %vm4562_vm11, %v4566_v8, %v10183_v21  ;;  %v4569_v48 = vsel %vm4562_vm11, %v4568_v49, %v10185_v24  ;;  %v4736_v5 = vadd.f32 %v4735_v15, %v4734_v62 }
0x137d   : > { %9111 = vmatmul.mubr.msk.f32.vlgmr.msra.gmra.mxu1 %vm1043_vm0, %v4567_v42  ;;  %9116 = vmatmul.mubr.msk.f32.vlgmr.msra.gmra.mxu0 %vm1043_vm0, %v4569_v48 }
0x137e   : > { %9119 = vmatpush3.xpose.msk.msra.mxu1 %vm1061_vm13, %v10314_v14  ;;  %9120 = vmatprep.mubr.msk.f32.mxu1 %vm9507_vm12, %v9506_v37  ;;  %v10381_v6 = vmul.f32 0.125, %v4736_v5 }
0x137f   : > { %9128 = vmatprep.subr.mxu1 %v9506_v37  ;;  %9125 = vmatprep.mubr.msk.f32.mxu0 %vm9507_vm12, %v9506_v37 }
0x1380   : > { %9124 = vmatpush3.msra.mxu0 %v10347_v33 }
0x1381   : > { %9121 = vmatmul.mubr.msk.f32.vlgmr.msra.gmra.mxu1 %vm1061_vm13, %v10330_v10  ;;  %9133 = vmatprep.subr.mxu0 %v9506_v37 }
0x1382   : > { %9130 = vmatprep.mubr.msk.f32.mxu1 %vm9507_vm12, %v9506_v37  ;;  %9129 = vmatpush3.msra.mxu1 %v10350_v29 }
0x1383   : > { %9138 = vmatprep.subr.mxu1 %v9506_v37 }
0x143d   : > { %v4639_v21 = vpop.f32.mrf.mxu1  ;;  %v4713_v24 = vpop.f32.mrf.mxu0 }
0x143e   : > { %v4643_v12 = vadd.f32 %v4639_v21, %v4268_v57 }
0x143f   : > { %v9112_v9 = vpop.f32.mrf.mxu1  ;;  %v9117_v20 = vpop.f32.mrf.mxu0 }
0x1440   : > { %v4717_v53 = vadd.f32 %v4713_v24, %v4643_v12 }
0x1441   : > { %v4815_v23 = vpop.f32.mrf.mxu1 }
0x1442   : > { %v4718_v25 = vadd.f32 %v10132_v30, %v4717_v53  ;;  %v4819_v26 = vsel %vm1061_vm13, %v4815_v23, -inf }
0x1443   : > { %4820 = vmax.xlane.f32.xlu0 %v4819_v26  ;;  %v9122_v36 = vpop.f32.mrf.mxu1 }
0x1444   : > { %8573 = vst [vmem:[%s10138_s14 + $0x8] sm:$0xff] %v4718_v25 }
0x1459   : > { %5192 = vrot.lane.b32.xlu0 %v10314_v14, %s9508_s21 }
0x14cc   : > { %v4821_v18 = vpop.xlane.xlu0 %4820 }
0x14cd   : > { %v4822_v31 = vsub.f32 %v4815_v23, %v4821_v18 }
0x14cf   : > { %v4823_v32 = vmul.f32 1.442695, %v4822_v31 }
0x14d0   : > { %v5193_v48 = vpop.permute.xlu0 %5192 }
0x14d1   : > { %9445 = vpow2.f32 %v4823_v32 }
0x14de   : > { %v9446_v45 = vpop.eup %9445 }
0x14df   : > { %9126 = vmatmul.mubr.msk.f32.vlgmr.msra.gmra.mxu0 %vm1061_vm13, %v9446_v45  ;;  %9131 = vmatmul.mubr.msk.f32.vlgmr.msra.gmra.mxu1 %vm1061_vm13, %v9446_v45 }
0x14e0   : > { %9134 = vmatpush3.msk.msra.mxu0 %vm4725_vm14, %v9509_v38  ;;  %9135 = vmatprep.mubr.msk.f32.mxu0 %vm9507_vm12, %v9506_v37 }
0x14e1   : > { %9139 = vmatpush3.msk.msra.mxu1 %vm1368_vm7, %v9920_v16  ;;  %9143 = vmatprep.subr.mxu0 %v9506_v37  ;;  %v4738_v16 = vsel %vm1043_vm0, %v10340_v27, 0.0 }
0x14e2   : > { %9140 = vmatprep.mubr.msk.f32.mxu1 %vm9507_vm12, %v9506_v37  ;;  %9148 = vmatprep.subr.mxu1 %v9506_v37  ;;  %v4739_v44 = vrot.slane %v4738_v16, 4 }
0x14e3   : > { %9136 = vmatmul.mubr.msk.f32.vlgmr.msra.gmra.mxu0 %vm1061_vm13, %v9446_v45 }
0x14e4   : > { %9144 = vmatpush3.msk.msra.mxu0 %vm1368_vm7, %v9925_v46  ;;  %9145 = vmatprep.mubr.msk.f32.mxu0 %vm9507_vm12, %v9506_v37  ;;  %v4740_v51 = vadd.f32 %v4739_v44, %v4738_v16 }
0x14e5   : > { %9153 = vmatprep.subr.mxu0 %v9506_v37 }
0x14e6   : > { %v4741_v46 = vrot.slane %v4740_v51, 2 }
0x14e8   : > { %v4742_v52 = vadd.f32 %v4741_v46, %v4740_v51 }
0x14ea   : > { %v4743_v4 = vrot.slane %v4742_v52, 1 }
0x14ec   : > { %v4744_v40 = vadd.f32 %v4743_v4, %v4742_v52 }
0x14ee   : > { %v10383_v22 = vmul.f32 0.125, %v4744_v40 }
0x159f   : > { %v4894_v47 = vpop.f32.mrf.mxu0  ;;  %v4964_v56 = vpop.f32.mrf.mxu1 }
0x15a1   : > { %v9127_v57 = vpop.f32.mrf.mxu0  ;;  %v9132_v2 = vpop.f32.mrf.mxu1 }
0x15a3   : > { %v5034_v59 = vpop.f32.mrf.mxu0 }
0x15a4   : > { %vm5038_vm15 = vcmp.gt.f32.partialorder %v5034_v59, 0.0 }
0x15a5   : > { %v5039_v60 = vsel %vm5038_vm15, %v5034_v59, 1.0  ;;  %v9137_v61 = vpop.f32.mrf.mxu0 }
0x15a6   : > { %9447 = vrcp.f32 %v5039_v60 }
0x15b3   : > { %v9448_v1 = vpop.eup %9447 }
0x15b4   : > { %v5042_v50 = vmul.f32 %v9448_v1, %v4894_v47  ;;  %v5044_v8 = vmul.f32 %v9448_v1, %v4964_v56 }
0x15b6   : > { %v5043_v49 = vsel %vm5038_vm15, %v5042_v50, %v10381_v6  ;;  %v5045_v42 = vsel %vm5038_vm15, %v5044_v8, %v10383_v22 }
0x15b7   : > { %9141 = vmatmul.mubr.msk.f32.vlgmr.msra.gmra.mxu1 %vm1043_vm0, %v5045_v42  ;;  %9146 = vmatmul.mubr.msk.f32.vlgmr.msra.gmra.mxu0 %vm1043_vm0, %v5043_v49 }
0x15b8   : > { %9149 = vmatpush3.xpose.msk.msra.mxu1 %vm1061_vm13, %v5193_v48  ;;  %9150 = vmatprep.mubr.msk.f32.mxu1 %vm9507_vm12, %v9506_v37 }
0x15b9   : > { %9154 = vmatpush3.msra.mxu0 %v10347_v33  ;;  %9158 = vmatprep.subr.mxu1 %v9506_v37 }
0x15ba   : > { %9155 = vmatprep.mubr.msk.f32.mxu0 %vm9507_vm12, %v9506_v37  ;;  %9163 = vmatprep.subr.mxu0 %v9506_v37 }
0x15bb   : > { %9151 = vmatmul.mubr.msk.f32.vlgmr.msra.gmra.mxu1 %vm1061_vm13, %v9957_v54 }
0x15bc   : > { %9159 = vmatpush3.msra.mxu1 %v10350_v29  ;;  %9160 = vmatprep.mubr.msk.f32.mxu1 %vm9507_vm12, %v9506_v37 }
0x15bd   : > { %9168 = vmatprep.subr.mxu1 %v9506_v37 }
0x1677   : > { %v5115_v21 = vpop.f32.mrf.mxu1  ;;  %v5188_v24 = vpop.f32.mrf.mxu0 }
0x1678   : > { %v5189_v12 = vadd.f32 %v5188_v24, %v5115_v21 }
0x1679   : > { %v9142_v9 = vpop.f32.mrf.mxu1  ;;  %v9147_v20 = vpop.f32.mrf.mxu0 }
0x167b   : > { %v5262_v53 = vpop.f32.mrf.mxu1 }
0x167c   : > { %v5266_v23 = vsel %vm1061_vm13, %v5262_v53, -inf }
0x167d   : > { %5267 = vmax.xlane.f32.xlu1 %v5266_v23  ;;  %v9152_v25 = vpop.f32.mrf.mxu1 }
0x168e   : > { %5641 = vrot.lane.b32.xlu1 %v10314_v14, %s9510_s30 }
0x1692   : > { %6090 = vrot.lane.b32.xlu1 %v10314_v14, %s9511_s28 }
0x1706   : > { %v5268_v54 = vpop.xlane.xlu1 %5267 }
0x1707   : > { %v5269_v26 = vsub.f32 %v5262_v53, %v5268_v54 }
0x1709   : > { %v5270_v36 = vmul.f32 1.442695, %v5269_v26 }
0x170a   : > { %v5642_v17 = vpop.permute.xlu1 %5641 }
0x170b   : > { %9449 = vpow2.f32 %v5270_v36 }
0x170e   : > { %v6091_v21 = vpop.permute.xlu1 %6090 }
0x1718   : > { %v9450_v28 = vpop.eup %9449 }
0x1719   : > { %9156 = vmatmul.mubr.msk.f32.vlgmr.msra.gmra.mxu0 %vm1061_vm13, %v9450_v28  ;;  %9161 = vmatmul.mubr.msk.f32.vlgmr.msra.gmra.mxu1 %vm1061_vm13, %v9450_v28 }
0x171a   : > { %9164 = vmatpush3.msk.msra.mxu0 %vm4725_vm14, %v9509_v38  ;;  %9165 = vmatprep.mubr.msk.f32.mxu0 %vm9507_vm12, %v9506_v37 }
0x171b   : > { %9169 = vmatpush3.msk.msra.mxu1 %vm1368_vm7, %v9987_v63  ;;  %9173 = vmatprep.subr.mxu0 %v9506_v37 }
0x171c   : > { %9170 = vmatprep.mubr.msk.f32.mxu1 %vm9507_vm12, %v9506_v37  ;;  %9178 = vmatprep.subr.mxu1 %v9506_v37 }
0x171d   : > { %9166 = vmatmul.mubr.msk.f32.vlgmr.msra.gmra.mxu0 %vm1061_vm13, %v9450_v28 }
0x171e   : > { %9174 = vmatpush3.msk.msra.mxu0 %vm1368_vm7, %v9992_v7  ;;  %9175 = vmatprep.mubr.msk.f32.mxu0 %vm9507_vm12, %v9506_v37 }
0x171f   : > { %9183 = vmatprep.subr.mxu0 %v9506_v37 }
0x17d9   : > { %v5341_v14 = vpop.f32.mrf.mxu0  ;;  %v5411_v43 = vpop.f32.mrf.mxu1 }
0x17db   : > { %v9157_v63 = vpop.f32.mrf.mxu0  ;;  %v9162_v18 = vpop.f32.mrf.mxu1 }
0x17dd   : > { %v5481_v31 = vpop.f32.mrf.mxu0 }
0x17de   : > { %vm5485_vm4 = vcmp.gt.f32.partialorder %v5481_v31, 0.0 }
0x17df   : > { %v5486_v32 = vsel %vm5485_vm4, %v5481_v31, 1.0  ;;  %v9167_v45 = vpop.f32.mrf.mxu0 }
0x17e0   : > { %9451 = vrcp.f32 %v5486_v32 }
0x17ed   : > { %v9452_v34 = vpop.eup %9451 }
0x17ee   : > { %v5489_v16 = vmul.f32 %v9452_v34, %v5341_v14  ;;  %v5491_v35 = vmul.f32 %v9452_v34, %v5411_v43 }
0x17f0   : > { %v5490_v44 = vsel %vm5485_vm4, %v5489_v16, %v10381_v6  ;;  %v5492_v7 = vsel %vm5485_vm4, %v5491_v35, %v10383_v22 }
0x17f1   : > { %9171 = vmatmul.mubr.msk.f32.vlgmr.msra.gmra.mxu1 %vm1043_vm0, %v5490_v44  ;;  %9176 = vmatmul.mubr.msk.f32.vlgmr.msra.gmra.mxu0 %vm1043_vm0, %v5492_v7 }
0x17f2   : > { %9179 = vmatpush3.xpose.msk.msra.mxu1 %vm1061_vm13, %v5642_v17  ;;  %9180 = vmatprep.mubr.msk.f32.mxu1 %vm9507_vm12, %v9506_v37 }
0x17f3   : > { %9184 = vmatpush3.msra.mxu0 %v10347_v33  ;;  %9188 = vmatprep.subr.mxu1 %v9506_v37 }
0x17f4   : > { %9185 = vmatprep.mubr.msk.f32.mxu0 %vm9507_vm12, %v9506_v37  ;;  %9193 = vmatprep.subr.mxu0 %v9506_v37 }
0x17f5   : > { %9181 = vmatmul.mubr.msk.f32.vlgmr.msra.gmra.mxu1 %vm1061_vm13, %v10010_v55 }
0x17f6   : > { %9189 = vmatpush3.msra.mxu1 %v10350_v29  ;;  %9190 = vmatprep.mubr.msk.f32.mxu1 %vm9507_vm12, %v9506_v37 }
0x17f7   : > { %9198 = vmatprep.subr.mxu1 %v9506_v37 }
0x18b1   : > { %v5562_v51 = vpop.f32.mrf.mxu1  ;;  %v5636_v47 = vpop.f32.mrf.mxu0 }
0x18b2   : > { %v5566_v56 = vadd.f32 %v5562_v51, %v5189_v12 }
0x18b3   : > { %v9172_v57 = vpop.f32.mrf.mxu1  ;;  %v9177_v2 = vpop.f32.mrf.mxu0 }
0x18b4   : > { %v5640_v58 = vadd.f32 %v5636_v47, %v5566_v56  ;;  %v10525_v56 = vld [vmem:[%s9877_s26 + $0x18] sm:$0xff] }
0x18b5   : > { %v5711_v46 = vpop.f32.mrf.mxu1  ;;  %vm6546_vm3 = vcmp.ne.f32.partialorder %v10525_v56, 0.0 }
0x18b6   : > { %v5715_v59 = vsel %vm1061_vm13, %v5711_v46, -inf  ;;  %v8620_v57 = vsel %vm6546_vm3, 1.0, %v9506_v37 }
0x18b7   : > { %5716 = vmax.xlane.f32.xlu0 %v5715_v59  ;;  %v9182_v60 = vpop.f32.mrf.mxu1 }
0x1940   : > { %v5717_v61 = vpop.xlane.xlu0 %5716 }
0x1941   : > { %v5718_v55 = vsub.f32 %v5711_v46, %v5717_v61  ;;  %v9479_v61 = vld [vmem:[%s10727_s9] sm:$0xf] }
0x1943   : > { %v5719_v62 = vmul.f32 1.442695, %v5718_v55  ;;  %v9480_v55 = vld [vmem:[%s10726_s8] sm:$0xf] }
0x1945   : > { %9453 = vpow2.f32 %v5719_v62 }
0x1952   : > { %v9454_v52 = vpop.eup %9453 }
0x1953   : > { %9186 = vmatmul.mubr.msk.f32.vlgmr.msra.gmra.mxu0 %vm1061_vm13, %v9454_v52  ;;  %9191 = vmatmul.mubr.msk.f32.vlgmr.msra.gmra.mxu1 %vm1061_vm13, %v9454_v52 }
0x1954   : > { %9194 = vmatpush3.msk.msra.mxu0 %vm4725_vm14, %v9509_v38  ;;  %9195 = vmatprep.mubr.msk.f32.mxu0 %vm9507_vm12, %v9506_v37 }
0x1955   : > { %9199 = vmatpush3.msk.msra.mxu1 %vm1368_vm7, %v10042_v19  ;;  %9203 = vmatprep.subr.mxu0 %v9506_v37 }
0x1956   : > { %9200 = vmatprep.mubr.msk.f32.mxu1 %vm9507_vm12, %v9506_v37  ;;  %9208 = vmatprep.subr.mxu1 %v9506_v37 }
0x1957   : > { %9196 = vmatmul.mubr.msk.f32.vlgmr.msra.gmra.mxu0 %vm1061_vm13, %v9454_v52  ;;  %v6559_v52 = vsel %vm1043_vm0, %v10525_v56, 0.0 }
0x1958   : > { %9204 = vmatpush3.msk.msra.mxu0 %vm1368_vm7, %v10047_v13  ;;  %9205 = vmatprep.mubr.msk.f32.mxu0 %vm9507_vm12, %v9506_v37 }
0x1959   : > { %9213 = vmatprep.subr.mxu0 %v9506_v37 }
0x1a13   : > { %v5790_v15 = vpop.f32.mrf.mxu0  ;;  %v5860_v4 = vpop.f32.mrf.mxu1 }
0x1a15   : > { %v9187_v19 = vpop.f32.mrf.mxu0  ;;  %v9192_v5 = vpop.f32.mrf.mxu1 }
0x1a17   : > { %v5930_v40 = vpop.f32.mrf.mxu0 }
0x1a18   : > { %vm5934_vm1 = vcmp.gt.f32.partialorder %v5930_v40, 0.0 }
0x1a19   : > { %v5935_v1 = vsel %vm5934_vm1, %v5930_v40, 1.0  ;;  %v9197_v50 = vpop.f32.mrf.mxu0 }
0x1a1a   : > { %9455 = vrcp.f32 %v5935_v1 }
0x1a27   : > { %v9456_v8 = vpop.eup %9455 }
0x1a28   : > { %v5938_v49 = vmul.f32 %v9456_v8, %v5790_v15  ;;  %v5940_v42 = vmul.f32 %v9456_v8, %v5860_v4  ;;  %v6560_v4 = vrot.slane %v6559_v52, 4 }
0x1a2a   : > { %v5939_v48 = vsel %vm5934_vm1, %v5938_v49, %v10381_v6  ;;  %v5941_v13 = vsel %vm5934_vm1, %v5940_v42, %v10383_v22  ;;  %v6561_v5 = vadd.f32 %v6560_v4, %v6559_v52 }
0x1a2b   : > { %9201 = vmatmul.mubr.msk.f32.vlgmr.msra.gmra.mxu1 %vm1043_vm0, %v5939_v48  ;;  %9206 = vmatmul.mubr.msk.f32.vlgmr.msra.gmra.mxu0 %vm1043_vm0, %v5941_v13 }
0x1a2c   : > { %9209 = vmatpush3.xpose.msk.msra.mxu1 %vm1061_vm13, %v6091_v21  ;;  %9210 = vmatprep.mubr.msk.f32.mxu1 %vm9507_vm12, %v9506_v37  ;;  %v6562_v42 = vrot.slane %v6561_v5, 2 }
0x1a2d   : > { %9214 = vmatpush3.msra.mxu0 %v10347_v33  ;;  %9218 = vmatprep.subr.mxu1 %v9506_v37 }
0x1a2e   : > { %9215 = vmatprep.mubr.msk.f32.mxu0 %vm9507_vm12, %v9506_v37  ;;  %9223 = vmatprep.subr.mxu0 %v9506_v37 }
0x1a2f   : > { %9211 = vmatmul.mubr.msk.f32.vlgmr.msra.gmra.mxu1 %vm1061_vm13, %v10065_v0 }
0x1a30   : > { %9219 = vmatpush3.msra.mxu1 %v10350_v29  ;;  %9220 = vmatprep.mubr.msk.f32.mxu1 %vm9507_vm12, %v9506_v37 }
0x1a31   : > { %9228 = vmatprep.subr.mxu1 %v9506_v37 }
0x1aeb   : > { %v6011_v24 = vpop.f32.mrf.mxu1  ;;  %v6085_v12 = vpop.f32.mrf.mxu0 }
0x1aec   : > { %v6015_v33 = vadd.f32 %v6011_v24, %v5640_v58 }
0x1aed   : > { %v9202_v9 = vpop.f32.mrf.mxu1  ;;  %v9207_v20 = vpop.f32.mrf.mxu0 }
0x1aee   : > { %v6089_v53 = vadd.f32 %v6085_v12, %v6015_v33  ;;  %v6563_v12 = vadd.f32 %v6562_v42, %v6561_v5 }
0x1aef   : > { %v6160_v23 = vpop.f32.mrf.mxu1 }
0x1af0   : > { %v6164_v25 = vsel %vm1061_vm13, %v6160_v23, -inf  ;;  %v6564_v9 = vrot.slane %v6563_v12, 1 }
0x1af1   : > { %6165 = vmax.xlane.f32.xlu1 %v6164_v25  ;;  %v9212_v54 = vpop.f32.mrf.mxu1 }
0x1b7a   : > { %v6166_v26 = vpop.xlane.xlu1 %6165 }
0x1b7b   : > { %v6167_v0 = vsub.f32 %v6160_v23, %v6166_v26 }
0x1b7d   : > { %v6168_v36 = vmul.f32 1.442695, %v6167_v0 }
0x1b7f   : > { %9457 = vpow2.f32 %v6168_v36 }
0x1b8c   : > { %v9458_v29 = vpop.eup %9457 }
0x1b8d   : > { %9216 = vmatmul.mubr.msk.f32.vlgmr.msra.gmra.mxu0 %vm1061_vm13, %v9458_v29  ;;  %9221 = vmatmul.mubr.msk.f32.vlgmr.msra.gmra.mxu1 %vm1061_vm13, %v9458_v29 }
0x1b8e   : > { %9224 = vmatpush3.msk.msra.mxu0 %vm4725_vm14, %v9509_v38  ;;  %9225 = vmatprep.mubr.msk.f32.mxu0 %vm9507_vm12, %v9506_v37 }
0x1b8f   : > { %9229 = vmatpush3.msk.msra.mxu1 %vm1368_vm7, %v10101_v39  ;;  %9233 = vmatprep.subr.mxu0 %v9506_v37 }
0x1b90   : > { %9230 = vmatprep.mubr.msk.f32.mxu1 %vm9507_vm12, %v9506_v37  ;;  %9238 = vmatprep.subr.mxu1 %v9506_v37 }
0x1b91   : > { %9226 = vmatmul.mubr.msk.f32.vlgmr.msra.gmra.mxu0 %vm1061_vm13, %v9458_v29 }
0x1b92   : > { %9234 = vmatpush3.msk.msra.mxu0 %vm1368_vm7, %v10106_v41  ;;  %9235 = vmatprep.mubr.msk.f32.mxu0 %vm9507_vm12, %v9506_v37  ;;  %v1011_v41 = vadd.f32 %v10310_v11, %v9936_v3 }
0x1b93   : > { %9243 = vmatprep.subr.mxu0 %v9506_v37 }
0x1c4d   : > { %v6239_v27 = vpop.f32.mrf.mxu0  ;;  %v6309_v28 = vpop.f32.mrf.mxu1 }
0x1c4f   : > { %v9217_v39 = vpop.f32.mrf.mxu0  ;;  %v9222_v14 = vpop.f32.mrf.mxu1 }
0x1c51   : > { %v6379_v43 = vpop.f32.mrf.mxu0 }
0x1c52   : > { %vm6383_vm2 = vcmp.gt.f32.partialorder %v6379_v43, 0.0 }
0x1c53   : > { %v6384_v63 = vsel %vm6383_vm2, %v6379_v43, 1.0  ;;  %v9227_v18 = vpop.f32.mrf.mxu0 }
0x1c54   : > { %9459 = vrcp.f32 %v6384_v63 }
0x1c61   : > { %v9460_v31 = vpop.eup %9459 }
0x1c62   : > { %v6387_v32 = vmul.f32 %v9460_v31, %v6239_v27  ;;  %v6389_v45 = vmul.f32 %v9460_v31, %v6309_v28  ;;  %v9481_v28 = vld [vmem:[%s10721_s3 + $0x8] sm:$0xff] }
0x1c64   : > { %v6388_v34 = vsel %vm6383_vm2, %v6387_v32, %v10381_v6  ;;  %v6390_v16 = vsel %vm6383_vm2, %v6389_v45, %v10383_v22 }
0x1c65   : > { %9231 = vmatmul.mubr.msk.f32.vlgmr.msra.gmra.mxu1 %vm1043_vm0, %v6388_v34  ;;  %9236 = vmatmul.mubr.msk.f32.vlgmr.msra.gmra.mxu0 %vm1043_vm0, %v6390_v16 }
0x1c66   : > { %9239 = vmatpush3.xpose.msk.msra.mxu1 %vm1061_vm13, %v1011_v41  ;;  %9240 = vmatprep.mubr.msk.f32.mxu1 %vm9507_vm12, %v9506_v37 }
0x1c67   : > { %9248 = vmatprep.subr.mxu1 %v9506_v37  ;;  %9245 = vmatprep.mubr.msk.f32.mxu0 %vm9507_vm12, %v9506_v37 }
0x1c69   : > { %9241 = vmatmul.mubr.msk.f32.vlgmr.msra.gmra.mxu1 %vm1061_vm13, %v10330_v10  ;;  %v8618_v10 = vld [vmem:[%s9883_s29 + $0x18] sm:$0xff] }
0x1c6a   : > { %9250 = vmatprep.mubr.msk.f32.mxu1 %vm9507_vm12, %v9506_v37  ;;  %v10533_v2 = vmul.f32 %v8620_v57, %v8618_v10  ;;  %v6551_v62 = vsel %vm1043_vm0, %v8618_v10, 0.0 }
0x1c6b   : > { %v6552_v15 = vrot.slane %v6551_v62, 4 }
0x1c6c   : > { %9244 = vmatpush3.msra.mxu0 %v10533_v2 }
0x1c6d   : > { %9253 = vmatprep.subr.mxu0 %v9506_v37  ;;  %v6553_v19 = vadd.f32 %v6552_v15, %v6551_v62 }
0x1c6f   : > { %v6554_v49 = vrot.slane %v6553_v19, 2 }
0x1c71   : > { %v6555_v24 = vadd.f32 %v6554_v49, %v6553_v19 }
0x1c73   : > { %v6556_v33 = vrot.slane %v6555_v24, 1 }
0x1c75   : > { %v6557_v20 = vadd.f32 %v6556_v33, %v6555_v24 }
0x1c77   : > { %v10571_v23 = vmul.f32 0.125, %v6557_v20 }
0x1d25   : > { %v6460_v3 = vpop.f32.mrf.mxu1  ;;  %v6534_v11 = vpop.f32.mrf.mxu0 }
0x1d26   : > { %v6464_v6 = vadd.f32 %v6460_v3, %v6089_v53  ;;  %v6565_v53 = vadd.f32 %v6564_v9, %v6563_v12 }
0x1d27   : > { %v9232_v22 = vpop.f32.mrf.mxu1  ;;  %v9237_v35 = vpop.f32.mrf.mxu0 }
0x1d28   : > { %v6538_v44 = vadd.f32 %v6534_v11, %v6464_v6  ;;  %v10573_v25 = vmul.f32 0.125, %v6565_v53  ;;  %v9482_v11 = vld [vmem:[%s10726_s8 + $0x4] sm:$0xf] }
0x1d29   : > { %v6636_v7 = vpop.f32.mrf.mxu1  ;;  %v9483_v6 = vld [vmem:[%s10727_s9 + $0x4] sm:$0xf] }
0x1d2a   : > { %v6539_v17 = vadd.f32 %v10132_v30, %v6538_v44  ;;  %v6640_v51 = vsel %vm1061_vm13, %v6636_v7, -inf  ;;  %v10536_v30 = vmul.f32 %v8620_v57, %v10525_v56 }
0x1d2b   : > { %6641 = vmax.xlane.f32.xlu0 %v6640_v51  ;;  %v9242_v47 = vpop.f32.mrf.mxu1 }
0x1d2c   : > { %8617 = vst [vmem:[%s10138_s14 + $0x10] sm:$0xff] %v6539_v17  ;;  %9249 = vmatpush3.msra.mxu1 %v10536_v30 }
0x1d2d   : > { %9258 = vmatprep.subr.mxu1 %v9506_v37 }
0x1d41   : > { %7013 = vrot.lane.b32.xlu0 %v1011_v41, %s9508_s21 }
0x1d45   : > { %7462 = vrot.lane.b32.xlu0 %v1011_v41, %s9510_s30 }
0x1d49   : > { %7911 = vrot.lane.b32.xlu0 %v1011_v41, %s9511_s28 }
0x1db4   : > { %v6642_v58 = vpop.xlane.xlu0 %6641 }
0x1db5   : > { %v6643_v46 = vsub.f32 %v6636_v7, %v6642_v58 }
0x1db7   : > { %v6644_v59 = vmul.f32 1.442695, %v6643_v46 }
0x1db8   : > { %v7014_v27 = vpop.permute.xlu0 %7013 }
0x1db9   : > { %9461 = vpow2.f32 %v6644_v59 }
0x1dc6   : > { %v9462_v60 = vpop.eup %9461 }
0x1dc7   : > { %9246 = vmatmul.mubr.msk.f32.vlgmr.msra.gmra.mxu0 %vm1061_vm13, %v9462_v60  ;;  %9251 = vmatmul.mubr.msk.f32.vlgmr.msra.gmra.mxu1 %vm1061_vm13, %v9462_v60 }
0x1dc8   : > { %9254 = vmatpush3.msk.msra.mxu0 %vm6546_vm3, %v9509_v38  ;;  %9255 = vmatprep.mubr.msk.f32.mxu0 %vm9507_vm12, %v9506_v37 }
0x1dc9   : > { %9259 = vmatpush3.msk.msra.mxu1 %vm1368_vm7, %v9479_v61  ;;  %9263 = vmatprep.subr.mxu0 %v9506_v37  ;;  %v9484_v61 = vld [vmem:[%s10721_s3 + $0x10] sm:$0xff] }
0x1dca   : > { %9260 = vmatprep.mubr.msk.f32.mxu1 %vm9507_vm12, %v9506_v37  ;;  %9268 = vmatprep.subr.mxu1 %v9506_v37 }
0x1dcb   : > { %9256 = vmatmul.mubr.msk.f32.vlgmr.msra.gmra.mxu0 %vm1061_vm13, %v9462_v60  ;;  %v7463_v60 = vpop.permute.xlu0 %7462 }
0x1dcc   : > { %9264 = vmatpush3.msk.msra.mxu0 %vm1368_vm7, %v9480_v55  ;;  %9265 = vmatprep.mubr.msk.f32.mxu0 %vm9507_vm12, %v9506_v37 }
0x1dcd   : > { %9273 = vmatprep.subr.mxu0 %v9506_v37 }
0x1e87   : > { %v6715_v40 = vpop.f32.mrf.mxu0  ;;  %v6785_v1 = vpop.f32.mrf.mxu1 }
0x1e89   : > { %v9247_v50 = vpop.f32.mrf.mxu0  ;;  %v9252_v8 = vpop.f32.mrf.mxu1 }
0x1e8b   : > { %v6855_v48 = vpop.f32.mrf.mxu0 }
0x1e8c   : > { %vm6859_vm5 = vcmp.gt.f32.partialorder %v6855_v48, 0.0 }
0x1e8d   : > { %v6860_v13 = vsel %vm6859_vm5, %v6855_v48, 1.0  ;;  %v9257_v21 = vpop.f32.mrf.mxu0  ;;  %v9485_v48 = vld [vmem:[%s10726_s8 + $0x8] sm:$0xf] }
0x1e8e   : > { %9463 = vrcp.f32 %v6860_v13  ;;  %v9486_v13 = vld [vmem:[%s10727_s9 + $0x8] sm:$0xf] }
0x1e9b   : > { %v9464_v54 = vpop.eup %9463 }
0x1e9c   : > { %v6863_v26 = vmul.f32 %v9464_v54, %v6715_v40  ;;  %v6865_v0 = vmul.f32 %v9464_v54, %v6785_v1 }
0x1e9e   : > { %v6864_v36 = vsel %vm6859_vm5, %v6863_v26, %v10571_v23  ;;  %v6866_v29 = vsel %vm6859_vm5, %v6865_v0, %v10573_v25 }
0x1e9f   : > { %9261 = vmatmul.mubr.msk.f32.vlgmr.msra.gmra.mxu1 %vm1043_vm0, %v6866_v29  ;;  %9266 = vmatmul.mubr.msk.f32.vlgmr.msra.gmra.mxu0 %vm1043_vm0, %v6864_v36 }
0x1ea0   : > { %9269 = vmatpush3.xpose.msk.msra.mxu1 %vm1061_vm13, %v7014_v27  ;;  %9270 = vmatprep.mubr.msk.f32.mxu1 %vm9507_vm12, %v9506_v37  ;;  %v7912_v27 = vpop.permute.xlu0 %7911 }
0x1ea1   : > { %9274 = vmatpush3.msra.mxu0 %v10533_v2  ;;  %9278 = vmatprep.subr.mxu1 %v9506_v37 }
0x1ea2   : > { %9275 = vmatprep.mubr.msk.f32.mxu0 %vm9507_vm12, %v9506_v37  ;;  %9283 = vmatprep.subr.mxu0 %v9506_v37 }
0x1ea3   : > { %9271 = vmatmul.mubr.msk.f32.vlgmr.msra.gmra.mxu1 %vm1061_vm13, %v9481_v28  ;;  %v9487_v28 = vld [vmem:[%s10721_s3 + $0x18] sm:$0xff] }
0x1ea4   : > { %9279 = vmatpush3.msra.mxu1 %v10536_v30  ;;  %9280 = vmatprep.mubr.msk.f32.mxu1 %vm9507_vm12, %v9506_v37 }
0x1ea5   : > { %9288 = vmatprep.subr.mxu1 %v9506_v37 }
0x1f5f   : > { %v6936_v39 = vpop.f32.mrf.mxu1  ;;  %v7009_v14 = vpop.f32.mrf.mxu0 }
0x1f60   : > { %v7010_v43 = vadd.f32 %v7009_v14, %v6936_v39 }
0x1f61   : > { %v9262_v63 = vpop.f32.mrf.mxu1  ;;  %v9267_v18 = vpop.f32.mrf.mxu0 }
0x1f63   : > { %v7083_v31 = vpop.f32.mrf.mxu1 }
0x1f64   : > { %v7087_v32 = vsel %vm1061_vm13, %v7083_v31, -inf }
0x1f65   : > { %7088 = vmax.xlane.f32.xlu1 %v7087_v32  ;;  %v9272_v45 = vpop.f32.mrf.mxu1 }
0x1fee   : > { %v7089_v41 = vpop.xlane.xlu1 %7088 }
0x1fef   : > { %v7090_v34 = vsub.f32 %v7083_v31, %v7089_v41 }
0x1ff1   : > { %v7091_v16 = vmul.f32 1.442695, %v7090_v34 }
0x1ff3   : > { %9465 = vpow2.f32 %v7091_v16 }
0x2000   : > { %v9466_v3 = vpop.eup %9465 }
0x2001   : > { %9276 = vmatmul.mubr.msk.f32.vlgmr.msra.gmra.mxu0 %vm1061_vm13, %v9466_v3  ;;  %9281 = vmatmul.mubr.msk.f32.vlgmr.msra.gmra.mxu1 %vm1061_vm13, %v9466_v3 }
0x2002   : > { %9284 = vmatpush3.msk.msra.mxu0 %vm6546_vm3, %v9509_v38  ;;  %9285 = vmatprep.mubr.msk.f32.mxu0 %vm9507_vm12, %v9506_v37 }
0x2003   : > { %9289 = vmatpush3.msk.msra.mxu1 %vm1368_vm7, %v9482_v11  ;;  %9293 = vmatprep.subr.mxu0 %v9506_v37 }
0x2004   : > { %9290 = vmatprep.mubr.msk.f32.mxu1 %vm9507_vm12, %v9506_v37  ;;  %9298 = vmatprep.subr.mxu1 %v9506_v37 }
0x2005   : > { %9286 = vmatmul.mubr.msk.f32.vlgmr.msra.gmra.mxu0 %vm1061_vm13, %v9466_v3  ;;  %v9488_v3 = vld [vmem:[%s10726_s8 + $0xc] sm:$0xf] }
0x2006   : > { %9294 = vmatpush3.msk.msra.mxu0 %vm1368_vm7, %v9483_v6  ;;  %9295 = vmatprep.mubr.msk.f32.mxu0 %vm9507_vm12, %v9506_v37 }
0x2007   : > { %9303 = vmatprep.subr.mxu0 %v9506_v37 }
0x20c1   : > { %v7162_v22 = vpop.f32.mrf.mxu0  ;;  %v7232_v35 = vpop.f32.mrf.mxu1 }
0x20c3   : > { %v9277_v44 = vpop.f32.mrf.mxu0  ;;  %v9282_v7 = vpop.f32.mrf.mxu1 }
0x20c5   : > { %v7302_v17 = vpop.f32.mrf.mxu0 }
0x20c6   : > { %vm7306_vm6 = vcmp.gt.f32.partialorder %v7302_v17, 0.0 }
0x20c7   : > { %v7307_v51 = vsel %vm7306_vm6, %v7302_v17, 1.0  ;;  %v9287_v47 = vpop.f32.mrf.mxu0 }
0x20c8   : > { %9467 = vrcp.f32 %v7307_v51 }
0x20d5   : > { %v9468_v10 = vpop.eup %9467 }
0x20d6   : > { %v7310_v57 = vmul.f32 %v9468_v10, %v7162_v22  ;;  %v7312_v58 = vmul.f32 %v9468_v10, %v7232_v35 }
0x20d8   : > { %v7311_v46 = vsel %vm7306_vm6, %v7310_v57, %v10571_v23  ;;  %v7313_v59 = vsel %vm7306_vm6, %v7312_v58, %v10573_v25 }
0x20d9   : > { %9291 = vmatmul.mubr.msk.f32.vlgmr.msra.gmra.mxu1 %vm1043_vm0, %v7311_v46  ;;  %9296 = vmatmul.mubr.msk.f32.vlgmr.msra.gmra.mxu0 %vm1043_vm0, %v7313_v59 }
0x20da   : > { %9299 = vmatpush3.xpose.msk.msra.mxu1 %vm1061_vm13, %v7463_v60  ;;  %9300 = vmatprep.mubr.msk.f32.mxu1 %vm9507_vm12, %v9506_v37 }
0x20db   : > { %9304 = vmatpush3.msra.mxu0 %v10533_v2  ;;  %9308 = vmatprep.subr.mxu1 %v9506_v37 }
0x20dc   : > { %9305 = vmatprep.mubr.msk.f32.mxu0 %vm9507_vm12, %v9506_v37  ;;  %9313 = vmatprep.subr.mxu0 %v9506_v37 }
0x20dd   : > { %9301 = vmatmul.mubr.msk.f32.vlgmr.msra.gmra.mxu1 %vm1061_vm13, %v9484_v61 }
0x20de   : > { %9309 = vmatpush3.msra.mxu1 %v10536_v30  ;;  %9310 = vmatprep.mubr.msk.f32.mxu1 %vm9507_vm12, %v9506_v37 }
0x20df   : > { %9318 = vmatprep.subr.mxu1 %v9506_v37 }
0x2199   : > { %v7383_v55 = vpop.f32.mrf.mxu1  ;;  %v7457_v62 = vpop.f32.mrf.mxu0 }
0x219a   : > { %v7387_v52 = vadd.f32 %v7383_v55, %v7010_v43  ;;  %v9490_v55 = vld [vmem:[%s10728_s10] ss:$0 sm:$0xff] }
0x219b   : > { %v9292_v15 = vpop.f32.mrf.mxu1  ;;  %v9297_v4 = vpop.f32.mrf.mxu0 }
0x219c   : > { %v7461_v19 = vadd.f32 %v7457_v62, %v7387_v52 }
0x219d   : > { %v7532_v5 = vpop.f32.mrf.mxu1 }
0x219e   : > { %v7536_v40 = vsel %vm1061_vm13, %v7532_v5, -inf }
0x219f   : > { %7537 = vmax.xlane.f32.xlu1 %v7536_v40  ;;  %v9302_v1 = vpop.f32.mrf.mxu1 }
0x2228   : > { %v7538_v50 = vpop.xlane.xlu1 %7537 }
0x2229   : > { %v7539_v8 = vsub.f32 %v7532_v5, %v7538_v50 }
0x222b   : > { %v7540_v49 = vmul.f32 1.442695, %v7539_v8 }
0x222d   : > { %9469 = vpow2.f32 %v7540_v49 }
0x223a   : > { %v9470_v42 = vpop.eup %9469 }
0x223b   : > { %9306 = vmatmul.mubr.msk.f32.vlgmr.msra.gmra.mxu0 %vm1061_vm13, %v9470_v42  ;;  %9311 = vmatmul.mubr.msk.f32.vlgmr.msra.gmra.mxu1 %vm1061_vm13, %v9470_v42 }
0x223c   : > { %9314 = vmatpush3.msk.msra.mxu0 %vm6546_vm3, %v9509_v38  ;;  %9315 = vmatprep.mubr.msk.f32.mxu0 %vm9507_vm12, %v9506_v37 }
0x223d   : > { %9319 = vmatpush3.msk.msra.mxu1 %vm1368_vm7, %v9485_v48  ;;  %9323 = vmatprep.subr.mxu0 %v9506_v37 }
0x223e   : > { %9320 = vmatprep.mubr.msk.f32.mxu1 %vm9507_vm12, %v9506_v37  ;;  %9328 = vmatprep.subr.mxu1 %v9506_v37 }
0x223f   : > { %9316 = vmatmul.mubr.msk.f32.vlgmr.msra.gmra.mxu0 %vm1061_vm13, %v9470_v42 }
0x2240   : > { %9324 = vmatpush3.msk.msra.mxu0 %vm1368_vm7, %v9486_v13  ;;  %9325 = vmatprep.mubr.msk.f32.mxu0 %vm9507_vm12, %v9506_v37 }
0x2241   : > { %9333 = vmatprep.subr.mxu0 %v9506_v37 }
0x22fb   : > { %v7611_v21 = vpop.f32.mrf.mxu0  ;;  %v7681_v24 = vpop.f32.mrf.mxu1 }
0x22fd   : > { %v9307_v12 = vpop.f32.mrf.mxu0  ;;  %v9312_v33 = vpop.f32.mrf.mxu1 }
0x22ff   : > { %v7751_v9 = vpop.f32.mrf.mxu0 }
0x2300   : > { %vm7755_vm8 = vcmp.gt.f32.partialorder %v7751_v9, 0.0 }
0x2301   : > { %v7756_v20 = vsel %vm7755_vm8, %v7751_v9, 1.0  ;;  %v9317_v53 = vpop.f32.mrf.mxu0 }
0x2302   : > { %9471 = vrcp.f32 %v7756_v20 }
0x230f   : > { %v9472_v54 = vpop.eup %9471 }
0x2310   : > { %v7759_v26 = vmul.f32 %v9472_v54, %v7611_v21  ;;  %v7761_v0 = vmul.f32 %v9472_v54, %v7681_v24 }
0x2312   : > { %v7760_v36 = vsel %vm7755_vm8, %v7759_v26, %v10571_v23  ;;  %v7762_v29 = vsel %vm7755_vm8, %v7761_v0, %v10573_v25 }
0x2313   : > { %9321 = vmatmul.mubr.msk.f32.vlgmr.msra.gmra.mxu1 %vm1043_vm0, %v7760_v36  ;;  %9326 = vmatmul.mubr.msk.f32.vlgmr.msra.gmra.mxu0 %vm1043_vm0, %v7762_v29 }
0x2314   : > { %9329 = vmatpush3.xpose.msk.msra.mxu1 %vm1061_vm13, %v7912_v27  ;;  %9330 = vmatprep.mubr.msk.f32.mxu1 %vm9507_vm12, %v9506_v37 }
0x2315   : > { %9334 = vmatpush3.msra.mxu0 %v10533_v2  ;;  %9338 = vmatprep.subr.mxu1 %v9506_v37 }
0x2316   : > { %9335 = vmatprep.mubr.msk.f32.mxu0 %vm9507_vm12, %v9506_v37  ;;  %9343 = vmatprep.subr.mxu0 %v9506_v37 }
0x2317   : > { %9331 = vmatmul.mubr.msk.f32.vlgmr.msra.gmra.mxu1 %vm1061_vm13, %v9487_v28 }
0x2318   : > { %9339 = vmatpush3.msra.mxu1 %v10536_v30  ;;  %9340 = vmatprep.mubr.msk.f32.mxu1 %vm9507_vm12, %v9506_v37 }
0x2319   : > { %9348 = vmatprep.subr.mxu1 %v9506_v37 }
0x23d3   : > { %v7832_v2 = vpop.f32.mrf.mxu1  ;;  %v7906_v39 = vpop.f32.mrf.mxu0 }
0x23d4   : > { %v7836_v14 = vadd.f32 %v7832_v2, %v7461_v19 }
0x23d5   : > { %v9322_v43 = vpop.f32.mrf.mxu1  ;;  %v9327_v63 = vpop.f32.mrf.mxu0 }
0x23d6   : > { %v7910_v18 = vadd.f32 %v7906_v39, %v7836_v14 }
0x23d7   : > { %v7981_v31 = vpop.f32.mrf.mxu1 }
0x23d8   : > { %v7985_v32 = vsel %vm1061_vm13, %v7981_v31, -inf }
0x23d9   : > { %7986 = vmax.xlane.f32.xlu1 %v7985_v32  ;;  %v9332_v45 = vpop.f32.mrf.mxu1 }
0x2462   : > { %v7987_v41 = vpop.xlane.xlu1 %7986 }
0x2463   : > { %v7988_v34 = vsub.f32 %v7981_v31, %v7987_v41 }
0x2465   : > { %v7989_v16 = vmul.f32 1.442695, %v7988_v34 }
0x2467   : > { %9473 = vpow2.f32 %v7989_v16 }
0x2474   : > { %v9474_v30 = vpop.eup %9473 }
0x2475   : > { %9336 = vmatmul.mubr.msk.f32.vlgmr.msra.gmra.mxu0 %vm1061_vm13, %v9474_v30  ;;  %9341 = vmatmul.mubr.msk.f32.vlgmr.msra.gmra.mxu1 %vm1061_vm13, %v9474_v30 }
0x2476   : > { %9344 = vmatpush3.msk.msra.mxu0 %vm6546_vm3, %v9509_v38  ;;  %9345 = vmatprep.mubr.msk.f32.mxu0 %vm9507_vm12, %v9506_v37  ;;  %v9489_v38 = vld [vmem:[%s10727_s9 + $0xc] sm:$0xf] }
0x2477   : > { %9349 = vmatpush3.msk.msra.mxu1 %vm1368_vm7, %v9488_v3  ;;  %9353 = vmatprep.subr.mxu0 %v9506_v37 }
0x2478   : > { %9350 = vmatprep.mubr.msk.f32.mxu1 %vm9507_vm12, %v9506_v37 }
0x2479   : > { %9346 = vmatmul.mubr.msk.f32.vlgmr.msra.gmra.mxu0 %vm1061_vm13, %v9474_v30 }
0x247a   : > { %9354 = vmatpush3.msk.msra.mxu0 %vm1368_vm7, %v9489_v38  ;;  %9355 = vmatprep.mubr.msk.f32.mxu0 %vm9507_vm12, %v9506_v37 }
0x2535   : > { %v8060_v56 = vpop.f32.mrf.mxu0  ;;  %v8130_v11 = vpop.f32.mrf.mxu1 }
0x2537   : > { %v9337_v6 = vpop.f32.mrf.mxu0  ;;  %v9342_v22 = vpop.f32.mrf.mxu1 }
0x2539   : > { %v8200_v35 = vpop.f32.mrf.mxu0 }
0x253a   : > { %vm8204_vm9 = vcmp.gt.f32.partialorder %v8200_v35, 0.0 }
0x253b   : > { %v8205_v44 = vsel %vm8204_vm9, %v8200_v35, 1.0  ;;  %v9347_v7 = vpop.f32.mrf.mxu0 }
0x253c   : > { %9475 = vrcp.f32 %v8205_v44 }
0x2549   : > { %v9476_v17 = vpop.eup %9475 }
0x254a   : > { %v8208_v51 = vmul.f32 %v9476_v17, %v8060_v56  ;;  %v8210_v47 = vmul.f32 %v9476_v17, %v8130_v11 }
0x254c   : > { %v8209_v10 = vsel %vm8204_vm9, %v8208_v51, %v10571_v23  ;;  %v8211_v57 = vsel %vm8204_vm9, %v8210_v47, %v10573_v25 }
0x254d   : > { %9351 = vmatmul.mubr.msk.f32.vlgmr.msra.gmra.mxu1 %vm1043_vm0, %v8209_v10  ;;  %9356 = vmatmul.mubr.msk.f32.vlgmr.msra.gmra.mxu0 %vm1043_vm0, %v8211_v57 }
0x260d   : > { %v8281_v37 = vpop.f32.mrf.mxu1  ;;  %v8355_v58 = vpop.f32.mrf.mxu0 }
0x260e   : > { %v8285_v46 = vadd.f32 %v8281_v37, %v7910_v18 }
0x260f   : > { %v9352_v59 = vpop.f32.mrf.mxu1  ;;  %v9357_v60 = vpop.f32.mrf.mxu0 }
0x2610   : > { %v8359_v61 = vadd.f32 %v8355_v58, %v8285_v46 }
0x2612   : > { %v8360_v62 = vadd.f32 %v9490_v55, %v8359_v61 }
0x2614   : > { %8661 = vst [vmem:[%s10138_s14 + $0x18] sm:$0xff] %v8360_v62 }
0x2615 PF: > { %s21_s17 = sadd.s32 1, %s9497_s17  }
0x2616   : > { %p18_p4 = scmp.ge.s32.totalorder %s21_s17, 4  }
0x2618   :  { %20 = sbr.rel (!%p18_p4) target bundleno = 1 (0x1), region = 118 }

</bundles_post_ra>
